<compile_context>
chip_gen: v7x
topology: tpu7x:2x2x1
jax: 0.10.0
libtpu: 0.0.40
codegen_flags: <defaults>
</compile_context>

<pallas_src>
import math
from functools import partial

import jax
import jax.numpy as jnp
from jax import lax
from jax.experimental import pallas as pl
from jax.experimental.pallas import tpu as pltpu

# ---------------------------------------------------------------------------
# Module-consistent (small) hyper-parameters
# ---------------------------------------------------------------------------
N_VOCAB = 16
D_MODEL = 32
N_LAYERS = 2
N_HEAD = 4
D_K = 8
D_V = 8
D_INNER = 64
N_SEQ_MAX = 64
PAD_ID = 0
LN_EPS = 1e-6

HK = N_HEAD * D_K          # 32
HV = N_HEAD * D_V          # 32
PRJ_PAD = 128              # lane-dense projection width (multiple of 128 >= N_VOCAB)

# ---- packed-weight blob layout (all section offsets 8-row aligned) ---------
# 32-column blob: emb | ln0 | pos_table | per-layer [Wq Wk Wv Wo ln w2 b2]
EMB_OFF = 0
LN0_OFF = EMB_OFF + N_VOCAB            # 16 (rows 16/17 used)
POS_OFF = LN0_OFF + 8                  # 24
LAYER_OFF = POS_OFF + N_SEQ_MAX        # 88
WQ_OFF = 0
WK_OFF = WQ_OFF + D_MODEL              # 32
WV_OFF = WK_OFF + D_MODEL              # 64
WO_OFF = WV_OFF + D_MODEL              # 96
LNL_OFF = WO_OFF + HV                  # 128 (4 rows used)
W2_OFF = LNL_OFF + 8                   # 136
B2_OFF = W2_OFF + D_INNER              # 200 (1 row used)
LAYER_STRIDE = B2_OFF + 8              # 208
W32_ROWS = LAYER_OFF + N_LAYERS * LAYER_STRIDE        # 504

# 64-column blob: per-layer [w1 | b1]
W1_OFF = 0
B1_OFF = W1_OFF + D_MODEL              # 32 (1 row used)
L64_STRIDE = B1_OFF + 8                # 40
W64_ROWS = N_LAYERS * L64_STRIDE       # 80


def _layer_norm(x, g, b):
    mu = jnp.mean(x, axis=-1, keepdims=True)
    var = jnp.mean((x - mu) ** 2, axis=-1, keepdims=True)
    return (x - mu) * jax.lax.rsqrt(var + LN_EPS) * g + b


# ---------------------------------------------------------------------------
# Fused Pallas kernel: embed -> ln0 -> N_LAYERS encoder layers -> shared proj
# ---------------------------------------------------------------------------
def _fused_decoder_kernel(seq_ref, sum_ref, w32_ref, w64_ref, wprj_ref, o_ref,
                          *, tile_b, seq_len):
    tB, L = tile_b, seq_len
    N = tB * L

    tok = seq_ref[...]                                            # (tB, L) int32

    # ---- causal + key-padding mask, built per batch tile (never (B,L,L)) ----
    key_ok = (tok != PAD_ID)[:, None, :]                          # (tB, 1, L)
    q_pos = lax.broadcasted_iota(jnp.int32, (L, L), 0)
    k_pos = lax.broadcasted_iota(jnp.int32, (L, L), 1)
    allow = key_ok & (k_pos <= q_pos)[None, :, :]                 # (tB, L, L) bool

    # ---- embedding lookup as a one-hot matmul (gather-free, MXU friendly) ---
    emb = w32_ref[EMB_OFF:EMB_OFF + N_VOCAB, :]                   # (V, D)
    onehot = jnp.where(
        tok[:, :, None] == lax.broadcasted_iota(jnp.int32, (tB, L, N_VOCAB), 2),
        1.0, 0.0)                                                 # (tB, L, V) f32
    x3 = jnp.dot(onehot.reshape(N, N_VOCAB), emb,
                 preferred_element_type=jnp.float32).reshape(tB, L, D_MODEL)

    # ---- summary injection at position 0, then positional encoding ----------
    is_head = lax.broadcasted_iota(jnp.int32, (tB, L, 1), 1) == 0
    x3 = jnp.where(is_head, sum_ref[...][:, None, :], x3)
    pos = w32_ref[POS_OFF:POS_OFF + L, :]                         # (L, D)
    x = (x3 + pos[None, :, :]).reshape(N, D_MODEL)
    # dropout layers: eval-mode identity

    # ---- pre-stack LayerNorm ----
    x = _layer_norm(x, w32_ref[LN0_OFF:LN0_OFF + 1, :],
                    w32_ref[LN0_OFF + 1:LN0_OFF + 2, :])

    for l in range(N_LAYERS):                                     # static unroll
        base = LAYER_OFF + l * LAYER_STRIDE
        wq = w32_ref[base + WQ_OFF:base + WQ_OFF + D_MODEL, :]    # (D, HK), *1/sqrt(dk)
        wk = w32_ref[base + WK_OFF:base + WK_OFF + D_MODEL, :]
        wv = w32_ref[base + WV_OFF:base + WV_OFF + D_MODEL, :]

        # Multi-head self-attention: heads are split on the tiny weight tiles
        # (static column windows); the (N, .) activations are never lane-sliced
        # or concatenated — per-head contexts fold back via per-head Wo dots.
        attn = None
        for h in range(N_HEAD):
            ck = h * D_K
            qh = jnp.dot(x, wq[:, ck:ck + D_K],
                         preferred_element_type=jnp.float32).reshape(tB, L, D_K)
            kh = jnp.dot(x, wk[:, ck:ck + D_K],
                         preferred_element_type=jnp.float32).reshape(tB, L, D_K)
            vh = jnp.dot(x, wv[:, ck:ck + D_V],
                         preferred_element_type=jnp.float32).reshape(tB, L, D_V)
            s = jnp.einsum('bqd,bkd->bqk', qh, kh,
                           preferred_element_type=jnp.float32)    # (tB, L, L)
            s = jnp.where(allow, s, -1e9)
            s = s - jnp.max(s, axis=-1, keepdims=True)
            p = jnp.exp(s)
            p = p / jnp.sum(p, axis=-1, keepdims=True)
            ctx = jnp.einsum('bqk,bkd->bqd', p, vh,
                             preferred_element_type=jnp.float32).reshape(N, D_V)
            wo_h = w32_ref[base + WO_OFF + h * D_V:
                           base + WO_OFF + (h + 1) * D_V, :]      # (dv, D)
            part = jnp.dot(ctx, wo_h, preferred_element_type=jnp.float32)
            attn = part if attn is None else attn + part
        # attention / residual dropout: eval-mode identity
        x = _layer_norm(attn + x,
                        w32_ref[base + LNL_OFF:base + LNL_OFF + 1, :],
                        w32_ref[base + LNL_OFF + 1:base + LNL_OFF + 2, :])

        # Position-wise FFN
        b64 = l * L64_STRIDE
        w1 = w64_ref[b64 + W1_OFF:b64 + W1_OFF + D_MODEL, :]      # (D, D_INNER)
        b1 = w64_ref[b64 + B1_OFF:b64 + B1_OFF + 1, :]            # (1, D_INNER)
        h1 = jnp.maximum(jnp.dot(x, w1, preferred_element_type=jnp.float32) + b1, 0.0)
        w2 = w32_ref[base + W2_OFF:base + W2_OFF + D_INNER, :]    # (D_INNER, D)
        b2 = w32_ref[base + B2_OFF:base + B2_OFF + 1, :]          # (1, D)
        h2 = jnp.dot(h1, w2, preferred_element_type=jnp.float32) + b2
        x = _layer_norm(h2 + x,
                        w32_ref[base + LNL_OFF + 2:base + LNL_OFF + 3, :],
                        w32_ref[base + LNL_OFF + 3:base + LNL_OFF + 4, :])

    # ---- shared-weight word projection (scale folded in, 128-lane dense) ----
    logits = jnp.dot(x, wprj_ref[...], preferred_element_type=jnp.float32)   # (N, 128)
    o_ref[...] = logits.reshape(tB, L, PRJ_PAD)


# ---------------------------------------------------------------------------
# Parameters: deterministic synthetic init + one-time packing into 3 blobs
# ---------------------------------------------------------------------------
def sinusoid_table(n_position, d_model):
    pos = jnp.arange(n_position, dtype=jnp.float32)[:, None]
    i = jnp.arange(d_model)[None, :]
    angle = pos / jnp.power(10000.0, (2 * (i // 2)).astype(jnp.float32) / d_model)
    return jnp.where(i % 2 == 0, jnp.sin(angle), jnp.cos(angle)).astype(jnp.float32)


def _pack_params(raw):
    """Pack everything the kernel needs into three contiguous blobs, folding
    1/sqrt(d_k) into Wq and d_model**-0.5 into the shared word projection."""
    w32 = jnp.zeros((W32_ROWS, D_MODEL), jnp.float32)
    w32 = w32.at[EMB_OFF:EMB_OFF + N_VOCAB].set(raw['emb'])
    w32 = w32.at[LN0_OFF].set(raw['ln0_g'])
    w32 = w32.at[LN0_OFF + 1].set(raw['ln0_b'])
    w32 = w32.at[POS_OFF:POS_OFF + N_SEQ_MAX].set(raw['pos_table'])
    inv_temp = 1.0 / math.sqrt(D_K)
    for l in range(N_LAYERS):
        base = LAYER_OFF + l * LAYER_STRIDE
        w32 = w32.at[base + WQ_OFF:base + WQ_OFF + D_MODEL].set(raw['wq'][l] * inv_temp)
        w32 = w32.at[base + WK_OFF:base + WK_OFF + D_MODEL].set(raw['wk'][l])
        w32 = w32.at[base + WV_OFF:base + WV_OFF + D_MODEL].set(raw['wv'][l])
        w32 = w32.at[base + WO_OFF:base + WO_OFF + HV].set(raw['wo'][l])
        w32 = w32.at[base + LNL_OFF].set(raw['ln1_g'][l])
        w32 = w32.at[base + LNL_OFF + 1].set(raw['ln1_b'][l])
        w32 = w32.at[base + LNL_OFF + 2].set(raw['ln2_g'][l])
        w32 = w32.at[base + LNL_OFF + 3].set(raw['ln2_b'][l])
        w32 = w32.at[base + W2_OFF:base + W2_OFF + D_INNER].set(raw['w2'][l])
        w32 = w32.at[base + B2_OFF].set(raw['b2'][l])

    w64 = jnp.zeros((W64_ROWS, D_INNER), jnp.float32)
    for l in range(N_LAYERS):
        b = l * L64_STRIDE
        w64 = w64.at[b + W1_OFF:b + W1_OFF + D_MODEL].set(raw['w1'][l])
        w64 = w64.at[b + B1_OFF].set(raw['b1'][l])

    wprj = jnp.zeros((D_MODEL, PRJ_PAD), jnp.float32)
    wprj = wprj.at[:, :N_VOCAB].set(raw['emb'].T * D_MODEL ** (-0.5))
    return w32, w64, wprj


def init_params(key):
    keys = jax.random.split(key, 1 + 6 * N_LAYERS)
    rnd = lambda k, shape: jax.random.normal(k, shape, jnp.float32) * 0.02
    emb = rnd(keys[0], (N_VOCAB, D_MODEL)).at[PAD_ID].set(0.0)   # padding_idx row
    wq, wk, wv, wo, w1, w2 = [], [], [], [], [], []
    for l in range(N_LAYERS):
        k = keys[1 + 6 * l: 1 + 6 * (l + 1)]
        wq.append(rnd(k[0], (D_MODEL, HK)))
        wk.append(rnd(k[1], (D_MODEL, HK)))
        wv.append(rnd(k[2], (D_MODEL, HV)))
        wo.append(rnd(k[3], (HV, D_MODEL)))
        w1.append(rnd(k[4], (D_MODEL, D_INNER)))
        w2.append(rnd(k[5], (D_INNER, D_MODEL)))
    raw = dict(
        emb=emb, pos_table=sinusoid_table(N_SEQ_MAX, D_MODEL),
        ln0_g=jnp.ones((D_MODEL,), jnp.float32),
        ln0_b=jnp.zeros((D_MODEL,), jnp.float32),
        wq=jnp.stack(wq), wk=jnp.stack(wk), wv=jnp.stack(wv), wo=jnp.stack(wo),
        ln1_g=jnp.ones((N_LAYERS, D_MODEL), jnp.float32),
        ln1_b=jnp.zeros((N_LAYERS, D_MODEL), jnp.float32),
        ln2_g=jnp.ones((N_LAYERS, D_MODEL), jnp.float32),
        ln2_b=jnp.zeros((N_LAYERS, D_MODEL), jnp.float32),
        w1=jnp.stack(w1), b1=jnp.zeros((N_LAYERS, D_INNER), jnp.float32),
        w2=jnp.stack(w2), b2=jnp.zeros((N_LAYERS, D_MODEL), jnp.float32),
    )
    w32, w64, wprj = _pack_params(raw)
    return dict(raw=raw, w32=w32, w64=w64, wprj=wprj)


# ---------------------------------------------------------------------------
# Forward pass: single pallas_call over a batch-tiled parallel grid
# ---------------------------------------------------------------------------
def _pick_tile_b(batch, seq_pad, target_rows=512):
    """Largest batch tile that divides `batch`, is a multiple of 8 (or the whole
    batch) and keeps ~target_rows activation rows per grid step."""
    if batch * seq_pad <= target_rows:
        return batch
    cands = [t for t in range(8, batch, 8)
             if batch % t == 0 and t * seq_pad <= target_rows]
    return max(cands) if cands else batch


def seqvae_decoder_head_forward(params, seq, summary):
    B, T = seq.shape
    L = T + 1                                    # +1 summary head token
    Lp = ((L + 7) // 8) * 8                      # sublane-aligned sequence length
    assert Lp <= N_SEQ_MAX, "sequence (plus summary head) exceeds positional table"

    head = jnp.full((B, 1), N_VOCAB - 1, dtype=jnp.int32)       # summary_id token
    full_seq = jnp.concatenate([head, seq.astype(jnp.int32)], axis=1)
    full_seq = jnp.pad(full_seq, ((0, 0), (0, Lp - L)), constant_values=PAD_ID)

    tile_b = _pick_tile_b(B, Lp)
    grid = (B // tile_b,)
    kernel = partial(_fused_decoder_kernel, tile_b=tile_b, seq_len=Lp)

    logits = pl.pallas_call(
        kernel,
        out_shape=jax.ShapeDtypeStruct((B, Lp, PRJ_PAD), jnp.float32),
        grid=grid,
        in_specs=[
            pl.BlockSpec((tile_b, Lp), lambda i: (i, 0)),            # token ids
            pl.BlockSpec((tile_b, D_MODEL), lambda i: (i, 0)),       # summaries
            pl.BlockSpec((W32_ROWS, D_MODEL), lambda i: (0, 0)),     # resident weights
            pl.BlockSpec((W64_ROWS, D_INNER), lambda i: (0, 0)),
            pl.BlockSpec((D_MODEL, PRJ_PAD), lambda i: (0, 0)),
        ],
        out_specs=pl.BlockSpec((tile_b, Lp, PRJ_PAD), lambda i: (i, 0, 0)),
        compiler_params=pltpu.CompilerParams(
            dimension_semantics=("parallel",)),                      # 2 TCs on v7x
    )(full_seq, summary.astype(jnp.float32),
      params['w32'], params['w64'], params['wprj'])

    return logits[:, 1:L, :N_VOCAB]              # drop head token, seq pad, lane pad


# ---------------------------------------------------------------------------
# Pure-JAX reference (same semantics) for a correctness sanity check
# ---------------------------------------------------------------------------
def _reference_forward(params, seq, summary):
    raw = params['raw']
    B, T = seq.shape
    full_seq = jnp.concatenate(
        [jnp.full((B, 1), N_VOCAB - 1, seq.dtype), seq], axis=1)
    L = T + 1
    mask = (full_seq != PAD_ID)[:, None, :] & jnp.tril(jnp.ones((L, L), bool))[None]
    x = jnp.take(raw['emb'], full_seq, axis=0)
    x = x.at[:, 0, :].set(summary)
    x = x + raw['pos_table'][None, :L, :]
    x = _layer_norm(x, raw['ln0_g'], raw['ln0_b'])
    for l in range(N_LAYERS):
        heads = []
        for h in range(N_HEAD):
            q = x @ raw['wq'][l][:, h * D_K:(h + 1) * D_K]
            k = x @ raw['wk'][l][:, h * D_K:(h + 1) * D_K]
            v = x @ raw['wv'][l][:, h * D_V:(h + 1) * D_V]
            s = jnp.einsum('bqd,bkd->bqk', q, k) / math.sqrt(D_K)
            s = jnp.where(mask, s, -1e9)
            heads.append(jnp.einsum('bqk,bkd->bqd', jax.nn.softmax(s, axis=-1), v))
        ctx = jnp.concatenate(heads, axis=-1)
        x = _layer_norm(ctx @ raw['wo'][l] + x, raw['ln1_g'][l], raw['ln1_b'][l])
        h1 = jax.nn.relu(x @ raw['w1'][l] + raw['b1'][l])
        h2 = h1 @ raw['w2'][l] + raw['b2'][l]
        x = _layer_norm(h2 + x, raw['ln2_g'][l], raw['ln2_b'][l])
    logits = jnp.einsum('btd,vd->btv', x, raw['emb']) * D_MODEL ** (-0.5)
    return logits[:, 1:]


if __name__ == "__main__":
    key = jax.random.PRNGKey(0)
    pkey, skey, sumkey = jax.random.split(key, 3)
    params = init_params(pkey)

    B, T = 2, 8
    seq = jax.random.randint(skey, (B, T), 1, N_VOCAB - 1, dtype=jnp.int32)
    seq = seq.at[1, T - 2:].set(PAD_ID)          # exercise the key-padding mask
    summary = jax.random.normal(sumkey, (B, D_MODEL), jnp.float32)

    logits = jax.block_until_ready(seqvae_decoder_head_forward(params, seq, summary))
    assert logits.shape == (B, T, N_VOCAB), logits.shape
    assert bool(jnp.all(jnp.isfinite(logits)))

    ref = jax.block_until_ready(_reference_forward(params, seq, summary))
    max_err = float(jnp.max(jnp.abs(logits - ref)))
    assert max_err < 2e-3, f"max abs error vs reference: {max_err}"

    print("KERNEL_OK")
</pallas_src>

<mosaic_0001>
module attributes {stable_mosaic.version = 11 : i64} {
  func.func @_fused_decoder_kernel(%arg0: i32, %arg1: memref<2x16xi32, #tpu.memory_space<vmem>>, %arg2: memref<2x32xf32, #tpu.memory_space<vmem>>, %arg3: memref<504x32xf32, #tpu.memory_space<vmem>>, %arg4: memref<80x64xf32, #tpu.memory_space<vmem>>, %arg5: memref<32x128xf32, #tpu.memory_space<vmem>>, %arg6: memref<2x16x128xf32, #tpu.memory_space<vmem>>) attributes {dimension_semantics = [#tpu.dimension_semantics<parallel>], iteration_bounds = array<i64: 1>, scalar_prefetch = 0 : i64, scratch_operands = 0 : i64, tpu.core_type = #tpu.core_type<tc>, window_params = [{transform_indices = @transform_0, window_bounds = array<i64: 2, 16>}, {transform_indices = @transform_1, window_bounds = array<i64: 2, 32>}, {pipeline_mode = #tpu.pipeline_mode<synchronous>, transform_indices = @transform_2, window_bounds = array<i64: 504, 32>}, {pipeline_mode = #tpu.pipeline_mode<synchronous>, transform_indices = @transform_3, window_bounds = array<i64: 80, 64>}, {pipeline_mode = #tpu.pipeline_mode<synchronous>, transform_indices = @transform_4, window_bounds = array<i64: 32, 128>}, {transform_indices = @transform_5, window_bounds = array<i64: 2, 16, 128>}]} {
    %c0 = arith.constant 0 : index
    %c0_0 = arith.constant 0 : index
    %0 = vector.load %arg1[%c0, %c0_0] : memref<2x16xi32, #tpu.memory_space<vmem>>, vector<2x16xi32>
    %c0_i32 = arith.constant 0 : i32
    %1 = vector.broadcast %c0_i32 : i32 to vector<2x16xi32>
    %2 = arith.cmpi ne, %0, %1 : vector<2x16xi32>
    %3 = vector.shape_cast %2 : vector<2x16xi1> to vector<2x1x16xi1>
    %4 = tpu.iota {dimensions = array<i32: 0>} : vector<16x16xi32>
    %5 = tpu.iota {dimensions = array<i32: 1>} : vector<16x16xi32>
    %6 = arith.cmpi sle, %5, %4 : vector<16x16xi32>
    %7 = vector.shape_cast %6 : vector<16x16xi1> to vector<1x16x16xi1>
    %8 = vector.broadcast %3 : vector<2x1x16xi1> to vector<2x16x16xi1>
    %9 = vector.broadcast %7 : vector<1x16x16xi1> to vector<2x16x16xi1>
    %10 = arith.andi %8, %9 : vector<2x16x16xi1>
    %c0_1 = arith.constant 0 : index
    %c0_2 = arith.constant 0 : index
    %11 = vector.load %arg3[%c0_1, %c0_2] : memref<504x32xf32, #tpu.memory_space<vmem>>, vector<16x32xf32>
    %12 = vector.shape_cast %0 : vector<2x16xi32> to vector<2x16x1xi32>
    %13 = tpu.iota {dimensions = array<i32: 2>} : vector<2x16x16xi32>
    %14 = vector.broadcast %12 : vector<2x16x1xi32> to vector<2x16x16xi32>
    %15 = arith.cmpi eq, %14, %13 : vector<2x16x16xi32>
    %cst = arith.constant 1.000000e+00 : f32
    %cst_3 = arith.constant 0.000000e+00 : f32
    %16 = vector.broadcast %cst : f32 to vector<2x16x16xf32>
    %17 = vector.broadcast %cst_3 : f32 to vector<2x16x16xf32>
    %18 = arith.select %15, %16, %17 : vector<2x16x16xi1>, vector<2x16x16xf32>
    %19 = vector.shape_cast %18 : vector<2x16x16xf32> to vector<32x16xf32>
    %cst_4 = arith.constant dense<0.000000e+00> : vector<32x32xf32>
    %20 = tpu.matmul %19, %11, %cst_4 {dimension_numbers = #tpu.dot_dimension_numbers<[1], [0], [0], [1], [0, 0, 1, 1], [], []>} : vector<32x16xf32>, vector<16x32xf32>, vector<32x32xf32> -> vector<32x32xf32>
    %21 = vector.shape_cast %20 : vector<32x32xf32> to vector<2x16x32xf32>
    %22 = tpu.iota {dimensions = array<i32: 1>} : vector<2x16x1xi32>
    %c0_i32_5 = arith.constant 0 : i32
    %23 = vector.broadcast %c0_i32_5 : i32 to vector<2x16x1xi32>
    %24 = arith.cmpi eq, %22, %23 : vector<2x16x1xi32>
    %c0_6 = arith.constant 0 : index
    %c0_7 = arith.constant 0 : index
    %25 = vector.load %arg2[%c0_6, %c0_7] : memref<2x32xf32, #tpu.memory_space<vmem>>, vector<2x32xf32>
    %26 = vector.shape_cast %25 : vector<2x32xf32> to vector<2x1x32xf32>
    %27 = vector.shape_cast %24 : vector<2x16x1xi1> to vector<2x16x1xi1>
    %28 = vector.broadcast %27 : vector<2x16x1xi1> to vector<2x16x32xi1>
    %29 = vector.shape_cast %26 : vector<2x1x32xf32> to vector<2x1x32xf32>
    %30 = vector.broadcast %29 : vector<2x1x32xf32> to vector<2x16x32xf32>
    %31 = arith.select %28, %30, %21 : vector<2x16x32xi1>, vector<2x16x32xf32>
    %c24 = arith.constant 24 : index
    %c0_8 = arith.constant 0 : index
    %32 = vector.load %arg3[%c24, %c0_8] : memref<504x32xf32, #tpu.memory_space<vmem>>, vector<16x32xf32>
    %33 = vector.shape_cast %32 : vector<16x32xf32> to vector<1x16x32xf32>
    %34 = vector.broadcast %33 : vector<1x16x32xf32> to vector<2x16x32xf32>
    %35 = arith.addf %31, %34 : vector<2x16x32xf32>
    %36 = vector.shape_cast %35 : vector<2x16x32xf32> to vector<32x32xf32>
    %c16 = arith.constant 16 : index
    %c0_9 = arith.constant 0 : index
    %37 = vector.load %arg3[%c16, %c0_9] : memref<504x32xf32, #tpu.memory_space<vmem>>, vector<1x32xf32>
    %c17 = arith.constant 17 : index
    %c0_10 = arith.constant 0 : index
    %38 = vector.load %arg3[%c17, %c0_10] : memref<504x32xf32, #tpu.memory_space<vmem>>, vector<1x32xf32>
    %cst_11 = arith.constant dense<0.000000e+00> : vector<32xf32>
    %39 = vector.multi_reduction <add>, %36, %cst_11 [1] : vector<32x32xf32> to vector<32xf32>
    %40 = vector.shape_cast %39 : vector<32xf32> to vector<32x1xf32>
    %cst_12 = arith.constant 3.200000e+01 : f32
    %41 = vector.broadcast %cst_12 : f32 to vector<32x1xf32>
    %42 = arith.divf %40, %41 : vector<32x1xf32>
    %43 = vector.broadcast %42 : vector<32x1xf32> to vector<32x32xf32>
    %44 = arith.subf %36, %43 : vector<32x32xf32>
    %45 = arith.mulf %44, %44 : vector<32x32xf32>
    %cst_13 = arith.constant dense<0.000000e+00> : vector<32xf32>
    %46 = vector.multi_reduction <add>, %45, %cst_13 [1] : vector<32x32xf32> to vector<32xf32>
    %47 = vector.shape_cast %46 : vector<32xf32> to vector<32x1xf32>
    %cst_14 = arith.constant 3.200000e+01 : f32
    %48 = vector.broadcast %cst_14 : f32 to vector<32x1xf32>
    %49 = arith.divf %47, %48 : vector<32x1xf32>
    %50 = vector.broadcast %42 : vector<32x1xf32> to vector<32x32xf32>
    %51 = arith.subf %36, %50 : vector<32x32xf32>
    %cst_15 = arith.constant 9.99999997E-7 : f32
    %52 = vector.broadcast %cst_15 : f32 to vector<32x1xf32>
    %53 = arith.addf %49, %52 : vector<32x1xf32>
    %54 = math.rsqrt %53 : vector<32x1xf32>
    %55 = vector.broadcast %54 : vector<32x1xf32> to vector<32x32xf32>
    %56 = arith.mulf %51, %55 : vector<32x32xf32>
    %57 = vector.broadcast %37 : vector<1x32xf32> to vector<32x32xf32>
    %58 = arith.mulf %56, %57 : vector<32x32xf32>
    %59 = vector.broadcast %38 : vector<1x32xf32> to vector<32x32xf32>
    %60 = arith.addf %58, %59 : vector<32x32xf32>
    %c88 = arith.constant 88 : index
    %c0_16 = arith.constant 0 : index
    %61 = vector.load %arg3[%c88, %c0_16] : memref<504x32xf32, #tpu.memory_space<vmem>>, vector<32x32xf32>
    %c120 = arith.constant 120 : index
    %c0_17 = arith.constant 0 : index
    %62 = vector.load %arg3[%c120, %c0_17] : memref<504x32xf32, #tpu.memory_space<vmem>>, vector<32x32xf32>
    %c152 = arith.constant 152 : index
    %c0_18 = arith.constant 0 : index
    %63 = vector.load %arg3[%c152, %c0_18] : memref<504x32xf32, #tpu.memory_space<vmem>>, vector<32x32xf32>
    %64 = vector.extract_strided_slice %61 {offsets = [0, 0], sizes = [32, 8], strides = [1, 1]} : vector<32x32xf32> to vector<32x8xf32>
    %cst_19 = arith.constant dense<0.000000e+00> : vector<32x8xf32>
    %65 = tpu.matmul %60, %64, %cst_19 {dimension_numbers = #tpu.dot_dimension_numbers<[1], [0], [0], [1], [0, 0, 1, 1], [], []>} : vector<32x32xf32>, vector<32x8xf32>, vector<32x8xf32> -> vector<32x8xf32>
    %66 = vector.shape_cast %65 : vector<32x8xf32> to vector<2x16x8xf32>
    %67 = vector.extract_strided_slice %62 {offsets = [0, 0], sizes = [32, 8], strides = [1, 1]} : vector<32x32xf32> to vector<32x8xf32>
    %cst_20 = arith.constant dense<0.000000e+00> : vector<32x8xf32>
    %68 = tpu.matmul %60, %67, %cst_20 {dimension_numbers = #tpu.dot_dimension_numbers<[1], [0], [0], [1], [0, 0, 1, 1], [], []>} : vector<32x32xf32>, vector<32x8xf32>, vector<32x8xf32> -> vector<32x8xf32>
    %69 = vector.shape_cast %68 : vector<32x8xf32> to vector<2x16x8xf32>
    %70 = vector.extract_strided_slice %63 {offsets = [0, 0], sizes = [32, 8], strides = [1, 1]} : vector<32x32xf32> to vector<32x8xf32>
    %cst_21 = arith.constant dense<0.000000e+00> : vector<32x8xf32>
    %71 = tpu.matmul %60, %70, %cst_21 {dimension_numbers = #tpu.dot_dimension_numbers<[1], [0], [0], [1], [0, 0, 1, 1], [], []>} : vector<32x32xf32>, vector<32x8xf32>, vector<32x8xf32> -> vector<32x8xf32>
    %72 = vector.shape_cast %71 : vector<32x8xf32> to vector<2x16x8xf32>
    "tpu.trace_start"() <{level = 10 : i32, message = "bqd,bkd->bqk"}> : () -> ()
    %cst_22 = arith.constant dense<0.000000e+00> : vector<2x16x16xf32>
    %73 = tpu.matmul %66, %69, %cst_22 {dimension_numbers = #tpu.dot_dimension_numbers<[2], [2], [1], [1], [0, 0, 0, 1, 1, 1], [0], [0]>} : vector<2x16x8xf32>, vector<2x16x8xf32>, vector<2x16x16xf32> -> vector<2x16x16xf32>
    %cst_23 = arith.constant -1.000000e+09 : f32
    "tpu.trace_stop"() : () -> ()
    %74 = vector.broadcast %cst_23 : f32 to vector<2x16x16xf32>
    %75 = arith.select %10, %73, %74 : vector<2x16x16xi1>, vector<2x16x16xf32>
    %cst_24 = arith.constant dense<0xFF800000> : vector<2x16xf32>
    %76 = vector.multi_reduction <maximumf>, %75, %cst_24 [2] : vector<2x16x16xf32> to vector<2x16xf32>
    %77 = vector.shape_cast %76 : vector<2x16xf32> to vector<2x16x1xf32>
    %78 = vector.broadcast %77 : vector<2x16x1xf32> to vector<2x16x16xf32>
    %79 = arith.subf %75, %78 : vector<2x16x16xf32>
    %80 = math.exp %79 : vector<2x16x16xf32>
    %cst_25 = arith.constant dense<0.000000e+00> : vector<2x16xf32>
    %81 = vector.multi_reduction <add>, %80, %cst_25 [2] : vector<2x16x16xf32> to vector<2x16xf32>
    %82 = vector.shape_cast %81 : vector<2x16xf32> to vector<2x16x1xf32>
    %83 = vector.broadcast %82 : vector<2x16x1xf32> to vector<2x16x16xf32>
    %84 = arith.divf %80, %83 : vector<2x16x16xf32>
    "tpu.trace_start"() <{level = 10 : i32, message = "bqk,bkd->bqd"}> : () -> ()
    %cst_26 = arith.constant dense<0.000000e+00> : vector<2x16x8xf32>
    %85 = tpu.matmul %84, %72, %cst_26 {dimension_numbers = #tpu.dot_dimension_numbers<[2], [1], [1], [2], [0, 0, 0, 1, 1, 2], [0], [0]>} : vector<2x16x16xf32>, vector<2x16x8xf32>, vector<2x16x8xf32> -> vector<2x16x8xf32>
    "tpu.trace_stop"() : () -> ()
    %86 = vector.shape_cast %85 : vector<2x16x8xf32> to vector<32x8xf32>
    %c184 = arith.constant 184 : index
    %c0_27 = arith.constant 0 : index
    %87 = vector.load %arg3[%c184, %c0_27] : memref<504x32xf32, #tpu.memory_space<vmem>>, vector<8x32xf32>
    %cst_28 = arith.constant dense<0.000000e+00> : vector<32x32xf32>
    %88 = tpu.matmul %86, %87, %cst_28 {dimension_numbers = #tpu.dot_dimension_numbers<[1], [0], [0], [1], [0, 0, 1, 1], [], []>} : vector<32x8xf32>, vector<8x32xf32>, vector<32x32xf32> -> vector<32x32xf32>
    %89 = vector.extract_strided_slice %61 {offsets = [0, 8], sizes = [32, 8], strides = [1, 1]} : vector<32x32xf32> to vector<32x8xf32>
    %cst_29 = arith.constant dense<0.000000e+00> : vector<32x8xf32>
    %90 = tpu.matmul %60, %89, %cst_29 {dimension_numbers = #tpu.dot_dimension_numbers<[1], [0], [0], [1], [0, 0, 1, 1], [], []>} : vector<32x32xf32>, vector<32x8xf32>, vector<32x8xf32> -> vector<32x8xf32>
    %91 = vector.shape_cast %90 : vector<32x8xf32> to vector<2x16x8xf32>
    %92 = vector.extract_strided_slice %62 {offsets = [0, 8], sizes = [32, 8], strides = [1, 1]} : vector<32x32xf32> to vector<32x8xf32>
    %cst_30 = arith.constant dense<0.000000e+00> : vector<32x8xf32>
    %93 = tpu.matmul %60, %92, %cst_30 {dimension_numbers = #tpu.dot_dimension_numbers<[1], [0], [0], [1], [0, 0, 1, 1], [], []>} : vector<32x32xf32>, vector<32x8xf32>, vector<32x8xf32> -> vector<32x8xf32>
    %94 = vector.shape_cast %93 : vector<32x8xf32> to vector<2x16x8xf32>
    %95 = vector.extract_strided_slice %63 {offsets = [0, 8], sizes = [32, 8], strides = [1, 1]} : vector<32x32xf32> to vector<32x8xf32>
    %cst_31 = arith.constant dense<0.000000e+00> : vector<32x8xf32>
    %96 = tpu.matmul %60, %95, %cst_31 {dimension_numbers = #tpu.dot_dimension_numbers<[1], [0], [0], [1], [0, 0, 1, 1], [], []>} : vector<32x32xf32>, vector<32x8xf32>, vector<32x8xf32> -> vector<32x8xf32>
    %97 = vector.shape_cast %96 : vector<32x8xf32> to vector<2x16x8xf32>
    "tpu.trace_start"() <{level = 10 : i32, message = "bqd,bkd->bqk"}> : () -> ()
    %cst_32 = arith.constant dense<0.000000e+00> : vector<2x16x16xf32>
    %98 = tpu.matmul %91, %94, %cst_32 {dimension_numbers = #tpu.dot_dimension_numbers<[2], [2], [1], [1], [0, 0, 0, 1, 1, 1], [0], [0]>} : vector<2x16x8xf32>, vector<2x16x8xf32>, vector<2x16x16xf32> -> vector<2x16x16xf32>
    %cst_33 = arith.constant -1.000000e+09 : f32
    "tpu.trace_stop"() : () -> ()
    %99 = vector.broadcast %cst_33 : f32 to vector<2x16x16xf32>
    %100 = arith.select %10, %98, %99 : vector<2x16x16xi1>, vector<2x16x16xf32>
    %cst_34 = arith.constant dense<0xFF800000> : vector<2x16xf32>
    %101 = vector.multi_reduction <maximumf>, %100, %cst_34 [2] : vector<2x16x16xf32> to vector<2x16xf32>
    %102 = vector.shape_cast %101 : vector<2x16xf32> to vector<2x16x1xf32>
    %103 = vector.broadcast %102 : vector<2x16x1xf32> to vector<2x16x16xf32>
    %104 = arith.subf %100, %103 : vector<2x16x16xf32>
    %105 = math.exp %104 : vector<2x16x16xf32>
    %cst_35 = arith.constant dense<0.000000e+00> : vector<2x16xf32>
    %106 = vector.multi_reduction <add>, %105, %cst_35 [2] : vector<2x16x16xf32> to vector<2x16xf32>
    %107 = vector.shape_cast %106 : vector<2x16xf32> to vector<2x16x1xf32>
    %108 = vector.broadcast %107 : vector<2x16x1xf32> to vector<2x16x16xf32>
    %109 = arith.divf %105, %108 : vector<2x16x16xf32>
    "tpu.trace_start"() <{level = 10 : i32, message = "bqk,bkd->bqd"}> : () -> ()
    %cst_36 = arith.constant dense<0.000000e+00> : vector<2x16x8xf32>
    %110 = tpu.matmul %109, %97, %cst_36 {dimension_numbers = #tpu.dot_dimension_numbers<[2], [1], [1], [2], [0, 0, 0, 1, 1, 2], [0], [0]>} : vector<2x16x16xf32>, vector<2x16x8xf32>, vector<2x16x8xf32> -> vector<2x16x8xf32>
    "tpu.trace_stop"() : () -> ()
    %111 = vector.shape_cast %110 : vector<2x16x8xf32> to vector<32x8xf32>
    %c192 = arith.constant 192 : index
    %c0_37 = arith.constant 0 : index
    %112 = vector.load %arg3[%c192, %c0_37] : memref<504x32xf32, #tpu.memory_space<vmem>>, vector<8x32xf32>
    %cst_38 = arith.constant dense<0.000000e+00> : vector<32x32xf32>
    %113 = tpu.matmul %111, %112, %cst_38 {dimension_numbers = #tpu.dot_dimension_numbers<[1], [0], [0], [1], [0, 0, 1, 1], [], []>} : vector<32x8xf32>, vector<8x32xf32>, vector<32x32xf32> -> vector<32x32xf32>
    %114 = arith.addf %88, %113 : vector<32x32xf32>
    %115 = vector.extract_strided_slice %61 {offsets = [0, 16], sizes = [32, 8], strides = [1, 1]} : vector<32x32xf32> to vector<32x8xf32>
    %cst_39 = arith.constant dense<0.000000e+00> : vector<32x8xf32>
    %116 = tpu.matmul %60, %115, %cst_39 {dimension_numbers = #tpu.dot_dimension_numbers<[1], [0], [0], [1], [0, 0, 1, 1], [], []>} : vector<32x32xf32>, vector<32x8xf32>, vector<32x8xf32> -> vector<32x8xf32>
    %117 = vector.shape_cast %116 : vector<32x8xf32> to vector<2x16x8xf32>
    %118 = vector.extract_strided_slice %62 {offsets = [0, 16], sizes = [32, 8], strides = [1, 1]} : vector<32x32xf32> to vector<32x8xf32>
    %cst_40 = arith.constant dense<0.000000e+00> : vector<32x8xf32>
    %119 = tpu.matmul %60, %118, %cst_40 {dimension_numbers = #tpu.dot_dimension_numbers<[1], [0], [0], [1], [0, 0, 1, 1], [], []>} : vector<32x32xf32>, vector<32x8xf32>, vector<32x8xf32> -> vector<32x8xf32>
    %120 = vector.shape_cast %119 : vector<32x8xf32> to vector<2x16x8xf32>
    %121 = vector.extract_strided_slice %63 {offsets = [0, 16], sizes = [32, 8], strides = [1, 1]} : vector<32x32xf32> to vector<32x8xf32>
    %cst_41 = arith.constant dense<0.000000e+00> : vector<32x8xf32>
    %122 = tpu.matmul %60, %121, %cst_41 {dimension_numbers = #tpu.dot_dimension_numbers<[1], [0], [0], [1], [0, 0, 1, 1], [], []>} : vector<32x32xf32>, vector<32x8xf32>, vector<32x8xf32> -> vector<32x8xf32>
    %123 = vector.shape_cast %122 : vector<32x8xf32> to vector<2x16x8xf32>
    "tpu.trace_start"() <{level = 10 : i32, message = "bqd,bkd->bqk"}> : () -> ()
    %cst_42 = arith.constant dense<0.000000e+00> : vector<2x16x16xf32>
    %124 = tpu.matmul %117, %120, %cst_42 {dimension_numbers = #tpu.dot_dimension_numbers<[2], [2], [1], [1], [0, 0, 0, 1, 1, 1], [0], [0]>} : vector<2x16x8xf32>, vector<2x16x8xf32>, vector<2x16x16xf32> -> vector<2x16x16xf32>
    %cst_43 = arith.constant -1.000000e+09 : f32
    "tpu.trace_stop"() : () -> ()
    %125 = vector.broadcast %cst_43 : f32 to vector<2x16x16xf32>
    %126 = arith.select %10, %124, %125 : vector<2x16x16xi1>, vector<2x16x16xf32>
    %cst_44 = arith.constant dense<0xFF800000> : vector<2x16xf32>
    %127 = vector.multi_reduction <maximumf>, %126, %cst_44 [2] : vector<2x16x16xf32> to vector<2x16xf32>
    %128 = vector.shape_cast %127 : vector<2x16xf32> to vector<2x16x1xf32>
    %129 = vector.broadcast %128 : vector<2x16x1xf32> to vector<2x16x16xf32>
    %130 = arith.subf %126, %129 : vector<2x16x16xf32>
    %131 = math.exp %130 : vector<2x16x16xf32>
    %cst_45 = arith.constant dense<0.000000e+00> : vector<2x16xf32>
    %132 = vector.multi_reduction <add>, %131, %cst_45 [2] : vector<2x16x16xf32> to vector<2x16xf32>
    %133 = vector.shape_cast %132 : vector<2x16xf32> to vector<2x16x1xf32>
    %134 = vector.broadcast %133 : vector<2x16x1xf32> to vector<2x16x16xf32>
    %135 = arith.divf %131, %134 : vector<2x16x16xf32>
    "tpu.trace_start"() <{level = 10 : i32, message = "bqk,bkd->bqd"}> : () -> ()
    %cst_46 = arith.constant dense<0.000000e+00> : vector<2x16x8xf32>
    %136 = tpu.matmul %135, %123, %cst_46 {dimension_numbers = #tpu.dot_dimension_numbers<[2], [1], [1], [2], [0, 0, 0, 1, 1, 2], [0], [0]>} : vector<2x16x16xf32>, vector<2x16x8xf32>, vector<2x16x8xf32> -> vector<2x16x8xf32>
    "tpu.trace_stop"() : () -> ()
    %137 = vector.shape_cast %136 : vector<2x16x8xf32> to vector<32x8xf32>
    %c200 = arith.constant 200 : index
    %c0_47 = arith.constant 0 : index
    %138 = vector.load %arg3[%c200, %c0_47] : memref<504x32xf32, #tpu.memory_space<vmem>>, vector<8x32xf32>
    %cst_48 = arith.constant dense<0.000000e+00> : vector<32x32xf32>
    %139 = tpu.matmul %137, %138, %cst_48 {dimension_numbers = #tpu.dot_dimension_numbers<[1], [0], [0], [1], [0, 0, 1, 1], [], []>} : vector<32x8xf32>, vector<8x32xf32>, vector<32x32xf32> -> vector<32x32xf32>
    %140 = arith.addf %114, %139 : vector<32x32xf32>
    %141 = vector.extract_strided_slice %61 {offsets = [0, 24], sizes = [32, 8], strides = [1, 1]} : vector<32x32xf32> to vector<32x8xf32>
    %cst_49 = arith.constant dense<0.000000e+00> : vector<32x8xf32>
    %142 = tpu.matmul %60, %141, %cst_49 {dimension_numbers = #tpu.dot_dimension_numbers<[1], [0], [0], [1], [0, 0, 1, 1], [], []>} : vector<32x32xf32>, vector<32x8xf32>, vector<32x8xf32> -> vector<32x8xf32>
    %143 = vector.shape_cast %142 : vector<32x8xf32> to vector<2x16x8xf32>
    %144 = vector.extract_strided_slice %62 {offsets = [0, 24], sizes = [32, 8], strides = [1, 1]} : vector<32x32xf32> to vector<32x8xf32>
    %cst_50 = arith.constant dense<0.000000e+00> : vector<32x8xf32>
    %145 = tpu.matmul %60, %144, %cst_50 {dimension_numbers = #tpu.dot_dimension_numbers<[1], [0], [0], [1], [0, 0, 1, 1], [], []>} : vector<32x32xf32>, vector<32x8xf32>, vector<32x8xf32> -> vector<32x8xf32>
    %146 = vector.shape_cast %145 : vector<32x8xf32> to vector<2x16x8xf32>
    %147 = vector.extract_strided_slice %63 {offsets = [0, 24], sizes = [32, 8], strides = [1, 1]} : vector<32x32xf32> to vector<32x8xf32>
    %cst_51 = arith.constant dense<0.000000e+00> : vector<32x8xf32>
    %148 = tpu.matmul %60, %147, %cst_51 {dimension_numbers = #tpu.dot_dimension_numbers<[1], [0], [0], [1], [0, 0, 1, 1], [], []>} : vector<32x32xf32>, vector<32x8xf32>, vector<32x8xf32> -> vector<32x8xf32>
    %149 = vector.shape_cast %148 : vector<32x8xf32> to vector<2x16x8xf32>
    "tpu.trace_start"() <{level = 10 : i32, message = "bqd,bkd->bqk"}> : () -> ()
    %cst_52 = arith.constant dense<0.000000e+00> : vector<2x16x16xf32>
    %150 = tpu.matmul %143, %146, %cst_52 {dimension_numbers = #tpu.dot_dimension_numbers<[2], [2], [1], [1], [0, 0, 0, 1, 1, 1], [0], [0]>} : vector<2x16x8xf32>, vector<2x16x8xf32>, vector<2x16x16xf32> -> vector<2x16x16xf32>
    %cst_53 = arith.constant -1.000000e+09 : f32
    "tpu.trace_stop"() : () -> ()
    %151 = vector.broadcast %cst_53 : f32 to vector<2x16x16xf32>
    %152 = arith.select %10, %150, %151 : vector<2x16x16xi1>, vector<2x16x16xf32>
    %cst_54 = arith.constant dense<0xFF800000> : vector<2x16xf32>
    %153 = vector.multi_reduction <maximumf>, %152, %cst_54 [2] : vector<2x16x16xf32> to vector<2x16xf32>
    %154 = vector.shape_cast %153 : vector<2x16xf32> to vector<2x16x1xf32>
    %155 = vector.broadcast %154 : vector<2x16x1xf32> to vector<2x16x16xf32>
    %156 = arith.subf %152, %155 : vector<2x16x16xf32>
    %157 = math.exp %156 : vector<2x16x16xf32>
    %cst_55 = arith.constant dense<0.000000e+00> : vector<2x16xf32>
    %158 = vector.multi_reduction <add>, %157, %cst_55 [2] : vector<2x16x16xf32> to vector<2x16xf32>
    %159 = vector.shape_cast %158 : vector<2x16xf32> to vector<2x16x1xf32>
    %160 = vector.broadcast %159 : vector<2x16x1xf32> to vector<2x16x16xf32>
    %161 = arith.divf %157, %160 : vector<2x16x16xf32>
    "tpu.trace_start"() <{level = 10 : i32, message = "bqk,bkd->bqd"}> : () -> ()
    %cst_56 = arith.constant dense<0.000000e+00> : vector<2x16x8xf32>
    %162 = tpu.matmul %161, %149, %cst_56 {dimension_numbers = #tpu.dot_dimension_numbers<[2], [1], [1], [2], [0, 0, 0, 1, 1, 2], [0], [0]>} : vector<2x16x16xf32>, vector<2x16x8xf32>, vector<2x16x8xf32> -> vector<2x16x8xf32>
    "tpu.trace_stop"() : () -> ()
    %163 = vector.shape_cast %162 : vector<2x16x8xf32> to vector<32x8xf32>
    %c208 = arith.constant 208 : index
    %c0_57 = arith.constant 0 : index
    %164 = vector.load %arg3[%c208, %c0_57] : memref<504x32xf32, #tpu.memory_space<vmem>>, vector<8x32xf32>
    %cst_58 = arith.constant dense<0.000000e+00> : vector<32x32xf32>
    %165 = tpu.matmul %163, %164, %cst_58 {dimension_numbers = #tpu.dot_dimension_numbers<[1], [0], [0], [1], [0, 0, 1, 1], [], []>} : vector<32x8xf32>, vector<8x32xf32>, vector<32x32xf32> -> vector<32x32xf32>
    %166 = arith.addf %140, %165 : vector<32x32xf32>
    %167 = arith.addf %166, %60 : vector<32x32xf32>
    %c216 = arith.constant 216 : index
    %c0_59 = arith.constant 0 : index
    %168 = vector.load %arg3[%c216, %c0_59] : memref<504x32xf32, #tpu.memory_space<vmem>>, vector<1x32xf32>
    %c217 = arith.constant 217 : index
    %c0_60 = arith.constant 0 : index
    %169 = vector.load %arg3[%c217, %c0_60] : memref<504x32xf32, #tpu.memory_space<vmem>>, vector<1x32xf32>
    %cst_61 = arith.constant dense<0.000000e+00> : vector<32xf32>
    %170 = vector.multi_reduction <add>, %167, %cst_61 [1] : vector<32x32xf32> to vector<32xf32>
    %171 = vector.shape_cast %170 : vector<32xf32> to vector<32x1xf32>
    %cst_62 = arith.constant 3.200000e+01 : f32
    %172 = vector.broadcast %cst_62 : f32 to vector<32x1xf32>
    %173 = arith.divf %171, %172 : vector<32x1xf32>
    %174 = vector.broadcast %173 : vector<32x1xf32> to vector<32x32xf32>
    %175 = arith.subf %167, %174 : vector<32x32xf32>
    %176 = arith.mulf %175, %175 : vector<32x32xf32>
    %cst_63 = arith.constant dense<0.000000e+00> : vector<32xf32>
    %177 = vector.multi_reduction <add>, %176, %cst_63 [1] : vector<32x32xf32> to vector<32xf32>
    %178 = vector.shape_cast %177 : vector<32xf32> to vector<32x1xf32>
    %cst_64 = arith.constant 3.200000e+01 : f32
    %179 = vector.broadcast %cst_64 : f32 to vector<32x1xf32>
    %180 = arith.divf %178, %179 : vector<32x1xf32>
    %181 = vector.broadcast %173 : vector<32x1xf32> to vector<32x32xf32>
    %182 = arith.subf %167, %181 : vector<32x32xf32>
    %cst_65 = arith.constant 9.99999997E-7 : f32
    %183 = vector.broadcast %cst_65 : f32 to vector<32x1xf32>
    %184 = arith.addf %180, %183 : vector<32x1xf32>
    %185 = math.rsqrt %184 : vector<32x1xf32>
    %186 = vector.broadcast %185 : vector<32x1xf32> to vector<32x32xf32>
    %187 = arith.mulf %182, %186 : vector<32x32xf32>
    %188 = vector.broadcast %168 : vector<1x32xf32> to vector<32x32xf32>
    %189 = arith.mulf %187, %188 : vector<32x32xf32>
    %190 = vector.broadcast %169 : vector<1x32xf32> to vector<32x32xf32>
    %191 = arith.addf %189, %190 : vector<32x32xf32>
    %c0_66 = arith.constant 0 : index
    %c0_67 = arith.constant 0 : index
    %192 = vector.load %arg4[%c0_66, %c0_67] : memref<80x64xf32, #tpu.memory_space<vmem>>, vector<32x64xf32>
    %c32 = arith.constant 32 : index
    %c0_68 = arith.constant 0 : index
    %193 = vector.load %arg4[%c32, %c0_68] : memref<80x64xf32, #tpu.memory_space<vmem>>, vector<1x64xf32>
    %cst_69 = arith.constant dense<0.000000e+00> : vector<32x64xf32>
    %194 = tpu.matmul %191, %192, %cst_69 {dimension_numbers = #tpu.dot_dimension_numbers<[1], [0], [0], [1], [0, 0, 1, 1], [], []>} : vector<32x32xf32>, vector<32x64xf32>, vector<32x64xf32> -> vector<32x64xf32>
    %195 = vector.broadcast %193 : vector<1x64xf32> to vector<32x64xf32>
    %196 = arith.addf %194, %195 : vector<32x64xf32>
    %cst_70 = arith.constant 0.000000e+00 : f32
    %197 = vector.broadcast %cst_70 : f32 to vector<32x64xf32>
    %198 = arith.maximumf %196, %197 : vector<32x64xf32>
    %c224 = arith.constant 224 : index
    %c0_71 = arith.constant 0 : index
    %199 = vector.load %arg3[%c224, %c0_71] : memref<504x32xf32, #tpu.memory_space<vmem>>, vector<64x32xf32>
    %c288 = arith.constant 288 : index
    %c0_72 = arith.constant 0 : index
    %200 = vector.load %arg3[%c288, %c0_72] : memref<504x32xf32, #tpu.memory_space<vmem>>, vector<1x32xf32>
    %cst_73 = arith.constant dense<0.000000e+00> : vector<32x32xf32>
    %201 = tpu.matmul %198, %199, %cst_73 {dimension_numbers = #tpu.dot_dimension_numbers<[1], [0], [0], [1], [0, 0, 1, 1], [], []>} : vector<32x64xf32>, vector<64x32xf32>, vector<32x32xf32> -> vector<32x32xf32>
    %202 = vector.broadcast %200 : vector<1x32xf32> to vector<32x32xf32>
    %203 = arith.addf %201, %202 : vector<32x32xf32>
    %204 = arith.addf %203, %191 : vector<32x32xf32>
    %c218 = arith.constant 218 : index
    %c0_74 = arith.constant 0 : index
    %205 = vector.load %arg3[%c218, %c0_74] : memref<504x32xf32, #tpu.memory_space<vmem>>, vector<1x32xf32>
    %c219 = arith.constant 219 : index
    %c0_75 = arith.constant 0 : index
    %206 = vector.load %arg3[%c219, %c0_75] : memref<504x32xf32, #tpu.memory_space<vmem>>, vector<1x32xf32>
    %cst_76 = arith.constant dense<0.000000e+00> : vector<32xf32>
    %207 = vector.multi_reduction <add>, %204, %cst_76 [1] : vector<32x32xf32> to vector<32xf32>
    %208 = vector.shape_cast %207 : vector<32xf32> to vector<32x1xf32>
    %cst_77 = arith.constant 3.200000e+01 : f32
    %209 = vector.broadcast %cst_77 : f32 to vector<32x1xf32>
    %210 = arith.divf %208, %209 : vector<32x1xf32>
    %211 = vector.broadcast %210 : vector<32x1xf32> to vector<32x32xf32>
    %212 = arith.subf %204, %211 : vector<32x32xf32>
    %213 = arith.mulf %212, %212 : vector<32x32xf32>
    %cst_78 = arith.constant dense<0.000000e+00> : vector<32xf32>
    %214 = vector.multi_reduction <add>, %213, %cst_78 [1] : vector<32x32xf32> to vector<32xf32>
    %215 = vector.shape_cast %214 : vector<32xf32> to vector<32x1xf32>
    %cst_79 = arith.constant 3.200000e+01 : f32
    %216 = vector.broadcast %cst_79 : f32 to vector<32x1xf32>
    %217 = arith.divf %215, %216 : vector<32x1xf32>
    %218 = vector.broadcast %210 : vector<32x1xf32> to vector<32x32xf32>
    %219 = arith.subf %204, %218 : vector<32x32xf32>
    %cst_80 = arith.constant 9.99999997E-7 : f32
    %220 = vector.broadcast %cst_80 : f32 to vector<32x1xf32>
    %221 = arith.addf %217, %220 : vector<32x1xf32>
    %222 = math.rsqrt %221 : vector<32x1xf32>
    %223 = vector.broadcast %222 : vector<32x1xf32> to vector<32x32xf32>
    %224 = arith.mulf %219, %223 : vector<32x32xf32>
    %225 = vector.broadcast %205 : vector<1x32xf32> to vector<32x32xf32>
    %226 = arith.mulf %224, %225 : vector<32x32xf32>
    %227 = vector.broadcast %206 : vector<1x32xf32> to vector<32x32xf32>
    %228 = arith.addf %226, %227 : vector<32x32xf32>
    %c296 = arith.constant 296 : index
    %c0_81 = arith.constant 0 : index
    %229 = vector.load %arg3[%c296, %c0_81] : memref<504x32xf32, #tpu.memory_space<vmem>>, vector<32x32xf32>
    %c328 = arith.constant 328 : index
    %c0_82 = arith.constant 0 : index
    %230 = vector.load %arg3[%c328, %c0_82] : memref<504x32xf32, #tpu.memory_space<vmem>>, vector<32x32xf32>
    %c360 = arith.constant 360 : index
    %c0_83 = arith.constant 0 : index
    %231 = vector.load %arg3[%c360, %c0_83] : memref<504x32xf32, #tpu.memory_space<vmem>>, vector<32x32xf32>
    %232 = vector.extract_strided_slice %229 {offsets = [0, 0], sizes = [32, 8], strides = [1, 1]} : vector<32x32xf32> to vector<32x8xf32>
    %cst_84 = arith.constant dense<0.000000e+00> : vector<32x8xf32>
    %233 = tpu.matmul %228, %232, %cst_84 {dimension_numbers = #tpu.dot_dimension_numbers<[1], [0], [0], [1], [0, 0, 1, 1], [], []>} : vector<32x32xf32>, vector<32x8xf32>, vector<32x8xf32> -> vector<32x8xf32>
    %234 = vector.shape_cast %233 : vector<32x8xf32> to vector<2x16x8xf32>
    %235 = vector.extract_strided_slice %230 {offsets = [0, 0], sizes = [32, 8], strides = [1, 1]} : vector<32x32xf32> to vector<32x8xf32>
    %cst_85 = arith.constant dense<0.000000e+00> : vector<32x8xf32>
    %236 = tpu.matmul %228, %235, %cst_85 {dimension_numbers = #tpu.dot_dimension_numbers<[1], [0], [0], [1], [0, 0, 1, 1], [], []>} : vector<32x32xf32>, vector<32x8xf32>, vector<32x8xf32> -> vector<32x8xf32>
    %237 = vector.shape_cast %236 : vector<32x8xf32> to vector<2x16x8xf32>
    %238 = vector.extract_strided_slice %231 {offsets = [0, 0], sizes = [32, 8], strides = [1, 1]} : vector<32x32xf32> to vector<32x8xf32>
    %cst_86 = arith.constant dense<0.000000e+00> : vector<32x8xf32>
    %239 = tpu.matmul %228, %238, %cst_86 {dimension_numbers = #tpu.dot_dimension_numbers<[1], [0], [0], [1], [0, 0, 1, 1], [], []>} : vector<32x32xf32>, vector<32x8xf32>, vector<32x8xf32> -> vector<32x8xf32>
    %240 = vector.shape_cast %239 : vector<32x8xf32> to vector<2x16x8xf32>
    "tpu.trace_start"() <{level = 10 : i32, message = "bqd,bkd->bqk"}> : () -> ()
    %cst_87 = arith.constant dense<0.000000e+00> : vector<2x16x16xf32>
    %241 = tpu.matmul %234, %237, %cst_87 {dimension_numbers = #tpu.dot_dimension_numbers<[2], [2], [1], [1], [0, 0, 0, 1, 1, 1], [0], [0]>} : vector<2x16x8xf32>, vector<2x16x8xf32>, vector<2x16x16xf32> -> vector<2x16x16xf32>
    %cst_88 = arith.constant -1.000000e+09 : f32
    "tpu.trace_stop"() : () -> ()
    %242 = vector.broadcast %cst_88 : f32 to vector<2x16x16xf32>
    %243 = arith.select %10, %241, %242 : vector<2x16x16xi1>, vector<2x16x16xf32>
    %cst_89 = arith.constant dense<0xFF800000> : vector<2x16xf32>
    %244 = vector.multi_reduction <maximumf>, %243, %cst_89 [2] : vector<2x16x16xf32> to vector<2x16xf32>
    %245 = vector.shape_cast %244 : vector<2x16xf32> to vector<2x16x1xf32>
    %246 = vector.broadcast %245 : vector<2x16x1xf32> to vector<2x16x16xf32>
    %247 = arith.subf %243, %246 : vector<2x16x16xf32>
    %248 = math.exp %247 : vector<2x16x16xf32>
    %cst_90 = arith.constant dense<0.000000e+00> : vector<2x16xf32>
    %249 = vector.multi_reduction <add>, %248, %cst_90 [2] : vector<2x16x16xf32> to vector<2x16xf32>
    %250 = vector.shape_cast %249 : vector<2x16xf32> to vector<2x16x1xf32>
    %251 = vector.broadcast %250 : vector<2x16x1xf32> to vector<2x16x16xf32>
    %252 = arith.divf %248, %251 : vector<2x16x16xf32>
    "tpu.trace_start"() <{level = 10 : i32, message = "bqk,bkd->bqd"}> : () -> ()
    %cst_91 = arith.constant dense<0.000000e+00> : vector<2x16x8xf32>
    %253 = tpu.matmul %252, %240, %cst_91 {dimension_numbers = #tpu.dot_dimension_numbers<[2], [1], [1], [2], [0, 0, 0, 1, 1, 2], [0], [0]>} : vector<2x16x16xf32>, vector<2x16x8xf32>, vector<2x16x8xf32> -> vector<2x16x8xf32>
    "tpu.trace_stop"() : () -> ()
    %254 = vector.shape_cast %253 : vector<2x16x8xf32> to vector<32x8xf32>
    %c392 = arith.constant 392 : index
    %c0_92 = arith.constant 0 : index
    %255 = vector.load %arg3[%c392, %c0_92] : memref<504x32xf32, #tpu.memory_space<vmem>>, vector<8x32xf32>
    %cst_93 = arith.constant dense<0.000000e+00> : vector<32x32xf32>
    %256 = tpu.matmul %254, %255, %cst_93 {dimension_numbers = #tpu.dot_dimension_numbers<[1], [0], [0], [1], [0, 0, 1, 1], [], []>} : vector<32x8xf32>, vector<8x32xf32>, vector<32x32xf32> -> vector<32x32xf32>
    %257 = vector.extract_strided_slice %229 {offsets = [0, 8], sizes = [32, 8], strides = [1, 1]} : vector<32x32xf32> to vector<32x8xf32>
    %cst_94 = arith.constant dense<0.000000e+00> : vector<32x8xf32>
    %258 = tpu.matmul %228, %257, %cst_94 {dimension_numbers = #tpu.dot_dimension_numbers<[1], [0], [0], [1], [0, 0, 1, 1], [], []>} : vector<32x32xf32>, vector<32x8xf32>, vector<32x8xf32> -> vector<32x8xf32>
    %259 = vector.shape_cast %258 : vector<32x8xf32> to vector<2x16x8xf32>
    %260 = vector.extract_strided_slice %230 {offsets = [0, 8], sizes = [32, 8], strides = [1, 1]} : vector<32x32xf32> to vector<32x8xf32>
    %cst_95 = arith.constant dense<0.000000e+00> : vector<32x8xf32>
    %261 = tpu.matmul %228, %260, %cst_95 {dimension_numbers = #tpu.dot_dimension_numbers<[1], [0], [0], [1], [0, 0, 1, 1], [], []>} : vector<32x32xf32>, vector<32x8xf32>, vector<32x8xf32> -> vector<32x8xf32>
    %262 = vector.shape_cast %261 : vector<32x8xf32> to vector<2x16x8xf32>
    %263 = vector.extract_strided_slice %231 {offsets = [0, 8], sizes = [32, 8], strides = [1, 1]} : vector<32x32xf32> to vector<32x8xf32>
    %cst_96 = arith.constant dense<0.000000e+00> : vector<32x8xf32>
    %264 = tpu.matmul %228, %263, %cst_96 {dimension_numbers = #tpu.dot_dimension_numbers<[1], [0], [0], [1], [0, 0, 1, 1], [], []>} : vector<32x32xf32>, vector<32x8xf32>, vector<32x8xf32> -> vector<32x8xf32>
    %265 = vector.shape_cast %264 : vector<32x8xf32> to vector<2x16x8xf32>
    "tpu.trace_start"() <{level = 10 : i32, message = "bqd,bkd->bqk"}> : () -> ()
    %cst_97 = arith.constant dense<0.000000e+00> : vector<2x16x16xf32>
    %266 = tpu.matmul %259, %262, %cst_97 {dimension_numbers = #tpu.dot_dimension_numbers<[2], [2], [1], [1], [0, 0, 0, 1, 1, 1], [0], [0]>} : vector<2x16x8xf32>, vector<2x16x8xf32>, vector<2x16x16xf32> -> vector<2x16x16xf32>
    %cst_98 = arith.constant -1.000000e+09 : f32
    "tpu.trace_stop"() : () -> ()
    %267 = vector.broadcast %cst_98 : f32 to vector<2x16x16xf32>
    %268 = arith.select %10, %266, %267 : vector<2x16x16xi1>, vector<2x16x16xf32>
    %cst_99 = arith.constant dense<0xFF800000> : vector<2x16xf32>
    %269 = vector.multi_reduction <maximumf>, %268, %cst_99 [2] : vector<2x16x16xf32> to vector<2x16xf32>
    %270 = vector.shape_cast %269 : vector<2x16xf32> to vector<2x16x1xf32>
    %271 = vector.broadcast %270 : vector<2x16x1xf32> to vector<2x16x16xf32>
    %272 = arith.subf %268, %271 : vector<2x16x16xf32>
    %273 = math.exp %272 : vector<2x16x16xf32>
    %cst_100 = arith.constant dense<0.000000e+00> : vector<2x16xf32>
    %274 = vector.multi_reduction <add>, %273, %cst_100 [2] : vector<2x16x16xf32> to vector<2x16xf32>
    %275 = vector.shape_cast %274 : vector<2x16xf32> to vector<2x16x1xf32>
    %276 = vector.broadcast %275 : vector<2x16x1xf32> to vector<2x16x16xf32>
    %277 = arith.divf %273, %276 : vector<2x16x16xf32>
    "tpu.trace_start"() <{level = 10 : i32, message = "bqk,bkd->bqd"}> : () -> ()
    %cst_101 = arith.constant dense<0.000000e+00> : vector<2x16x8xf32>
    %278 = tpu.matmul %277, %265, %cst_101 {dimension_numbers = #tpu.dot_dimension_numbers<[2], [1], [1], [2], [0, 0, 0, 1, 1, 2], [0], [0]>} : vector<2x16x16xf32>, vector<2x16x8xf32>, vector<2x16x8xf32> -> vector<2x16x8xf32>
    "tpu.trace_stop"() : () -> ()
    %279 = vector.shape_cast %278 : vector<2x16x8xf32> to vector<32x8xf32>
    %c400 = arith.constant 400 : index
    %c0_102 = arith.constant 0 : index
    %280 = vector.load %arg3[%c400, %c0_102] : memref<504x32xf32, #tpu.memory_space<vmem>>, vector<8x32xf32>
    %cst_103 = arith.constant dense<0.000000e+00> : vector<32x32xf32>
    %281 = tpu.matmul %279, %280, %cst_103 {dimension_numbers = #tpu.dot_dimension_numbers<[1], [0], [0], [1], [0, 0, 1, 1], [], []>} : vector<32x8xf32>, vector<8x32xf32>, vector<32x32xf32> -> vector<32x32xf32>
    %282 = arith.addf %256, %281 : vector<32x32xf32>
    %283 = vector.extract_strided_slice %229 {offsets = [0, 16], sizes = [32, 8], strides = [1, 1]} : vector<32x32xf32> to vector<32x8xf32>
    %cst_104 = arith.constant dense<0.000000e+00> : vector<32x8xf32>
    %284 = tpu.matmul %228, %283, %cst_104 {dimension_numbers = #tpu.dot_dimension_numbers<[1], [0], [0], [1], [0, 0, 1, 1], [], []>} : vector<32x32xf32>, vector<32x8xf32>, vector<32x8xf32> -> vector<32x8xf32>
    %285 = vector.shape_cast %284 : vector<32x8xf32> to vector<2x16x8xf32>
    %286 = vector.extract_strided_slice %230 {offsets = [0, 16], sizes = [32, 8], strides = [1, 1]} : vector<32x32xf32> to vector<32x8xf32>
    %cst_105 = arith.constant dense<0.000000e+00> : vector<32x8xf32>
    %287 = tpu.matmul %228, %286, %cst_105 {dimension_numbers = #tpu.dot_dimension_numbers<[1], [0], [0], [1], [0, 0, 1, 1], [], []>} : vector<32x32xf32>, vector<32x8xf32>, vector<32x8xf32> -> vector<32x8xf32>
    %288 = vector.shape_cast %287 : vector<32x8xf32> to vector<2x16x8xf32>
    %289 = vector.extract_strided_slice %231 {offsets = [0, 16], sizes = [32, 8], strides = [1, 1]} : vector<32x32xf32> to vector<32x8xf32>
    %cst_106 = arith.constant dense<0.000000e+00> : vector<32x8xf32>
    %290 = tpu.matmul %228, %289, %cst_106 {dimension_numbers = #tpu.dot_dimension_numbers<[1], [0], [0], [1], [0, 0, 1, 1], [], []>} : vector<32x32xf32>, vector<32x8xf32>, vector<32x8xf32> -> vector<32x8xf32>
    %291 = vector.shape_cast %290 : vector<32x8xf32> to vector<2x16x8xf32>
    "tpu.trace_start"() <{level = 10 : i32, message = "bqd,bkd->bqk"}> : () -> ()
    %cst_107 = arith.constant dense<0.000000e+00> : vector<2x16x16xf32>
    %292 = tpu.matmul %285, %288, %cst_107 {dimension_numbers = #tpu.dot_dimension_numbers<[2], [2], [1], [1], [0, 0, 0, 1, 1, 1], [0], [0]>} : vector<2x16x8xf32>, vector<2x16x8xf32>, vector<2x16x16xf32> -> vector<2x16x16xf32>
    %cst_108 = arith.constant -1.000000e+09 : f32
    "tpu.trace_stop"() : () -> ()
    %293 = vector.broadcast %cst_108 : f32 to vector<2x16x16xf32>
    %294 = arith.select %10, %292, %293 : vector<2x16x16xi1>, vector<2x16x16xf32>
    %cst_109 = arith.constant dense<0xFF800000> : vector<2x16xf32>
    %295 = vector.multi_reduction <maximumf>, %294, %cst_109 [2] : vector<2x16x16xf32> to vector<2x16xf32>
    %296 = vector.shape_cast %295 : vector<2x16xf32> to vector<2x16x1xf32>
    %297 = vector.broadcast %296 : vector<2x16x1xf32> to vector<2x16x16xf32>
    %298 = arith.subf %294, %297 : vector<2x16x16xf32>
    %299 = math.exp %298 : vector<2x16x16xf32>
    %cst_110 = arith.constant dense<0.000000e+00> : vector<2x16xf32>
    %300 = vector.multi_reduction <add>, %299, %cst_110 [2] : vector<2x16x16xf32> to vector<2x16xf32>
    %301 = vector.shape_cast %300 : vector<2x16xf32> to vector<2x16x1xf32>
    %302 = vector.broadcast %301 : vector<2x16x1xf32> to vector<2x16x16xf32>
    %303 = arith.divf %299, %302 : vector<2x16x16xf32>
    "tpu.trace_start"() <{level = 10 : i32, message = "bqk,bkd->bqd"}> : () -> ()
    %cst_111 = arith.constant dense<0.000000e+00> : vector<2x16x8xf32>
    %304 = tpu.matmul %303, %291, %cst_111 {dimension_numbers = #tpu.dot_dimension_numbers<[2], [1], [1], [2], [0, 0, 0, 1, 1, 2], [0], [0]>} : vector<2x16x16xf32>, vector<2x16x8xf32>, vector<2x16x8xf32> -> vector<2x16x8xf32>
    "tpu.trace_stop"() : () -> ()
    %305 = vector.shape_cast %304 : vector<2x16x8xf32> to vector<32x8xf32>
    %c408 = arith.constant 408 : index
    %c0_112 = arith.constant 0 : index
    %306 = vector.load %arg3[%c408, %c0_112] : memref<504x32xf32, #tpu.memory_space<vmem>>, vector<8x32xf32>
    %cst_113 = arith.constant dense<0.000000e+00> : vector<32x32xf32>
    %307 = tpu.matmul %305, %306, %cst_113 {dimension_numbers = #tpu.dot_dimension_numbers<[1], [0], [0], [1], [0, 0, 1, 1], [], []>} : vector<32x8xf32>, vector<8x32xf32>, vector<32x32xf32> -> vector<32x32xf32>
    %308 = arith.addf %282, %307 : vector<32x32xf32>
    %309 = vector.extract_strided_slice %229 {offsets = [0, 24], sizes = [32, 8], strides = [1, 1]} : vector<32x32xf32> to vector<32x8xf32>
    %cst_114 = arith.constant dense<0.000000e+00> : vector<32x8xf32>
    %310 = tpu.matmul %228, %309, %cst_114 {dimension_numbers = #tpu.dot_dimension_numbers<[1], [0], [0], [1], [0, 0, 1, 1], [], []>} : vector<32x32xf32>, vector<32x8xf32>, vector<32x8xf32> -> vector<32x8xf32>
    %311 = vector.shape_cast %310 : vector<32x8xf32> to vector<2x16x8xf32>
    %312 = vector.extract_strided_slice %230 {offsets = [0, 24], sizes = [32, 8], strides = [1, 1]} : vector<32x32xf32> to vector<32x8xf32>
    %cst_115 = arith.constant dense<0.000000e+00> : vector<32x8xf32>
    %313 = tpu.matmul %228, %312, %cst_115 {dimension_numbers = #tpu.dot_dimension_numbers<[1], [0], [0], [1], [0, 0, 1, 1], [], []>} : vector<32x32xf32>, vector<32x8xf32>, vector<32x8xf32> -> vector<32x8xf32>
    %314 = vector.shape_cast %313 : vector<32x8xf32> to vector<2x16x8xf32>
    %315 = vector.extract_strided_slice %231 {offsets = [0, 24], sizes = [32, 8], strides = [1, 1]} : vector<32x32xf32> to vector<32x8xf32>
    %cst_116 = arith.constant dense<0.000000e+00> : vector<32x8xf32>
    %316 = tpu.matmul %228, %315, %cst_116 {dimension_numbers = #tpu.dot_dimension_numbers<[1], [0], [0], [1], [0, 0, 1, 1], [], []>} : vector<32x32xf32>, vector<32x8xf32>, vector<32x8xf32> -> vector<32x8xf32>
    %317 = vector.shape_cast %316 : vector<32x8xf32> to vector<2x16x8xf32>
    "tpu.trace_start"() <{level = 10 : i32, message = "bqd,bkd->bqk"}> : () -> ()
    %cst_117 = arith.constant dense<0.000000e+00> : vector<2x16x16xf32>
    %318 = tpu.matmul %311, %314, %cst_117 {dimension_numbers = #tpu.dot_dimension_numbers<[2], [2], [1], [1], [0, 0, 0, 1, 1, 1], [0], [0]>} : vector<2x16x8xf32>, vector<2x16x8xf32>, vector<2x16x16xf32> -> vector<2x16x16xf32>
    %cst_118 = arith.constant -1.000000e+09 : f32
    "tpu.trace_stop"() : () -> ()
    %319 = vector.broadcast %cst_118 : f32 to vector<2x16x16xf32>
    %320 = arith.select %10, %318, %319 : vector<2x16x16xi1>, vector<2x16x16xf32>
    %cst_119 = arith.constant dense<0xFF800000> : vector<2x16xf32>
    %321 = vector.multi_reduction <maximumf>, %320, %cst_119 [2] : vector<2x16x16xf32> to vector<2x16xf32>
    %322 = vector.shape_cast %321 : vector<2x16xf32> to vector<2x16x1xf32>
    %323 = vector.broadcast %322 : vector<2x16x1xf32> to vector<2x16x16xf32>
    %324 = arith.subf %320, %323 : vector<2x16x16xf32>
    %325 = math.exp %324 : vector<2x16x16xf32>
    %cst_120 = arith.constant dense<0.000000e+00> : vector<2x16xf32>
    %326 = vector.multi_reduction <add>, %325, %cst_120 [2] : vector<2x16x16xf32> to vector<2x16xf32>
    %327 = vector.shape_cast %326 : vector<2x16xf32> to vector<2x16x1xf32>
    %328 = vector.broadcast %327 : vector<2x16x1xf32> to vector<2x16x16xf32>
    %329 = arith.divf %325, %328 : vector<2x16x16xf32>
    "tpu.trace_start"() <{level = 10 : i32, message = "bqk,bkd->bqd"}> : () -> ()
    %cst_121 = arith.constant dense<0.000000e+00> : vector<2x16x8xf32>
    %330 = tpu.matmul %329, %317, %cst_121 {dimension_numbers = #tpu.dot_dimension_numbers<[2], [1], [1], [2], [0, 0, 0, 1, 1, 2], [0], [0]>} : vector<2x16x16xf32>, vector<2x16x8xf32>, vector<2x16x8xf32> -> vector<2x16x8xf32>
    "tpu.trace_stop"() : () -> ()
    %331 = vector.shape_cast %330 : vector<2x16x8xf32> to vector<32x8xf32>
    %c416 = arith.constant 416 : index
    %c0_122 = arith.constant 0 : index
    %332 = vector.load %arg3[%c416, %c0_122] : memref<504x32xf32, #tpu.memory_space<vmem>>, vector<8x32xf32>
    %cst_123 = arith.constant dense<0.000000e+00> : vector<32x32xf32>
    %333 = tpu.matmul %331, %332, %cst_123 {dimension_numbers = #tpu.dot_dimension_numbers<[1], [0], [0], [1], [0, 0, 1, 1], [], []>} : vector<32x8xf32>, vector<8x32xf32>, vector<32x32xf32> -> vector<32x32xf32>
    %334 = arith.addf %308, %333 : vector<32x32xf32>
    %335 = arith.addf %334, %228 : vector<32x32xf32>
    %c424 = arith.constant 424 : index
    %c0_124 = arith.constant 0 : index
    %336 = vector.load %arg3[%c424, %c0_124] : memref<504x32xf32, #tpu.memory_space<vmem>>, vector<1x32xf32>
    %c425 = arith.constant 425 : index
    %c0_125 = arith.constant 0 : index
    %337 = vector.load %arg3[%c425, %c0_125] : memref<504x32xf32, #tpu.memory_space<vmem>>, vector<1x32xf32>
    %cst_126 = arith.constant dense<0.000000e+00> : vector<32xf32>
    %338 = vector.multi_reduction <add>, %335, %cst_126 [1] : vector<32x32xf32> to vector<32xf32>
    %339 = vector.shape_cast %338 : vector<32xf32> to vector<32x1xf32>
    %cst_127 = arith.constant 3.200000e+01 : f32
    %340 = vector.broadcast %cst_127 : f32 to vector<32x1xf32>
    %341 = arith.divf %339, %340 : vector<32x1xf32>
    %342 = vector.broadcast %341 : vector<32x1xf32> to vector<32x32xf32>
    %343 = arith.subf %335, %342 : vector<32x32xf32>
    %344 = arith.mulf %343, %343 : vector<32x32xf32>
    %cst_128 = arith.constant dense<0.000000e+00> : vector<32xf32>
    %345 = vector.multi_reduction <add>, %344, %cst_128 [1] : vector<32x32xf32> to vector<32xf32>
    %346 = vector.shape_cast %345 : vector<32xf32> to vector<32x1xf32>
    %cst_129 = arith.constant 3.200000e+01 : f32
    %347 = vector.broadcast %cst_129 : f32 to vector<32x1xf32>
    %348 = arith.divf %346, %347 : vector<32x1xf32>
    %349 = vector.broadcast %341 : vector<32x1xf32> to vector<32x32xf32>
    %350 = arith.subf %335, %349 : vector<32x32xf32>
    %cst_130 = arith.constant 9.99999997E-7 : f32
    %351 = vector.broadcast %cst_130 : f32 to vector<32x1xf32>
    %352 = arith.addf %348, %351 : vector<32x1xf32>
    %353 = math.rsqrt %352 : vector<32x1xf32>
    %354 = vector.broadcast %353 : vector<32x1xf32> to vector<32x32xf32>
    %355 = arith.mulf %350, %354 : vector<32x32xf32>
    %356 = vector.broadcast %336 : vector<1x32xf32> to vector<32x32xf32>
    %357 = arith.mulf %355, %356 : vector<32x32xf32>
    %358 = vector.broadcast %337 : vector<1x32xf32> to vector<32x32xf32>
    %359 = arith.addf %357, %358 : vector<32x32xf32>
    %c40 = arith.constant 40 : index
    %c0_131 = arith.constant 0 : index
    %360 = vector.load %arg4[%c40, %c0_131] : memref<80x64xf32, #tpu.memory_space<vmem>>, vector<32x64xf32>
    %c72 = arith.constant 72 : index
    %c0_132 = arith.constant 0 : index
    %361 = vector.load %arg4[%c72, %c0_132] : memref<80x64xf32, #tpu.memory_space<vmem>>, vector<1x64xf32>
    %cst_133 = arith.constant dense<0.000000e+00> : vector<32x64xf32>
    %362 = tpu.matmul %359, %360, %cst_133 {dimension_numbers = #tpu.dot_dimension_numbers<[1], [0], [0], [1], [0, 0, 1, 1], [], []>} : vector<32x32xf32>, vector<32x64xf32>, vector<32x64xf32> -> vector<32x64xf32>
    %363 = vector.broadcast %361 : vector<1x64xf32> to vector<32x64xf32>
    %364 = arith.addf %362, %363 : vector<32x64xf32>
    %cst_134 = arith.constant 0.000000e+00 : f32
    %365 = vector.broadcast %cst_134 : f32 to vector<32x64xf32>
    %366 = arith.maximumf %364, %365 : vector<32x64xf32>
    %c432 = arith.constant 432 : index
    %c0_135 = arith.constant 0 : index
    %367 = vector.load %arg3[%c432, %c0_135] : memref<504x32xf32, #tpu.memory_space<vmem>>, vector<64x32xf32>
    %c496 = arith.constant 496 : index
    %c0_136 = arith.constant 0 : index
    %368 = vector.load %arg3[%c496, %c0_136] : memref<504x32xf32, #tpu.memory_space<vmem>>, vector<1x32xf32>
    %cst_137 = arith.constant dense<0.000000e+00> : vector<32x32xf32>
    %369 = tpu.matmul %366, %367, %cst_137 {dimension_numbers = #tpu.dot_dimension_numbers<[1], [0], [0], [1], [0, 0, 1, 1], [], []>} : vector<32x64xf32>, vector<64x32xf32>, vector<32x32xf32> -> vector<32x32xf32>
    %370 = vector.broadcast %368 : vector<1x32xf32> to vector<32x32xf32>
    %371 = arith.addf %369, %370 : vector<32x32xf32>
    %372 = arith.addf %371, %359 : vector<32x32xf32>
    %c426 = arith.constant 426 : index
    %c0_138 = arith.constant 0 : index
    %373 = vector.load %arg3[%c426, %c0_138] : memref<504x32xf32, #tpu.memory_space<vmem>>, vector<1x32xf32>
    %c427 = arith.constant 427 : index
    %c0_139 = arith.constant 0 : index
    %374 = vector.load %arg3[%c427, %c0_139] : memref<504x32xf32, #tpu.memory_space<vmem>>, vector<1x32xf32>
    %cst_140 = arith.constant dense<0.000000e+00> : vector<32xf32>
    %375 = vector.multi_reduction <add>, %372, %cst_140 [1] : vector<32x32xf32> to vector<32xf32>
    %376 = vector.shape_cast %375 : vector<32xf32> to vector<32x1xf32>
    %cst_141 = arith.constant 3.200000e+01 : f32
    %377 = vector.broadcast %cst_141 : f32 to vector<32x1xf32>
    %378 = arith.divf %376, %377 : vector<32x1xf32>
    %379 = vector.broadcast %378 : vector<32x1xf32> to vector<32x32xf32>
    %380 = arith.subf %372, %379 : vector<32x32xf32>
    %381 = arith.mulf %380, %380 : vector<32x32xf32>
    %cst_142 = arith.constant dense<0.000000e+00> : vector<32xf32>
    %382 = vector.multi_reduction <add>, %381, %cst_142 [1] : vector<32x32xf32> to vector<32xf32>
    %383 = vector.shape_cast %382 : vector<32xf32> to vector<32x1xf32>
    %cst_143 = arith.constant 3.200000e+01 : f32
    %384 = vector.broadcast %cst_143 : f32 to vector<32x1xf32>
    %385 = arith.divf %383, %384 : vector<32x1xf32>
    %386 = vector.broadcast %378 : vector<32x1xf32> to vector<32x32xf32>
    %387 = arith.subf %372, %386 : vector<32x32xf32>
    %cst_144 = arith.constant 9.99999997E-7 : f32
    %388 = vector.broadcast %cst_144 : f32 to vector<32x1xf32>
    %389 = arith.addf %385, %388 : vector<32x1xf32>
    %390 = math.rsqrt %389 : vector<32x1xf32>
    %391 = vector.broadcast %390 : vector<32x1xf32> to vector<32x32xf32>
    %392 = arith.mulf %387, %391 : vector<32x32xf32>
    %393 = vector.broadcast %373 : vector<1x32xf32> to vector<32x32xf32>
    %394 = arith.mulf %392, %393 : vector<32x32xf32>
    %395 = vector.broadcast %374 : vector<1x32xf32> to vector<32x32xf32>
    %396 = arith.addf %394, %395 : vector<32x32xf32>
    %c0_145 = arith.constant 0 : index
    %c0_146 = arith.constant 0 : index
    %397 = vector.load %arg5[%c0_145, %c0_146] : memref<32x128xf32, #tpu.memory_space<vmem>>, vector<32x128xf32>
    %cst_147 = arith.constant dense<0.000000e+00> : vector<32x128xf32>
    %398 = tpu.matmul %396, %397, %cst_147 {dimension_numbers = #tpu.dot_dimension_numbers<[1], [0], [0], [1], [0, 0, 1, 1], [], []>} : vector<32x32xf32>, vector<32x128xf32>, vector<32x128xf32> -> vector<32x128xf32>
    %399 = vector.shape_cast %398 : vector<32x128xf32> to vector<2x16x128xf32>
    %c0_148 = arith.constant 0 : index
    %c0_149 = arith.constant 0 : index
    %c0_150 = arith.constant 0 : index
    %400 = vector.load %arg6[%c0_148, %c0_149, %c0_150] : memref<2x16x128xf32, #tpu.memory_space<vmem>>, vector<2x16x128xf32>
    tpu.vector_store %arg6[%c0_148, %c0_149, %c0_150], %399 {strides = array<i32>} : memref<2x16x128xf32, #tpu.memory_space<vmem>>, vector<2x16x128xf32>,
    return
  }
  func.func @transform_0(%arg0: i32) -> (i32, i32) {
    %c0_i32 = arith.constant 0 : i32
    %c0_i32_0 = arith.constant 0 : i32
    return %arg0, %c0_i32 : i32, i32
  }
  func.func @transform_1(%arg0: i32) -> (i32, i32) {
    %c0_i32 = arith.constant 0 : i32
    %c0_i32_0 = arith.constant 0 : i32
    return %arg0, %c0_i32 : i32, i32
  }
  func.func @transform_2(%arg0: i32) -> (i32, i32) {
    %c0_i32 = arith.constant 0 : i32
    %c0_i32_0 = arith.constant 0 : i32
    %c0_i32_1 = arith.constant 0 : i32
    return %c0_i32, %c0_i32_0 : i32, i32
  }
  func.func @transform_3(%arg0: i32) -> (i32, i32) {
    %c0_i32 = arith.constant 0 : i32
    %c0_i32_0 = arith.constant 0 : i32
    %c0_i32_1 = arith.constant 0 : i32
    return %c0_i32, %c0_i32_0 : i32, i32
  }
  func.func @transform_4(%arg0: i32) -> (i32, i32) {
    %c0_i32 = arith.constant 0 : i32
    %c0_i32_0 = arith.constant 0 : i32
    %c0_i32_1 = arith.constant 0 : i32
    return %c0_i32, %c0_i32_0 : i32, i32
  }
  func.func @transform_5(%arg0: i32) -> (i32, i32, i32) {
    %c0_i32 = arith.constant 0 : i32
    %c0_i32_0 = arith.constant 0 : i32
    %c0_i32_1 = arith.constant 0 : i32
    return %arg0, %c0_i32, %c0_i32_0 : i32, i32, i32
  }
}

</mosaic_0001>

<bundles_post_ra>
// kernel: tpu_custom_call.1
= control target key start
LH: loop header
LB: loop body
LE: loop exit
PB: predicated region body
PF: predicated region fallthrough
CT: control target
= control target key end

     0   :  { %v27_v0 = vlaneseq  ;;  %s10822_s0 = inlined_call_operand.vmem [shape: s32[2,16], index: 0, kind: input, shape index: {}]   ;;  %s10823_s1 = inlined_call_operand.vmem [shape: f32[2,32], index: 1, kind: input, shape index: {}]   ;;  %s10824_s2 = inlined_call_operand.vmem [shape: f32[504,32], index: 2, kind: input, shape index: {}]   ;;  %s10825_s3 = inlined_call_operand.vmem [shape: f32[80,64], index: 3, kind: input, shape index: {}]   ;;  %s10826_s4 = inlined_call_operand.vmem [shape: f32[32,128], index: 4, kind: input, shape index: {}]   ;;  %s10827_s5 = inlined_call_operand.hbm [shape: f32[2,16,128], index: 5, kind: output, shape index: {}]  }
   0x1   :  { %v75_v1 = vld [vmem:[%s10824_s2] sm:$0xff]  ;;  %v76_v2 = vld [vmem:[%s10824_s2 + $0x8] sm:$0xff] }
   0x2   :  { %10 = vsyncpa [#allocation3], 0  ;;  %v9645_v3 = vshrl.u32 %v27_v0, 7  ;;  %v8783_v4 = vpack.c.bf16 %v76_v2, %v75_v1  ;;  %v9650_v5 = vld [vmem:[%s10822_s0] sm:$0x3]  ;;  %v9659_v10 = vand.u32 127, %v27_v0 }
   0x3   :  { %vm107_vm0 = vcmask 130048   ;;  %v9600_v13 = vmov 0.0   ;;  %v9601_v20 = vmov 1966171168   ;;  %v250_v27 = vld [vmem:[%s10824_s2 + $0x20] sm:$0xff]  ;;  %vm257_vm6 = vcmask 261120  }
   0x4   :  { %v9653_v6 = vsub.s32 0, %v9645_v3  ;;  %v90_v7 = vsub.s32 1, %v9645_v3  ;;  %8784 = vmatprep.subr.bf16.mxu0 %v8783_v4  ;;  %v25_v21 = vunpack.c.l.s4 %v9601_v20  ;;  %v7390_v24 = vld.sshfl [vmem:[%s10823_s1] sm:$0x11 pattern:$0x75316420]  ;;  %vm53_vm14 = vcmp.le.s32.totalorder %v9659_v10, %v9645_v3 }
   0x5   :  { %8786 = vmatpush3.bf16.msra.mxu0 %v8783_v4  ;;  %v216_v26 = vcombine.high %v7390_v24, %v7390_v24  ;;  %vm205_vm5 = vcmp.eq.s32.totalorder %v9645_v3, 0  ;;  %v249_v31 = vld [vmem:[%s10824_s2 + $0x18] sm:$0xff]  ;;  %v9718_v4 = vld [vmem:[%s10824_s2 + $0x60] sm:$0xff]  ;;  %vm606_vm7 = vcmask 64512   ;;  %vm22_vm9 = vcmp.ne.s32.totalorder %v9650_v5, 0  ;;  %s9603_s29 = smov 120  }
   0x6   :  { %v80_v8 = vrot.slane %v9650_v5, %v9653_v6  ;;  %v91_v9 = vrot.slane %v9650_v5, %v90_v7  ;;  %v26_v22 = vunpack.c.0.s8 %v25_v21  ;;  %v9713_v2 = vld [vmem:[%s10824_s2 + $0x58] sm:$0xff]  ;;  %vm9826_vm8 = vmpackc.low %vm606_vm7, %vm606_vm7  ;;  %s9604_s30 = smov 112   ;;  %s9605_s10 = smov 104  }
   0x7   :  { %v9723_v7 = vld [vmem:[%s10824_s2 + $0x78] sm:$0xff] }
   0x8   :  { %82 = vbcast.lane.b32.xlu0 %v80_v8, 256  ;;  %93 = vbcast.lane.b32.xlu1 %v91_v9, 256  ;;  %v9670_v23 = vsub.s32 %v26_v22, %v9645_v3 }
   0xa   :  { %v223_v25 = vrot.slane %v7390_v24, %v9670_v23  ;;  %v230_v29 = vrot.slane %v216_v26, %v9670_v23 }
   0xc   :  { %86 = vbcast.lane.b32.xlu0 %v80_v8, 264  ;;  %97 = vbcast.lane.b32.xlu1 %v91_v9, 264  ;;  %v238_v28 = vrot.slane %v223_v25, %v9653_v6  ;;  %v242_v35 = vrot.slane %v230_v29, %v9653_v6  ;;  %v8787_v8 = vpack.c.bf16 %v9718_v4, %v9713_v2  ;;  %v9730_v9 = vld [vmem:[%s10824_s2 + $0x80] sm:$0xff] }
   0xe   :  { %8788 = vmatprep.subr.bf16.mxu1 %v8787_v8 }
   0xf   :  { %8790 = vmatpush3.bf16.msra.mxu1 %v8787_v8 }
  0x7a   :  { %v83_v11 = vpop.permute.xlu0 %82  ;;  %v94_v12 = vpop.permute.xlu1 %93 }
  0x7b   :  { %vm99_vm1 = vcmp.eq.s32.totalorder %v83_v11, %v9659_v10  ;;  %vm101_vm2 = vcmp.eq.s32.totalorder %v94_v12, %v9659_v10  ;;  %v8795_v11 = vpack.c.bf16 %v9730_v9, %v9723_v7  ;;  %v9737_v12 = vld [vmem:[%s10824_s2 + $0x68] sm:$0xff] }
  0x7c   :  { %v103_v14 = vsel %vm99_vm1, 1.0, %v9600_v13  ;;  %v105_v17 = vsel %vm101_vm2, 1.0, %v9600_v13 }
  0x7d   :  { %8067 = vmatprep.mubr.msk.f32.mxu0 %vm107_vm0, %v103_v14  ;;  %8796 = vmatprep.subr.bf16.mxu0 %v8795_v11  ;;  %v9747_v14 = vld [vmem:[%s10824_s2 + $0x88] sm:$0xff] }
  0x7e   :  { %v87_v15 = vpop.permute.xlu0 %86  ;;  %v98_v16 = vpop.permute.xlu1 %97 }
  0x7f   :  { %vm100_vm3 = vcmp.eq.s32.totalorder %v87_v15, %v9659_v10  ;;  %vm102_vm4 = vcmp.eq.s32.totalorder %v98_v16, %v9659_v10  ;;  %v9754_v16 = vld [vmem:[%s10824_s2 + $0x90] sm:$0xff] }
  0x80   :  { %v104_v18 = vsel %vm100_vm3, 1.0, %v9600_v13  ;;  %v106_v19 = vsel %vm102_vm4, 1.0, %v9600_v13  ;;  %v9742_v13 = vld [vmem:[%s10824_s2 + $0x70] sm:$0xff] }
  0x81   :  { %8068 = vmatmul.mubr.msk.f32.vlgmr.msra.gmra.mrb[0].mxu0 %vm107_vm0, %v104_v18  ;;  %v8791_v15 = vpack.c.bf16 %v9742_v13, %v9737_v12  ;;  %v9761_v18 = vld [vmem:[%s10824_s2 + $0x98] sm:$0xff] }
  0x82   :  { %8070 = vmatprep.mubr.msk.f32.mxu0 %vm107_vm0, %v105_v17  ;;  %8798 = vmatpush3.bf16.msra.mxu0 %v8795_v11  ;;  %v8799_v17 = vpack.c.bf16 %v9754_v16, %v9747_v14 }
  0x83   :  { %8792 = vmatprep.subr.bf16.mxu1 %v8791_v15 }
  0x84   :  { %8800 = vmatprep.subr.bf16.mxu0 %v8799_v17  ;;  %8794 = vmatpush3.bf16.msra.mxu1 %v8791_v15 }
  0x85   :  { %8071 = vmatmul.mubr.msk.f32.gmra.mrb[2].mxu0 %vm107_vm0, %v106_v19  ;;  %v9766_v19 = vld [vmem:[%s10824_s2 + $0xa0] sm:$0xff] }
  0x86   :  { %8802 = vmatpush3.bf16.msra.mxu0 %v8799_v17  ;;  %v8803_v20 = vpack.c.bf16 %v9766_v19, %v9761_v18 }
  0x88   :  { %8804 = vmatprep.subr.bf16.mxu1 %v8803_v20 }
 0x154   :  { %v8069_v30 = vpop.f32.mrb[0].mxu0 }
 0x155   :  { %v252_v32 = vadd.f32 %v8069_v30, %v250_v27  ;;  %v186_v33 = vpop.f32.mrb[1].mxu0 }
 0x156   :  { %v245_v34 = vsel %vm205_vm5, %v238_v28, %v186_v33 }
 0x157   :  { %v261_v36 = vsel %vm257_vm6, %v252_v32, 0.0  ;;  %v251_v37 = vadd.f32 %v249_v31, %v245_v34 }
 0x158   :  { %262 = vadd.xlane.f32.xlu1 %v261_v36  ;;  %v8072_v38 = vpop.f32.mrb[2].mxu0 }
 0x159   :  { %v196_v39 = vpop.f32.mrb[3].mxu0  ;;  %v258_v40 = vsel %vm257_vm6, %v251_v37, 0.0  ;;  %v254_v43 = vadd.f32 %v8072_v38, %v250_v27 }
 0x15a   :  { %v247_v41 = vsel %vm205_vm5, %v242_v35, %v196_v39  ;;  %259 = vadd.xlane.f32.xlu0 %v258_v40  ;;  %v7391_v35 = vld [vmem:[%s10824_s2 + $0x10] ss:$0 sm:$0xff]  ;;  %v7392_v40 = vld [vmem:[%s10824_s2 + $0x11] ss:$0 sm:$0xff]  ;;  %vm3625_vm5 = vcmask 523264  }
 0x15b   :  { %v253_v42 = vadd.f32 %v249_v31, %v247_v41  ;;  %v267_v45 = vsel %vm257_vm6, %v254_v43, 0.0 }
 0x15d   :  { %v264_v44 = vsel %vm257_vm6, %v253_v42, 0.0 }
 0x15e   :  { %265 = vadd.xlane.f32.xlu0 %v264_v44 }
 0x162   :  { %268 = vadd.xlane.f32.xlu0 %v267_v45 }
 0x1e5   :  { %v263_v46 = vpop.xlane.xlu1 %262 }
 0x1e6   :  { %v272_v47 = vmul.f32 0.03125, %v263_v46 }
 0x1e7   :  { %v260_v48 = vpop.xlane.xlu0 %259 }
 0x1e8   :  { %v9690_v49 = vsub.f32 %v252_v32, %v272_v47  ;;  %v271_v50 = vmul.f32 0.03125, %v260_v48 }
 0x1ea   :  { %v9692_v51 = vsub.f32 %v251_v37, %v271_v50  ;;  %v280_v52 = vmul.f32 %v9690_v49, %v9690_v49 }
 0x1eb   :  { %v266_v53 = vpop.xlane.xlu0 %265 }
 0x1ec   :  { %v273_v54 = vmul.f32 0.03125, %v266_v53  ;;  %v286_v55 = vsel %vm257_vm6, %v280_v52, 0.0  ;;  %v279_v56 = vmul.f32 %v9692_v51, %v9692_v51 }
 0x1ed   :  { %287 = vadd.xlane.f32.xlu0 %v286_v55 }
 0x1ee   :  { %v9699_v57 = vsub.f32 %v253_v42, %v273_v54  ;;  %v283_v58 = vsel %vm257_vm6, %v279_v56, 0.0  ;;  %v9781_v42 = vld [vmem:[%s10824_s2 + $0xa8] sm:$0xff] }
 0x1ef   :  { %284 = vadd.xlane.f32.xlu1 %v283_v58  ;;  %v269_v59 = vpop.xlane.xlu0 %268 }
 0x1f0   :  { %v274_v60 = vmul.f32 0.03125, %v269_v59  ;;  %v281_v61 = vmul.f32 %v9699_v57, %v9699_v57 }
 0x1f2   :  { %v9704_v62 = vsub.f32 %v254_v43, %v274_v60  ;;  %v289_v63 = vsel %vm257_vm6, %v281_v61, 0.0  ;;  %v9786_v43 = vld [vmem:[%s10824_s2 + $0xb0] sm:$0xff] }
 0x1f3   :  { %290 = vadd.xlane.f32.xlu1 %v289_v63  ;;  %v8807_v48 = vpack.c.bf16 %v9786_v43, %v9781_v42 }
 0x1f4   :  { %v282_v0 = vmul.f32 %v9704_v62, %v9704_v62 }
 0x1f6   :  { %v292_v1 = vsel %vm257_vm6, %v282_v0, 0.0 }
 0x1f7   :  { %293 = vadd.xlane.f32.xlu0 %v292_v1 }
 0x27a   :  { %v288_v21 = vpop.xlane.xlu0 %287 }
 0x27b   :  { %v296_v22 = vmul.f32 0.03125, %v288_v21 }
 0x27c   :  { %v285_v24 = vpop.xlane.xlu1 %284 }
 0x27d   :  { %v300_v25 = vadd.f32 1e-06, %v296_v22  ;;  %v295_v26 = vmul.f32 0.03125, %v285_v24  ;;  %v9602_v22 = vmov 0  }
 0x27e   :  { %v23_v24 = vsel %vm22_vm9, 1, %v9602_v22 }
 0x27f   :  { %9408 = vrsqrt.f32 %v300_v25  ;;  %v299_v27 = vadd.f32 1e-06, %v295_v26  ;;  %v30_v25 = vrot.slane %v23_v24, %v9670_v23  ;;  %v9907_v24 = vpack.i.bf16 %v9754_v16, %v9747_v14 }
 0x280   :  { %v291_v28 = vpop.xlane.xlu1 %290 }
 0x281   :  { %9410 = vrsqrt.f32 %v299_v27  ;;  %v297_v29 = vmul.f32 0.03125, %v291_v28  ;;  %v38_v26 = vrot.slane %v30_v25, %v9670_v23  ;;  %v31_v27 = vcombine.high %v30_v25, %v30_v25 }
 0x282   :  { %v9911_v25 = vpack.i.bf16 %v9742_v13, %v9737_v12 }
 0x283   :  { %v301_v30 = vadd.f32 1e-06, %v297_v29  ;;  %vm46_vm10 = vcmp.ne.s32.totalorder %v38_v26, 0  ;;  %v45_v28 = vrot.slane %v31_v27, %v9670_v23 }
 0x284   :  { %v294_v31 = vpop.xlane.xlu0 %293  ;;  %v55_v29 = vsel %vm46_vm10, 1, %v9602_v22 }
 0x285   :  { %9412 = vrsqrt.f32 %v301_v30  ;;  %v298_v32 = vmul.f32 0.03125, %v294_v31  ;;  %v50_v30 = vadd.s32 8, %v9645_v3  ;;  %v60_v31 = vrot.slane %v55_v29, %v9653_v6 }
 0x286   :  { %vm47_vm11 = vcmp.ne.s32.totalorder %v45_v28, 0 }
 0x287   :  { %v302_v33 = vadd.f32 1e-06, %v298_v32  ;;  %vm54_vm12 = vcmp.le.s32.totalorder %v9659_v10, %v50_v30  ;;  %v56_v32 = vsel %vm47_vm11, 1, %v9602_v22  ;;  %vm65_vm13 = vcmp.eq.s32.totalorder %v60_v31, 1 }
 0x288   :  { %v64_v5 = vrot.slane %v56_v32, %v9653_v6  ;;  %vm9859_vm15 = vmand %vm65_vm13, %vm54_vm12  ;;  %v9901_v22 = vpack.i.bf16 %v9718_v4, %v9713_v2  ;;  %v9919_v2 = vpack.i.bf16 %v9766_v19, %v9761_v18  ;;  %v9923_v4 = vpack.i.bf16 %v9786_v43, %v9781_v42 }
 0x289   :  { %v9409_v34 = vpop.eup %9408  ;;  %9414 = vrsqrt.f32 %v302_v33  ;;  %vm9863_vm1 = vmand %vm65_vm13, %vm53_vm14 }
 0x28a   :  { %v308_v36 = vmul.f32 %v9409_v34, %v9690_v49  ;;  %vm66_vm2 = vcmp.eq.s32.totalorder %v64_v5, 1 }
 0x28b   :  { %v9411_v37 = vpop.eup %9410  ;;  %vm9875_vm3 = vmand %vm66_vm2, %vm54_vm12 }
 0x28c   :  { %v307_v38 = vmul.f32 %v9411_v37, %v9692_v51  ;;  %v316_v39 = vmul.f32 %v7391_v35, %v308_v36  ;;  %vm9879_vm4 = vmand %vm66_vm2, %vm53_vm14 }
 0x28e   :  { %v315_v41 = vmul.f32 %v7391_v35, %v307_v38  ;;  %v9791_v47 = vadd.f32 %v7392_v40, %v316_v39 }
 0x28f   :  { %v9413_v44 = vpop.eup %9412 }
 0x290   :  { %v9788_v45 = vadd.f32 %v7392_v40, %v315_v41  ;;  %v309_v46 = vmul.f32 %v9413_v44, %v9699_v57 }
 0x292   :  { %v317_v49 = vmul.f32 %v7391_v35, %v309_v46  ;;  %8081 = vmatprep.mubr.msk.f32.mxu1 %vm257_vm6, %v9788_v45  ;;  %8095 = vmatprep.mubr.msk.f32.mxu0 %vm257_vm6, %v9788_v45 }
 0x293   :  { %v9415_v50 = vpop.eup %9414  ;;  %8082 = vmatmul.mubr.msk.f32.vlgmr.msra.gmra.mrb[0].mxu1 %vm257_vm6, %v9791_v47  ;;  %8096 = vmatmul.mubr.msk.f32.vlgmr.msra.gmra.mrb[4].mxu0 %vm257_vm6, %v9791_v47 }
 0x294   :  { %v9803_v51 = vadd.f32 %v7392_v40, %v317_v49  ;;  %v310_v52 = vmul.f32 %v9415_v50, %v9704_v62  ;;  %8806 = vmatpush3.bf16.msra.mxu1 %v8803_v20  ;;  %v9891_v49 = vpack.i.bf16 %v9730_v9, %v9723_v7 }
 0x295   :  { %8808 = vmatprep.subr.bf16.mxu1 %v8807_v48 }
 0x296   :  { %v318_v53 = vmul.f32 %v7391_v35, %v310_v52  ;;  %8084 = vmatprep.mubr.msk.f32.mxu1 %vm257_vm6, %v9803_v51  ;;  %8098 = vmatprep.mubr.msk.f32.mxu0 %vm257_vm6, %v9803_v51 }
 0x298   :  { %v9810_v54 = vadd.f32 %v7392_v40, %v318_v53  ;;  %8810 = vmatpush3.bf16.msra.mxu1 %v8807_v48 }
 0x29a   :  { %8085 = vmatmul.mubr.msk.f32.gmra.mrb[2].mxu1 %vm257_vm6, %v9810_v54  ;;  %8099 = vmatmul.mubr.msk.f32.gmra.mrb[6].mxu0 %vm257_vm6, %v9810_v54 }
 0x29b   :  { %8109 = vmatprep.mubr.msk.f32.mxu1 %vm257_vm6, %v9788_v45 }
 0x29e   :  { %8110 = vmatmul.mubr.msk.f32.vlgmr.msra.gmra.mrb[4].mxu1 %vm257_vm6, %v9791_v47 }
 0x29f   :  { %8112 = vmatprep.mubr.msk.f32.mxu1 %vm257_vm6, %v9803_v51 }
 0x2a2   :  { %8113 = vmatmul.mubr.msk.f32.gmra.mrb[6].mxu1 %vm257_vm6, %v9810_v54 }
 0x366   :  { %v8083_v55 = vpop.f32.mrb[0].mxu1  ;;  %v8097_v56 = vpop.f32.mrb[4].mxu0 }
 0x367   :  { %v417_v57 = vpop.f32.mrb[1].mxu1  ;;  %v502_v58 = vpop.f32.mrb[5].mxu0 }
 0x368   :  { %v8811_v60 = vpack.c.bf16 %v8097_v56, %v502_v58  ;;  %8119 = vmatprep.mubr.msk.f32.mxu0 %vm606_vm7, %v417_v57 }
 0x36a   :  { %8813 = vmatprep.subr.msk.bf16.mxu0 %vm9826_vm8, %v8811_v60 }
 0x36b   :  { %8816 = vmatpush3.bf16.xpose.msk.msra.mxu0 %vm9826_vm8, %v8811_v60 }
 0x36d   :  { %v8086_v61 = vpop.f32.mrb[2].mxu1  ;;  %v8100_v62 = vpop.f32.mrb[6].mxu0 }
 0x36e   :  { %v427_v63 = vpop.f32.mrb[3].mxu1  ;;  %v512_v0 = vpop.f32.mrb[7].mxu0 }
 0x36f   :  { %v8817_v1 = vpack.c.bf16 %v8100_v62, %v512_v0  ;;  %8126 = vmatprep.mubr.msk.f32.mxu1 %vm606_vm7, %v427_v63 }
 0x371   :  { %v8111_v8 = vpop.f32.mrb[4].mxu1  ;;  %8819 = vmatprep.subr.msk.bf16.mxu1 %vm9826_vm8, %v8817_v1 }
 0x372   :  { %v587_v11 = vpop.f32.mrb[5].mxu1  ;;  %8120 = vmatmul.mubr.msk.f32.vlgmr.msra.gmra.mrb[8].mxu0 %vm606_vm7, %v8083_v55  ;;  %8822 = vmatpush3.bf16.xpose.msk.msra.mxu1 %vm9826_vm8, %v8817_v1 }
 0x373   :  { %v8823_v15 = vpack.c.bf16 %v8111_v8, %v587_v11 }
 0x375   :  { %v8114_v17 = vpop.f32.mrb[6].mxu1  ;;  %8824 = vmatprep.subr.bf16.mxu0 %v8823_v15 }
 0x376   :  { %v597_v20 = vpop.f32.mrb[7].mxu1  ;;  %8826 = vmatpush3.bf16.msra.mxu0 %v8823_v15 }
 0x377   :  { %v9841_v21 = vpack.c.bf16 %v8114_v17, %v597_v20 }
 0x379   :  { %8127 = vmatmul.mubr.msk.f32.vlgmr.msra.gmra.mrb[8].mxu1 %vm606_vm7, %v8086_v61  ;;  %8828 = vmatprep.subr.bf16.mxu0 %v9841_v21 }
 0x37a   :  { %8151 = vmatprep.mubr.msk.f32.mxu1 %vm257_vm6, %v9788_v45 }
 0x445   :  { %v8121_v34 = vpop.f32.mrb[8].mxu0 }
 0x446   :  { %v782_v35 = vsel %vm9859_vm15, %v8121_v34, -1e+09  ;;  %v685_v36 = vpop.f32.mrb[9].mxu0 }
 0x447   :  { %v781_v3 = vsel %vm9863_vm1, %v685_v36, -1e+09  ;;  %v788_v6 = vsel %vm107_vm0, %v782_v35, -inf }
 0x448   :  { %789 = vmax.xlane.f32.xlu0 %v788_v6  ;;  %v785_v37 = vsel %vm107_vm0, %v781_v3, -inf }
 0x449   :  { %786 = vmax.xlane.f32.xlu1 %v785_v37 }
 0x44c   :  { %v8128_v40 = vpop.f32.mrb[8].mxu1 }
 0x44d   :  { %v784_v41 = vsel %vm9875_vm3, %v8128_v40, -1e+09  ;;  %v772_v44 = vpop.f32.mrb[9].mxu1 }
 0x44e   :  { %v783_v46 = vsel %vm9879_vm4, %v772_v44, -1e+09  ;;  %v794_v48 = vsel %vm107_vm0, %v784_v41, -inf }
 0x44f   :  { %795 = vmax.xlane.f32.xlu0 %v794_v48  ;;  %v791_v10 = vsel %vm107_vm0, %v783_v46, -inf }
 0x450   :  { %792 = vmax.xlane.f32.xlu1 %v791_v10 }
 0x461   :  { %9229 = vrot.lane.b32.xlu1 %v9891_v49, %s9603_s29 }
 0x4d5   :  { %v790_v50 = vpop.xlane.xlu0 %789 }
 0x4d6   :  { %v798_v52 = vsub.f32 %v782_v35, %v790_v50  ;;  %v787_v53 = vpop.xlane.xlu1 %786 }
 0x4d7   :  { %v797_v55 = vsub.f32 %v781_v3, %v787_v53 }
 0x4d8   :  { %v803_v56 = vmul.f32 1.442695, %v798_v52 }
 0x4d9   :  { %v801_v57 = vmul.f32 1.442695, %v797_v55 }
 0x4da   :  { %9416 = vpow2.f32 %v803_v56 }
 0x4db   :  { %9418 = vpow2.f32 %v801_v57 }
 0x4dc   :  { %v796_v58 = vpop.xlane.xlu0 %795 }
 0x4dd   :  { %v800_v60 = vsub.f32 %v784_v41, %v796_v58  ;;  %v793_v61 = vpop.xlane.xlu1 %792 }
 0x4de   :  { %v799_v62 = vsub.f32 %v783_v46, %v793_v61 }
 0x4df   :  { %v807_v63 = vmul.f32 1.442695, %v800_v60 }
 0x4e0   :  { %v805_v0 = vmul.f32 1.442695, %v799_v62 }
 0x4e1   :  { %9420 = vpow2.f32 %v807_v63  ;;  %v9230_v12 = vpop.permute.xlu1 %9229 }
 0x4e2   :  { %9422 = vpow2.f32 %v805_v0  ;;  %v9232_v42 = vunpack.i.h.bf16 %v9230_v12  ;;  %v9231_v43 = vunpack.i.l.bf16 %v9230_v12 }
 0x4e4   :  { %v9417_v7 = vpop.eup %9416  ;;  %v8839_v36 = vpack.c.bf16 %v9232_v42, %v9231_v43 }
 0x4e5   :  { %v9419_v9 = vpop.eup %9418  ;;  %v812_v1 = vsel %vm107_vm0, %v9417_v7, 0.0 }
 0x4e6   :  { %813 = vadd.xlane.f32.xlu0 %v812_v1  ;;  %v809_v8 = vsel %vm107_vm0, %v9419_v9, 0.0 }
 0x4e7   :  { %810 = vadd.xlane.f32.xlu1 %v809_v8 }
 0x4eb   :  { %v9421_v11 = vpop.eup %9420 }
 0x4ec   :  { %v9423_v15 = vpop.eup %9422  ;;  %v818_v17 = vsel %vm107_vm0, %v9421_v11, 0.0 }
 0x4ed   :  { %819 = vadd.xlane.f32.xlu0 %v818_v17  ;;  %v815_v20 = vsel %vm107_vm0, %v9423_v15, 0.0 }
 0x4ee   :  { %816 = vadd.xlane.f32.xlu1 %v815_v20 }
 0x4ff   :  { %9239 = vrot.lane.b32.xlu1 %v9901_v22, %s9603_s29 }
 0x503   :  { %9234 = vrot.lane.b32.xlu0 %v9907_v24, %s9603_s29  ;;  %9244 = vrot.lane.b32.xlu1 %v9911_v25, %s9603_s29 }
 0x507   :  { %9249 = vrot.lane.b32.xlu0 %v9919_v2, %s9603_s29  ;;  %9254 = vrot.lane.b32.xlu1 %v9923_v4, %s9603_s29 }
 0x573   :  { %v814_v13 = vpop.xlane.xlu0 %813 }
 0x574   :  { %9424 = vrcp.f32 %v814_v13  ;;  %v811_v14 = vpop.xlane.xlu1 %810 }
 0x575   :  { %9426 = vrcp.f32 %v811_v14 }
 0x57a   :  { %v820_v16 = vpop.xlane.xlu0 %819 }
 0x57b   :  { %9428 = vrcp.f32 %v820_v16  ;;  %v817_v26 = vpop.xlane.xlu1 %816 }
 0x57c   :  { %9430 = vrcp.f32 %v817_v26 }
 0x57e   :  { %v9425_v18 = vpop.eup %9424  ;;  %v9235_v19 = vpop.permute.xlu0 %9234 }
 0x57f   :  { %v9427_v27 = vpop.eup %9426  ;;  %v9240_v28 = vpop.permute.xlu1 %9239  ;;  %v824_v32 = vmul.f32 %v9425_v18, %v9417_v7  ;;  %v9237_v37 = vunpack.i.h.bf16 %v9235_v19  ;;  %v9236_v40 = vunpack.i.l.bf16 %v9235_v19 }
 0x580   :  { %v9242_v29 = vunpack.i.h.bf16 %v9240_v28  ;;  %v9241_v30 = vunpack.i.l.bf16 %v9240_v28  ;;  %v822_v31 = vmul.f32 %v9427_v27, %v9419_v9 }
 0x581   :  { %v8843_v58 = vpack.c.bf16 %v9237_v37, %v9236_v40 }
 0x582   :  { %8133 = vmatprep.mubr.msk.f32.mxu0 %vm107_vm0, %v822_v31  ;;  %v8831_v5 = vpack.c.bf16 %v9242_v29, %v9241_v30  ;;  %v9250_v34 = vpop.permute.xlu0 %9249 }
 0x583   :  { %8134 = vmatmul.mubr.msk.f32.vlgmr.msra.gmra.mrb[10].mxu0 %vm107_vm0, %v824_v32  ;;  %v9245_v35 = vpop.permute.xlu1 %9244  ;;  %v9252_v3 = vunpack.i.h.bf16 %v9250_v34  ;;  %v9251_v6 = vunpack.i.l.bf16 %v9250_v34 }
 0x584   :  { %8830 = vmatpush3.bf16.msra.mxu0 %v9841_v21  ;;  %v9247_v41 = vunpack.i.h.bf16 %v9245_v35  ;;  %v9246_v44 = vunpack.i.l.bf16 %v9245_v35  ;;  %8832 = vmatprep.subr.bf16.mxu1 %v8831_v5 }
 0x585   :  { %v9429_v46 = vpop.eup %9428  ;;  %8840 = vmatprep.subr.bf16.mxu0 %v8839_v36  ;;  %8834 = vmatpush3.bf16.msra.mxu1 %v8831_v5  ;;  %v8847_v50 = vpack.c.bf16 %v9252_v3, %v9251_v6 }
 0x586   :  { %v9431_v48 = vpop.eup %9430  ;;  %v8835_v10 = vpack.c.bf16 %v9247_v41, %v9246_v44  ;;  %v828_v55 = vmul.f32 %v9429_v46, %v9421_v11 }
 0x587   :  { %v826_v52 = vmul.f32 %v9431_v48, %v9423_v15  ;;  %v9255_v53 = vpop.permute.xlu1 %9254 }
 0x588   :  { %8836 = vmatprep.subr.bf16.mxu1 %v8835_v10  ;;  %v9257_v56 = vunpack.i.h.bf16 %v9255_v53  ;;  %v9256_v57 = vunpack.i.l.bf16 %v9255_v53 }
 0x589   :  { %8140 = vmatprep.mubr.msk.f32.mxu0 %vm107_vm0, %v826_v52  ;;  %8838 = vmatpush3.bf16.msra.mxu1 %v8835_v10 }
 0x58a   :  { %8141 = vmatmul.mubr.msk.f32.vlgmr.msra.gmra.mrb[12].mxu0 %vm107_vm0, %v828_v55  ;;  %8848 = vmatprep.subr.bf16.mxu1 %v8847_v50  ;;  %v8851_v21 = vpack.c.bf16 %v9257_v56, %v9256_v57 }
 0x58b   :  { %8842 = vmatpush3.bf16.msra.mxu0 %v8839_v36  ;;  %8165 = vmatprep.mubr.msk.f32.mxu0 %vm257_vm6, %v9788_v45 }
 0x58c   :  { %8152 = vmatmul.mubr.msk.f32.vlgmr.msra.gmra.mrb[10].mxu1 %vm257_vm6, %v9791_v47  ;;  %8844 = vmatprep.subr.bf16.mxu0 %v8843_v58 }
 0x58d   :  { %8154 = vmatprep.mubr.msk.f32.mxu1 %vm257_vm6, %v9803_v51  ;;  %8850 = vmatpush3.bf16.msra.mxu1 %v8847_v50 }
 0x58e   :  { %8852 = vmatprep.subr.bf16.mxu1 %v8851_v21 }
 0x58f   :  { %8846 = vmatpush3.bf16.msra.mxu0 %v8843_v58 }
 0x590   :  { %8155 = vmatmul.mubr.msk.f32.gmra.mrb[12].mxu1 %vm257_vm6, %v9810_v54 }
 0x591   :  { %8854 = vmatpush3.bf16.msra.mxu1 %v8851_v21  ;;  %8179 = vmatprep.mubr.msk.f32.mxu1 %vm257_vm6, %v9788_v45 }
 0x592   :  { %8166 = vmatmul.mubr.msk.f32.vlgmr.msra.gmra.mrb[14].mxu0 %vm257_vm6, %v9791_v47 }
 0x593   :  { %8168 = vmatprep.mubr.msk.f32.mxu0 %vm257_vm6, %v9803_v51 }
 0x594   :  { %8180 = vmatmul.mubr.msk.f32.vlgmr.msra.gmra.mrb[14].mxu1 %vm257_vm6, %v9791_v47 }
 0x595   :  { %8182 = vmatprep.mubr.msk.f32.mxu1 %vm257_vm6, %v9803_v51 }
 0x596   :  { %8169 = vmatmul.mubr.msk.f32.gmra.mrb[16].mxu0 %vm257_vm6, %v9810_v54 }
 0x598   :  { %8183 = vmatmul.mubr.msk.f32.gmra.mrb[16].mxu1 %vm257_vm6, %v9810_v54 }
 0x656   :  { %v9956_v60 = vpop.f32.mrb[10].mxu0 }
 0x657   :  { %v9958_v61 = vpop.f32.mrb[11].mxu0 }
 0x65d   :  { %v9960_v62 = vpop.f32.mrb[12].mxu0 }
 0x65e   :  { %v9962_v63 = vpop.f32.mrb[13].mxu0 }
 0x65f   :  { %v8153_v0 = vpop.f32.mrb[10].mxu1 }
 0x660   :  { %v1074_v7 = vpop.f32.mrb[11].mxu1 }
 0x661   :  { %8189 = vmatprep.mubr.msk.f32.mxu0 %vm606_vm7, %v1074_v7 }
 0x663   :  { %v8156_v9 = vpop.f32.mrb[12].mxu1 }
 0x664   :  { %v1084_v1 = vpop.f32.mrb[13].mxu1 }
 0x665   :  { %v8167_v8 = vpop.f32.mrb[14].mxu0  ;;  %8196 = vmatprep.mubr.msk.f32.mxu1 %vm606_vm7, %v1084_v1 }
 0x666   :  { %v1175_v11 = vpop.f32.mrb[15].mxu0 }
 0x667   :  { %v8855_v15 = vpack.c.bf16 %v8167_v8, %v1175_v11  ;;  %v8181_v17 = vpop.f32.mrb[14].mxu1 }
 0x668   :  { %v1276_v20 = vpop.f32.mrb[15].mxu1 }
 0x669   :  { %v8170_v12 = vpop.f32.mrb[16].mxu0  ;;  %v8867_v13 = vpack.c.bf16 %v8181_v17, %v1276_v20  ;;  %8857 = vmatprep.subr.msk.bf16.mxu0 %vm9826_vm8, %v8855_v15 }
 0x66a   :  { %v1185_v14 = vpop.f32.mrb[17].mxu0  ;;  %8860 = vmatpush3.bf16.xpose.msk.msra.mxu0 %vm9826_vm8, %v8855_v15 }
 0x66b   :  { %v8861_v16 = vpack.c.bf16 %v8170_v12, %v1185_v14  ;;  %v8184_v26 = vpop.f32.mrb[16].mxu1  ;;  %8868 = vmatprep.subr.bf16.mxu0 %v8867_v13 }
 0x66c   :  { %v1286_v18 = vpop.f32.mrb[17].mxu1 }
 0x66d   :  { %v9970_v19 = vpack.c.bf16 %v8184_v26, %v1286_v18  ;;  %8863 = vmatprep.subr.msk.bf16.mxu1 %vm9826_vm8, %v8861_v16 }
 0x66e   :  { %8866 = vmatpush3.bf16.xpose.msk.msra.mxu1 %vm9826_vm8, %v8861_v16 }
 0x671   :  { %8190 = vmatmul.mubr.msk.f32.vlgmr.msra.gmra.mrb[18].mxu0 %vm606_vm7, %v8153_v0 }
 0x672   :  { %8870 = vmatpush3.bf16.msra.mxu0 %v8867_v13 }
 0x673   :  { %8872 = vmatprep.subr.bf16.mxu0 %v9970_v19 }
 0x675   :  { %8197 = vmatmul.mubr.msk.f32.vlgmr.msra.gmra.mrb[18].mxu1 %vm606_vm7, %v8156_v9 }
 0x744   :  { %v8191_v27 = vpop.f32.mrb[18].mxu0 }
 0x745   :  { %v1470_v42 = vsel %vm9859_vm15, %v8191_v27, -1e+09  ;;  %v1373_v43 = vpop.f32.mrb[19].mxu0 }
 0x746   :  { %v1469_v28 = vsel %vm9863_vm1, %v1373_v43, -1e+09  ;;  %v1476_v29 = vsel %vm107_vm0, %v1470_v42, -inf }
 0x747   :  { %1477 = vmax.xlane.f32.xlu1 %v1476_v29  ;;  %v1473_v30 = vsel %vm107_vm0, %v1469_v28, -inf }
 0x748   :  { %v8198_v31 = vpop.f32.mrb[18].mxu1  ;;  %1474 = vmax.xlane.f32.xlu0 %v1473_v30 }
 0x749   :  { %v1460_v32 = vpop.f32.mrb[19].mxu1  ;;  %v1472_v35 = vsel %vm9875_vm3, %v8198_v31, -1e+09 }
 0x74a   :  { %v1471_v5 = vsel %vm9879_vm4, %v1460_v32, -1e+09  ;;  %v1482_v36 = vsel %vm107_vm0, %v1472_v35, -inf }
 0x74b   :  { %v1479_v34 = vsel %vm107_vm0, %v1471_v5, -inf }
 0x74c   :  { %1480 = vmax.xlane.f32.xlu0 %v1479_v34 }
 0x750   :  { %1483 = vmax.xlane.f32.xlu0 %v1482_v36 }
 0x758   :  { %9259 = vrot.lane.b32.xlu1 %v9901_v22, %s9604_s30 }
 0x7d4   :  { %v1478_v3 = vpop.xlane.xlu1 %1477 }
 0x7d5   :  { %v1486_v6 = vsub.f32 %v1470_v42, %v1478_v3  ;;  %v1475_v37 = vpop.xlane.xlu0 %1474 }
 0x7d6   :  { %v1485_v40 = vsub.f32 %v1469_v28, %v1475_v37 }
 0x7d7   :  { %v1491_v41 = vmul.f32 1.442695, %v1486_v6 }
 0x7d8   :  { %v1489_v44 = vmul.f32 1.442695, %v1485_v40  ;;  %v9260_v1 = vpop.permute.xlu1 %9259  ;;  %v1679_v40 = vld [vmem:[%s10824_s2 + $0xc0] sm:$0xff] }
 0x7d9   :  { %9432 = vpow2.f32 %v1491_v41  ;;  %v1481_v46 = vpop.xlane.xlu0 %1480  ;;  %v9262_v13 = vunpack.i.h.bf16 %v9260_v1  ;;  %v9261_v14 = vunpack.i.l.bf16 %v9260_v1  ;;  %8213 = vmatprep.subr.mxu1 %v1679_v40  ;;  %v991_v41 = vld [vmem:[%s10824_s2 + $0xb8] sm:$0xff] }
 0x7da   :  { %9434 = vpow2.f32 %v1489_v44  ;;  %v1487_v48 = vsub.f32 %v1471_v5, %v1481_v46  ;;  %8214 = vmatpush3.msra.mxu1 %v1679_v40 }
 0x7db   :  { %v8875_v42 = vpack.c.bf16 %v9262_v13, %v9261_v14  ;;  %8221 = vmatprep.subr.mxu1 %v991_v41 }
 0x7dc   :  { %v1493_v10 = vmul.f32 1.442695, %v1487_v48 }
 0x7dd   :  { %v1484_v50 = vpop.xlane.xlu0 %1483 }
 0x7de   :  { %9436 = vpow2.f32 %v1493_v10  ;;  %v1488_v52 = vsub.f32 %v1472_v35, %v1484_v50 }
 0x7e0   :  { %v1495_v53 = vmul.f32 1.442695, %v1488_v52 }
 0x7e2   :  { %9438 = vpow2.f32 %v1495_v53 }
 0x7e3   :  { %v9433_v55 = vpop.eup %9432 }
 0x7e4   :  { %v9435_v56 = vpop.eup %9434  ;;  %v1500_v57 = vsel %vm107_vm0, %v9433_v55, 0.0 }
 0x7e5   :  { %1501 = vadd.xlane.f32.xlu0 %v1500_v57  ;;  %v1497_v58 = vsel %vm107_vm0, %v9435_v56, 0.0 }
 0x7e6   :  { %1498 = vadd.xlane.f32.xlu1 %v1497_v58 }
 0x7e8   :  { %v9437_v21 = vpop.eup %9436 }
 0x7e9   :  { %v1503_v0 = vsel %vm107_vm0, %v9437_v21, 0.0 }
 0x7ea   :  { %1504 = vadd.xlane.f32.xlu1 %v1503_v0 }
 0x7ec   :  { %v9439_v7 = vpop.eup %9438 }
 0x7ed   :  { %v1506_v9 = vsel %vm107_vm0, %v9439_v7, 0.0 }
 0x7ee   :  { %1507 = vadd.xlane.f32.xlu0 %v1506_v9 }
 0x7fb   :  { %9269 = vrot.lane.b32.xlu1 %v9891_v49, %s9604_s30 }
 0x7ff   :  { %9274 = vrot.lane.b32.xlu1 %v9907_v24, %s9604_s30 }
 0x803   :  { %9284 = vrot.lane.b32.xlu1 %v9923_v4, %s9604_s30 }
 0x804   :  { %9264 = vrot.lane.b32.xlu0 %v9911_v25, %s9604_s30 }
 0x808   :  { %9279 = vrot.lane.b32.xlu0 %v9919_v2, %s9604_s30 }
 0x872   :  { %v1502_v8 = vpop.xlane.xlu0 %1501 }
 0x873   :  { %9440 = vrcp.f32 %v1502_v8  ;;  %v1499_v11 = vpop.xlane.xlu1 %1498 }
 0x874   :  { %9442 = vrcp.f32 %v1499_v11 }
 0x877   :  { %v1505_v15 = vpop.xlane.xlu1 %1504 }
 0x878   :  { %9444 = vrcp.f32 %v1505_v15 }
 0x87b   :  { %v1508_v17 = vpop.xlane.xlu0 %1507  ;;  %v9270_v43 = vpop.permute.xlu1 %9269 }
 0x87c   :  { %9446 = vrcp.f32 %v1508_v17  ;;  %v9272_v5 = vunpack.i.h.bf16 %v9270_v43  ;;  %v9271_v34 = vunpack.i.l.bf16 %v9270_v43 }
 0x87d   :  { %v9441_v20 = vpop.eup %9440 }
 0x87e   :  { %v9443_v12 = vpop.eup %9442  ;;  %v1512_v26 = vmul.f32 %v9441_v20, %v9433_v55  ;;  %v8883_v6 = vpack.c.bf16 %v9272_v5, %v9271_v34 }
 0x87f   :  { %v1510_v16 = vmul.f32 %v9443_v12, %v9435_v56  ;;  %v9265_v18 = vpop.permute.xlu0 %9264  ;;  %v9275_v36 = vpop.permute.xlu1 %9274 }
 0x880   :  { %v9267_v29 = vunpack.i.h.bf16 %v9265_v18  ;;  %v9266_v30 = vunpack.i.l.bf16 %v9265_v18  ;;  %v9276_v3 = vunpack.i.l.bf16 %v9275_v36 }
 0x881   :  { %8203 = vmatprep.mubr.msk.f32.mxu0 %vm107_vm0, %v1510_v16 }
 0x882   :  { %v9445_v27 = vpop.eup %9444  ;;  %8204 = vmatmul.mubr.msk.f32.vlgmr.msra.gmra.mrb[20].mxu0 %vm107_vm0, %v1512_v26  ;;  %v8879_v35 = vpack.c.bf16 %v9267_v29, %v9266_v30 }
 0x883   :  { %8874 = vmatpush3.bf16.msra.mxu0 %v9970_v19  ;;  %v1514_v28 = vmul.f32 %v9445_v27, %v9437_v21  ;;  %v9277_v19 = vunpack.i.h.bf16 %v9275_v36  ;;  %v9280_v44 = vpop.permute.xlu0 %9279  ;;  %v9285_v53 = vpop.permute.xlu1 %9284 }
 0x884   :  { %8876 = vmatprep.subr.bf16.mxu0 %v8875_v42  ;;  %v9282_v46 = vunpack.i.h.bf16 %v9280_v44  ;;  %v9281_v48 = vunpack.i.l.bf16 %v9280_v44  ;;  %v9287_v57 = vunpack.i.h.bf16 %v9285_v53  ;;  %v9286_v58 = vunpack.i.l.bf16 %v9285_v53 }
 0x885   :  { %8210 = vmatprep.mubr.msk.f32.mxu0 %vm107_vm0, %v1514_v28  ;;  %v8887_v37 = vpack.c.bf16 %v9277_v19, %v9276_v3 }
 0x886   :  { %v9447_v31 = vpop.eup %9446  ;;  %v8891_v52 = vpack.c.bf16 %v9282_v46, %v9281_v48  ;;  %v8895_v21 = vpack.c.bf16 %v9287_v57, %v9286_v58 }
 0x887   :  { %v1516_v32 = vmul.f32 %v9447_v31, %v9439_v7 }
 0x889   :  { %8211 = vmatmul.mubr.msk.f32.vlgmr.msra.gmra.mrb[22].mxu0 %vm107_vm0, %v1516_v32 }
 0x88a   :  { %8878 = vmatpush3.bf16.msra.mxu0 %v8875_v42  ;;  %8237 = vmatprep.mubr.msk.f32.mxu0 %vm257_vm6, %v9788_v45 }
 0x88b   :  { %8880 = vmatprep.subr.bf16.mxu0 %v8879_v35 }
 0x88e   :  { %8882 = vmatpush3.bf16.msra.mxu0 %v8879_v35 }
 0x88f   :  { %8884 = vmatprep.subr.bf16.mxu0 %v8883_v6 }
 0x891   :  { %8238 = vmatmul.mubr.msk.f32.vlgmr.msra.gmra.mrb[24].mxu0 %vm257_vm6, %v9791_v47 }
 0x892   :  { %8240 = vmatprep.mubr.msk.f32.mxu0 %vm257_vm6, %v9803_v51  ;;  %8886 = vmatpush3.bf16.msra.mxu0 %v8883_v6 }
 0x893   :  { %8888 = vmatprep.subr.bf16.mxu0 %v8887_v37 }
 0x895   :  { %8241 = vmatmul.mubr.msk.f32.gmra.mrb[26].mxu0 %vm257_vm6, %v9810_v54 }
 0x896   :  { %8890 = vmatpush3.bf16.msra.mxu0 %v8887_v37  ;;  %8251 = vmatprep.mubr.msk.f32.mxu0 %vm257_vm6, %v9788_v45 }
 0x899   :  { %8252 = vmatmul.mubr.msk.f32.vlgmr.msra.gmra.mrb[28].mxu0 %vm257_vm6, %v9791_v47 }
 0x89a   :  { %8254 = vmatprep.mubr.msk.f32.mxu0 %vm257_vm6, %v9803_v51 }
 0x89d   :  { %8255 = vmatmul.mubr.msk.f32.gmra.mrb[30].mxu0 %vm257_vm6, %v9810_v54 }
 0x955   :  { %v8205_v10 = vpop.f32.mrb[20].mxu0 }
 0x956   :  { %v1589_v50 = vpop.f32.mrb[21].mxu0 }
 0x957   :  { %8215 = vmatprep.mubr.msk.f32.mxu1 %vm606_vm7, %v1589_v50 }
 0x958   :  { %8216 = vmatmul.mubr.msk.f32.vlgmr.msra.gmra.mrb[20].mxu1 %vm606_vm7, %v8205_v10 }
 0x959   :  { %8222 = vmatpush3.msra.mxu1 %v991_v41 }
 0x95a   :  { %8892 = vmatprep.subr.bf16.mxu1 %v8891_v52 }
 0x95c   :  { %v8212_v55 = vpop.f32.mrb[22].mxu0 }
 0x95d   :  { %v1670_v56 = vpop.f32.mrb[23].mxu0 }
 0x95e   :  { %8218 = vmatprep.mubr.msk.f32.mxu1 %vm606_vm7, %v1670_v56 }
 0x95f   :  { %8219 = vmatmul.mubr.msk.f32.gmra.mrb[22].mxu1 %vm606_vm7, %v8212_v55 }
 0x960   :  { %8223 = vmatprep.mubr.msk.f32.mxu1 %vm606_vm7, %v9958_v61 }
 0x963   :  { %8224 = vmatmul.mubr.msk.f32.vlgmr.msra.gmra.mrb[20].mxu1 %vm606_vm7, %v9956_v60 }
 0x964   :  { %v8239_v0 = vpop.f32.mrb[24].mxu0  ;;  %8226 = vmatprep.mubr.msk.f32.mxu1 %vm606_vm7, %v9962_v63  ;;  %8894 = vmatpush3.bf16.msra.mxu1 %v8891_v52 }
 0x965   :  { %v1952_v7 = vpop.f32.mrb[25].mxu0  ;;  %8896 = vmatprep.subr.bf16.mxu1 %v8895_v21 }
 0x966   :  { %8275 = vmatprep.mubr.msk.f32.mxu0 %vm606_vm7, %v1952_v7 }
 0x967   :  { %8227 = vmatmul.mubr.msk.f32.gmra.mrb[22].mxu1 %vm606_vm7, %v9960_v62 }
 0x968   :  { %v8242_v9 = vpop.f32.mrb[26].mxu0  ;;  %8898 = vmatpush3.bf16.msra.mxu1 %v8895_v21  ;;  %8265 = vmatprep.mubr.msk.f32.mxu1 %vm257_vm6, %v9788_v45 }
 0x969   :  { %v1962_v61 = vpop.f32.mrb[27].mxu0 }
 0x96b   :  { %8266 = vmatmul.mubr.msk.f32.vlgmr.msra.gmra.mrb[24].mxu1 %vm257_vm6, %v9791_v47 }
 0x96c   :  { %v8253_v60 = vpop.f32.mrb[28].mxu0  ;;  %8268 = vmatprep.mubr.msk.f32.mxu1 %vm257_vm6, %v9803_v51 }
 0x96d   :  { %v2049_v63 = vpop.f32.mrb[29].mxu0 }
 0x96e   :  { %v8899_v1 = vpack.c.bf16 %v8253_v60, %v2049_v63 }
 0x96f   :  { %8269 = vmatmul.mubr.msk.f32.gmra.mrb[26].mxu1 %vm257_vm6, %v9810_v54 }
 0x970   :  { %v8256_v8 = vpop.f32.mrb[30].mxu0  ;;  %8901 = vmatprep.subr.msk.bf16.mxu0 %vm9826_vm8, %v8899_v1  ;;  %8282 = vmatprep.mubr.msk.f32.mxu1 %vm606_vm7, %v1962_v61 }
 0x971   :  { %v2059_v62 = vpop.f32.mrb[31].mxu0  ;;  %8904 = vmatpush3.bf16.xpose.msk.msra.mxu0 %vm9826_vm8, %v8899_v1 }
 0x972   :  { %v8905_v11 = vpack.c.bf16 %v8256_v8, %v2059_v62 }
 0x974   :  { %8907 = vmatprep.subr.msk.bf16.mxu1 %vm9826_vm8, %v8905_v11 }
 0x975   :  { %8910 = vmatpush3.bf16.xpose.msk.msra.mxu1 %vm9826_vm8, %v8905_v11 }
 0x978   :  { %8276 = vmatmul.mubr.msk.f32.vlgmr.msra.gmra.mrb[32].mxu0 %vm606_vm7, %v8239_v0 }
 0x97c   :  { %8283 = vmatmul.mubr.msk.f32.vlgmr.msra.gmra.mrb[28].mxu1 %vm606_vm7, %v8242_v9 }
 0xa3e   :  { %v8267_v15 = vpop.f32.mrb[24].mxu1 }
 0xa3f   :  { %v2146_v17 = vpop.f32.mrb[25].mxu1 }
 0xa40   :  { %v8911_v20 = vpack.c.bf16 %v8267_v15, %v2146_v17 }
 0xa42   :  { %v8270_v12 = vpop.f32.mrb[26].mxu1  ;;  %8912 = vmatprep.subr.bf16.mxu0 %v8911_v20 }
 0xa43   :  { %v2156_v13 = vpop.f32.mrb[27].mxu1  ;;  %8914 = vmatpush3.bf16.msra.mxu0 %v8911_v20 }
 0xa44   :  { %v8915_v14 = vpack.c.bf16 %v8270_v12, %v2156_v13 }
 0xa46   :  { %8916 = vmatprep.subr.bf16.mxu1 %v8915_v14 }
 0xa47   :  { %8918 = vmatpush3.bf16.msra.mxu1 %v8915_v14 }
 0xa4b   :  { %v8277_v16 = vpop.f32.mrb[32].mxu0 }
 0xa4c   :  { %v2340_v26 = vsel %vm9859_vm15, %v8277_v16, -1e+09  ;;  %v2243_v18 = vpop.f32.mrb[33].mxu0 }
 0xa4d   :  { %v2339_v27 = vsel %vm9863_vm1, %v2243_v18, -1e+09  ;;  %v2346_v42 = vsel %vm107_vm0, %v2340_v26, -inf }
 0xa4e   :  { %2347 = vmax.xlane.f32.xlu1 %v2346_v42  ;;  %v2343_v43 = vsel %vm107_vm0, %v2339_v27, -inf }
 0xa4f   :  { %v8284_v28 = vpop.f32.mrb[28].mxu1  ;;  %2344 = vmax.xlane.f32.xlu0 %v2343_v43 }
 0xa50   :  { %v2330_v29 = vpop.f32.mrb[29].mxu1  ;;  %v2342_v32 = vsel %vm9875_vm3, %v8284_v28, -1e+09 }
 0xa51   :  { %v2341_v30 = vsel %vm9879_vm4, %v2330_v29, -1e+09  ;;  %v2352_v5 = vsel %vm107_vm0, %v2342_v32, -inf }
 0xa52   :  { %v2349_v31 = vsel %vm107_vm0, %v2341_v30, -inf }
 0xa53   :  { %2350 = vmax.xlane.f32.xlu0 %v2349_v31 }
 0xa57   :  { %2353 = vmax.xlane.f32.xlu0 %v2352_v5 }
 0xadb   :  { %v2348_v34 = vpop.xlane.xlu1 %2347 }
 0xadc   :  { %v2356_v35 = vsub.f32 %v2340_v26, %v2348_v34  ;;  %v2345_v36 = vpop.xlane.xlu0 %2344 }
 0xadd   :  { %v2355_v19 = vsub.f32 %v2339_v27, %v2345_v36 }
 0xade   :  { %v2361_v3 = vmul.f32 1.442695, %v2356_v35 }
 0xadf   :  { %v2359_v6 = vmul.f32 1.442695, %v2355_v19 }
 0xae0   :  { %9448 = vpow2.f32 %v2361_v3  ;;  %v2351_v37 = vpop.xlane.xlu0 %2350 }
 0xae1   :  { %9450 = vpow2.f32 %v2359_v6  ;;  %v2357_v40 = vsub.f32 %v2341_v30, %v2351_v37 }
 0xae3   :  { %v2363_v41 = vmul.f32 1.442695, %v2357_v40 }
 0xae4   :  { %v2354_v44 = vpop.xlane.xlu0 %2353 }
 0xae5   :  { %9452 = vpow2.f32 %v2363_v41  ;;  %v2358_v46 = vsub.f32 %v2342_v32, %v2354_v44  ;;  %v2549_v32 = vld [vmem:[%s10824_s2 + $0xc8] sm:$0xff] }
 0xae6   :  { %8299 = vmatprep.subr.mxu1 %v2549_v32 }
 0xae7   :  { %v2365_v48 = vmul.f32 1.442695, %v2358_v46 }
 0xae9   :  { %9454 = vpow2.f32 %v2365_v48 }
 0xaea   :  { %v9449_v10 = vpop.eup %9448 }
 0xaeb   :  { %v9451_v50 = vpop.eup %9450  ;;  %v2370_v52 = vsel %vm107_vm0, %v9449_v10, 0.0 }
 0xaec   :  { %2371 = vadd.xlane.f32.xlu0 %v2370_v52  ;;  %v2367_v53 = vsel %vm107_vm0, %v9451_v50, 0.0 }
 0xaed   :  { %2368 = vadd.xlane.f32.xlu1 %v2367_v53 }
 0xaef   :  { %v9453_v55 = vpop.eup %9452 }
 0xaf0   :  { %v2373_v56 = vsel %vm107_vm0, %v9453_v55, 0.0 }
 0xaf1   :  { %2374 = vadd.xlane.f32.xlu1 %v2373_v56 }
 0xaf3   :  { %v9455_v57 = vpop.eup %9454 }
 0xaf4   :  { %v2376_v58 = vsel %vm107_vm0, %v9455_v57, 0.0 }
 0xaf5   :  { %2377 = vadd.xlane.f32.xlu0 %v2376_v58 }
 0xb02   :  { %9289 = vrot.lane.b32.xlu1 %v9891_v49, %s9605_s10 }
 0xb06   :  { %9299 = vrot.lane.b32.xlu1 %v9901_v22, %s9605_s10 }
 0xb0a   :  { %9304 = vrot.lane.b32.xlu1 %v9911_v25, %s9605_s10 }
 0xb0b   :  { %9294 = vrot.lane.b32.xlu0 %v9907_v24, %s9605_s10 }
 0xb0e   :  { %9314 = vrot.lane.b32.xlu1 %v9923_v4, %s9605_s10 }
 0xb0f   :  { %9309 = vrot.lane.b32.xlu0 %v9919_v2, %s9605_s10 }
 0xb79   :  { %v2372_v21 = vpop.xlane.xlu0 %2371 }
 0xb7a   :  { %9456 = vrcp.f32 %v2372_v21  ;;  %v2369_v0 = vpop.xlane.xlu1 %2368 }
 0xb7b   :  { %9458 = vrcp.f32 %v2369_v0 }
 0xb7e   :  { %v2375_v49 = vpop.xlane.xlu1 %2374 }
 0xb7f   :  { %9460 = vrcp.f32 %v2375_v49 }
 0xb82   :  { %v9290_v7 = vpop.permute.xlu1 %9289  ;;  %v2378_v22 = vpop.xlane.xlu0 %2377 }
 0xb83   :  { %9462 = vrcp.f32 %v2378_v22  ;;  %v9292_v29 = vunpack.i.h.bf16 %v9290_v7  ;;  %v9291_v30 = vunpack.i.l.bf16 %v9290_v7 }
 0xb84   :  { %v9457_v9 = vpop.eup %9456 }
 0xb85   :  { %v9459_v25 = vpop.eup %9458  ;;  %v2382_v4 = vmul.f32 %v9457_v9, %v9449_v10  ;;  %v8927_v31 = vpack.c.bf16 %v9292_v29, %v9291_v30 }
 0xb86   :  { %v9300_v61 = vpop.permute.xlu1 %9299  ;;  %v2380_v60 = vmul.f32 %v9459_v25, %v9451_v50  ;;  %v9295_v24 = vpop.permute.xlu0 %9294 }
 0xb87   :  { %v9302_v63 = vunpack.i.h.bf16 %v9300_v61  ;;  %v9301_v1 = vunpack.i.l.bf16 %v9300_v61  ;;  %v9297_v5 = vunpack.i.h.bf16 %v9295_v24  ;;  %v9296_v34 = vunpack.i.l.bf16 %v9295_v24 }
 0xb88   :  { %8289 = vmatprep.mubr.msk.f32.mxu0 %vm107_vm0, %v2380_v60 }
 0xb89   :  { %v9461_v2 = vpop.eup %9460  ;;  %v8919_v8 = vpack.c.bf16 %v9302_v63, %v9301_v1  ;;  %8290 = vmatmul.mubr.msk.f32.vlgmr.msra.gmra.mrb[34].mxu0 %vm107_vm0, %v2382_v4  ;;  %v8931_v36 = vpack.c.bf16 %v9297_v5, %v9296_v34 }
 0xb8a   :  { %v9305_v62 = vpop.permute.xlu1 %9304  ;;  %8315 = vmatprep.mubr.msk.f32.mxu0 %vm257_vm6, %v9788_v45  ;;  %v2384_v11 = vmul.f32 %v9461_v2, %v9453_v55  ;;  %v9310_v15 = vpop.permute.xlu0 %9309 }
 0xb8b   :  { %v9307_v17 = vunpack.i.h.bf16 %v9305_v62  ;;  %v9306_v20 = vunpack.i.l.bf16 %v9305_v62  ;;  %8920 = vmatprep.subr.bf16.mxu0 %v8919_v8  ;;  %v9312_v12 = vunpack.i.h.bf16 %v9310_v15  ;;  %v9311_v13 = vunpack.i.l.bf16 %v9310_v15 }
 0xb8c   :  { %8296 = vmatprep.mubr.msk.f32.mxu1 %vm107_vm0, %v2384_v11  ;;  %8922 = vmatpush3.bf16.msra.mxu0 %v8919_v8 }
 0xb8d   :  { %v9463_v14 = vpop.eup %9462  ;;  %v8923_v16 = vpack.c.bf16 %v9307_v17, %v9306_v20  ;;  %v8935_v26 = vpack.c.bf16 %v9312_v12, %v9311_v13 }
 0xb8e   :  { %v2386_v18 = vmul.f32 %v9463_v14, %v9455_v57  ;;  %v9315_v27 = vpop.permute.xlu1 %9314 }
 0xb8f   :  { %8924 = vmatprep.subr.bf16.mxu0 %v8923_v16  ;;  %v9317_v42 = vunpack.i.h.bf16 %v9315_v27  ;;  %v9316_v43 = vunpack.i.l.bf16 %v9315_v27 }
 0xb90   :  { %8297 = vmatmul.mubr.msk.f32.vlgmr.msra.gmra.mrb[30].mxu1 %vm107_vm0, %v2386_v18  ;;  %8926 = vmatpush3.bf16.msra.mxu0 %v8923_v16 }
 0xb91   :  { %v8939_v28 = vpack.c.bf16 %v9317_v42, %v9316_v43  ;;  %8936 = vmatprep.subr.bf16.mxu0 %v8935_v26  ;;  %8300 = vmatpush3.msra.mxu1 %v2549_v32 }
 0xb92   :  { %8928 = vmatprep.subr.bf16.mxu1 %v8927_v31 }
 0xb93   :  { %8316 = vmatmul.mubr.msk.f32.vlgmr.msra.gmra.mrb[36].mxu0 %vm257_vm6, %v9791_v47 }
 0xb94   :  { %8318 = vmatprep.mubr.msk.f32.mxu0 %vm257_vm6, %v9803_v51  ;;  %8938 = vmatpush3.bf16.msra.mxu0 %v8935_v26 }
 0xb95   :  { %8940 = vmatprep.subr.bf16.mxu0 %v8939_v28 }
 0xb97   :  { %8319 = vmatmul.mubr.msk.f32.gmra.mrb[38].mxu0 %vm257_vm6, %v9810_v54 }
 0xb98   :  { %8942 = vmatpush3.bf16.msra.mxu0 %v8939_v28  ;;  %8343 = vmatprep.mubr.msk.f32.mxu0 %vm257_vm6, %v9788_v45 }
 0xb9b   :  { %8344 = vmatmul.mubr.msk.f32.vlgmr.msra.gmra.mrb[40].mxu0 %vm257_vm6, %v9791_v47 }
 0xb9c   :  { %8346 = vmatprep.mubr.msk.f32.mxu0 %vm257_vm6, %v9803_v51 }
 0xb9f   :  { %8347 = vmatmul.mubr.msk.f32.gmra.mrb[42].mxu0 %vm257_vm6, %v9810_v54 }
 0xc5c   :  { %v8291_v35 = vpop.f32.mrb[34].mxu0 }
 0xc5d   :  { %v2459_v19 = vpop.f32.mrb[35].mxu0 }
 0xc5e   :  { %8301 = vmatprep.mubr.msk.f32.mxu1 %vm606_vm7, %v2459_v19 }
 0xc5f   :  { %8302 = vmatmul.mubr.msk.f32.vlgmr.msra.gmra.mrb[20].mxu1 %vm606_vm7, %v8291_v35 }
 0xc60   :  { %8930 = vmatpush3.bf16.msra.mxu1 %v8927_v31 }
 0xc61   :  { %8932 = vmatprep.subr.bf16.mxu1 %v8931_v36 }
 0xc63   :  { %v8298_v3 = vpop.f32.mrb[30].mxu1 }
 0xc64   :  { %v2540_v6 = vpop.f32.mrb[31].mxu1  ;;  %8934 = vmatpush3.bf16.msra.mxu1 %v8931_v36 }
 0xc65   :  { %8304 = vmatprep.mubr.msk.f32.mxu1 %vm606_vm7, %v2540_v6 }
 0xc66   :  { %8305 = vmatmul.mubr.msk.f32.gmra.mrb[22].mxu1 %vm606_vm7, %v8298_v3  ;;  %v8317_v37 = vpop.f32.mrb[36].mxu0 }
 0xc67   :  { %v2729_v40 = vpop.f32.mrb[37].mxu0  ;;  %8329 = vmatprep.mubr.msk.f32.mxu1 %vm257_vm6, %v9788_v45 }
 0xc6a   :  { %v8320_v41 = vpop.f32.mrb[38].mxu0  ;;  %8330 = vmatmul.mubr.msk.f32.vlgmr.msra.gmra.mrb[32].mxu1 %vm257_vm6, %v9791_v47 }
 0xc6b   :  { %v2739_v44 = vpop.f32.mrb[39].mxu0  ;;  %8332 = vmatprep.mubr.msk.f32.mxu1 %vm257_vm6, %v9803_v51 }
 0xc6c   :  { %8360 = vmatprep.mubr.msk.f32.mxu0 %vm606_vm7, %v2739_v44 }
 0xc6e   :  { %8333 = vmatmul.mubr.msk.f32.gmra.mrb[34].mxu1 %vm257_vm6, %v9810_v54  ;;  %v8345_v46 = vpop.f32.mrb[40].mxu0 }
 0xc6f   :  { %v2923_v48 = vpop.f32.mrb[41].mxu0  ;;  %8353 = vmatprep.mubr.msk.f32.mxu1 %vm606_vm7, %v2729_v40 }
 0xc70   :  { %v8955_v10 = vpack.c.bf16 %v8345_v46, %v2923_v48  ;;  %v3326_v48 = vld [vmem:[%s10824_s2 + $0xd0] sm:$0xff] }
 0xc72   :  { %v8348_v50 = vpop.f32.mrb[42].mxu0 }
 0xc73   :  { %v2933_v52 = vpop.f32.mrb[43].mxu0 }
 0xc74   :  { %v8959_v53 = vpack.c.bf16 %v8348_v50, %v2933_v52 }
 0xd3d   :  { %v8331_v55 = vpop.f32.mrb[32].mxu1 }
 0xd3e   :  { %v2826_v56 = vpop.f32.mrb[33].mxu1 }
 0xd3f   :  { %v8943_v57 = vpack.c.bf16 %v8331_v55, %v2826_v56 }
 0xd41   :  { %v8334_v58 = vpop.f32.mrb[34].mxu1  ;;  %8945 = vmatprep.subr.msk.bf16.mxu1 %vm9826_vm8, %v8943_v57 }
 0xd42   :  { %v2836_v21 = vpop.f32.mrb[35].mxu1  ;;  %8948 = vmatpush3.bf16.xpose.msk.msra.mxu1 %vm9826_vm8, %v8943_v57 }
 0xd43   :  { %v8949_v0 = vpack.c.bf16 %v8334_v58, %v2836_v21  ;;  %8956 = vmatprep.subr.bf16.mxu1 %v8955_v10 }
 0xd45   :  { %8951 = vmatprep.subr.msk.bf16.mxu0 %vm9826_vm8, %v8949_v0 }
 0xd46   :  { %8954 = vmatpush3.bf16.xpose.msk.msra.mxu0 %vm9826_vm8, %v8949_v0 }
 0xd47   :  { %8960 = vmatprep.subr.bf16.mxu0 %v8959_v53 }
 0xd49   :  { %8354 = vmatmul.mubr.msk.f32.vlgmr.msra.gmra.mrb[36].mxu1 %vm606_vm7, %v8317_v37 }
 0xd4a   :  { %8958 = vmatpush3.bf16.msra.mxu1 %v8955_v10 }
 0xd4b   :  { %8377 = vmatprep.subr.mxu1 %v3326_v48 }
 0xd4d   :  { %8361 = vmatmul.mubr.msk.f32.vlgmr.msra.gmra.mrb[44].mxu0 %vm606_vm7, %v8320_v41 }
 0xd4e   :  { %8962 = vmatpush3.bf16.msra.mxu0 %v8959_v53 }
 0xe1c   :  { %v8355_v49 = vpop.f32.mrb[36].mxu1 }
 0xe1d   :  { %v3117_v7 = vsel %vm9859_vm15, %v8355_v49, -1e+09  ;;  %v3020_v22 = vpop.f32.mrb[37].mxu1 }
 0xe1e   :  { %v3116_v9 = vsel %vm9863_vm1, %v3020_v22, -1e+09  ;;  %v3123_v25 = vsel %vm107_vm0, %v3117_v7, -inf }
 0xe1f   :  { %3124 = vmax.xlane.f32.xlu1 %v3123_v25  ;;  %v3120_v61 = vsel %vm107_vm0, %v3116_v9, -inf }
 0xe20   :  { %v8362_v60 = vpop.f32.mrb[44].mxu0  ;;  %3121 = vmax.xlane.f32.xlu0 %v3120_v61 }
 0xe21   :  { %v3107_v24 = vpop.f32.mrb[45].mxu0  ;;  %v3119_v4 = vsel %vm9875_vm3, %v8362_v60, -1e+09 }
 0xe22   :  { %v3118_v63 = vsel %vm9879_vm4, %v3107_v24, -1e+09  ;;  %v3129_v2 = vsel %vm107_vm0, %v3119_v4, -inf }
 0xe23   :  { %v3126_v1 = vsel %vm107_vm0, %v3118_v63, -inf }
 0xe24   :  { %3127 = vmax.xlane.f32.xlu0 %v3126_v1 }
 0xe28   :  { %3130 = vmax.xlane.f32.xlu0 %v3129_v2 }
 0xeac   :  { %v3125_v8 = vpop.xlane.xlu1 %3124 }
 0xead   :  { %v3133_v62 = vsub.f32 %v3117_v7, %v3125_v8  ;;  %v3122_v11 = vpop.xlane.xlu0 %3121 }
 0xeae   :  { %v3132_v15 = vsub.f32 %v3116_v9, %v3122_v11 }
 0xeaf   :  { %v3138_v17 = vmul.f32 1.442695, %v3133_v62 }
 0xeb0   :  { %v3136_v20 = vmul.f32 1.442695, %v3132_v15 }
 0xeb1   :  { %9464 = vpow2.f32 %v3138_v17  ;;  %v3128_v12 = vpop.xlane.xlu0 %3127 }
 0xeb2   :  { %9466 = vpow2.f32 %v3136_v20  ;;  %v3134_v13 = vsub.f32 %v3118_v63, %v3128_v12 }
 0xeb4   :  { %v3140_v14 = vmul.f32 1.442695, %v3134_v13 }
 0xeb5   :  { %v3131_v16 = vpop.xlane.xlu0 %3130 }
 0xeb6   :  { %9468 = vpow2.f32 %v3140_v14  ;;  %v3135_v26 = vsub.f32 %v3119_v4, %v3131_v16 }
 0xeb8   :  { %v3142_v18 = vmul.f32 1.442695, %v3135_v26  ;;  %v3502_v26 = vld [vmem:[%s10825_s3] sm:$0xff] }
 0xeba   :  { %9470 = vpow2.f32 %v3142_v18  ;;  %v3503_v18 = vld [vmem:[%s10825_s3 + $0x8] sm:$0xff] }
 0xebb   :  { %v9465_v27 = vpop.eup %9464 }
 0xebc   :  { %v9467_v42 = vpop.eup %9466  ;;  %v3147_v43 = vsel %vm107_vm0, %v9465_v27, 0.0 }
 0xebd   :  { %3148 = vadd.xlane.f32.xlu0 %v3147_v43  ;;  %v3144_v28 = vsel %vm107_vm0, %v9467_v42, 0.0  ;;  %v3505_v43 = vld [vmem:[%s10825_s3 + $0x18] sm:$0xff] }
 0xebe   :  { %3145 = vadd.xlane.f32.xlu1 %v3144_v28 }
 0xec0   :  { %v9469_v29 = vpop.eup %9468 }
 0xec1   :  { %v3150_v30 = vsel %vm107_vm0, %v9469_v29, 0.0 }
 0xec2   :  { %3151 = vadd.xlane.f32.xlu1 %v3150_v30  ;;  %v3613_v30 = vld [vmem:[%s10824_s2 + $0xe8] sm:$0xff] }
 0xec4   :  { %v9471_v31 = vpop.eup %9470 }
 0xec5   :  { %v3153_v32 = vsel %vm107_vm0, %v9471_v31, 0.0 }
 0xec6   :  { %3154 = vadd.xlane.f32.xlu0 %v3153_v32 }
 0xf4a   :  { %v3149_v5 = vpop.xlane.xlu0 %3148 }
 0xf4b   :  { %9472 = vrcp.f32 %v3149_v5  ;;  %v3146_v34 = vpop.xlane.xlu1 %3145  ;;  %v3615_v5 = vld [vmem:[%s10824_s2 + $0xf8] sm:$0xff] }
 0xf4c   :  { %9474 = vrcp.f32 %v3146_v34 }
 0xf4f   :  { %v3152_v35 = vpop.xlane.xlu1 %3151 }
 0xf50   :  { %9476 = vrcp.f32 %v3152_v35  ;;  %v3616_v35 = vld [vmem:[%s10824_s2 + $0x100] sm:$0xff] }
 0xf53   :  { %v3155_v36 = vpop.xlane.xlu0 %3154 }
 0xf54   :  { %9478 = vrcp.f32 %v3155_v36  ;;  %v3617_v36 = vld [vmem:[%s10824_s2 + $0x108] sm:$0xff] }
 0xf55   :  { %v9473_v19 = vpop.eup %9472 }
 0xf56   :  { %v9475_v3 = vpop.eup %9474  ;;  %v3159_v37 = vmul.f32 %v9473_v19, %v9465_v27  ;;  %v8963_v27 = vpack.c.bf16 %v3503_v18, %v3502_v26  ;;  %v8979_v19 = vpack.c.bf16 %v3617_v36, %v3616_v35 }
 0xf57   :  { %v3157_v6 = vmul.f32 %v9475_v3, %v9467_v42  ;;  %v3504_v42 = vld [vmem:[%s10825_s3 + $0x10] sm:$0xff] }
 0xf58   :  { %8964 = vmatprep.subr.bf16.mxu0 %v8963_v27  ;;  %v8967_v28 = vpack.c.bf16 %v3505_v43, %v3504_v42 }
 0xf59   :  { %8367 = vmatprep.mubr.msk.f32.mxu1 %vm107_vm0, %v3157_v6 }
 0xf5a   :  { %v9477_v40 = vpop.eup %9476  ;;  %8368 = vmatmul.mubr.msk.f32.vlgmr.msra.gmra.mrb[38].mxu1 %vm107_vm0, %v3159_v37 }
 0xf5b   :  { %v3161_v41 = vmul.f32 %v9477_v40, %v9469_v29  ;;  %8378 = vmatpush3.msra.mxu1 %v3326_v48  ;;  %v3612_v29 = vld [vmem:[%s10824_s2 + $0xe0] sm:$0xff] }
 0xf5c   :  { %v8971_v32 = vpack.c.bf16 %v3613_v30, %v3612_v29 }
 0xf5d   :  { %8374 = vmatprep.mubr.msk.f32.mxu0 %vm107_vm0, %v3161_v41 }
 0xf5e   :  { %v9479_v44 = vpop.eup %9478  ;;  %8972 = vmatprep.subr.bf16.mxu1 %v8971_v32 }
 0xf5f   :  { %v3163_v46 = vmul.f32 %v9479_v44, %v9471_v31  ;;  %v3614_v31 = vld [vmem:[%s10824_s2 + $0xf0] sm:$0xff] }
 0xf60   :  { %v8975_v34 = vpack.c.bf16 %v3615_v5, %v3614_v31 }
 0xf61   :  { %8375 = vmatmul.mubr.msk.f32.vlgmr.msra.gmra.mrb[46].mxu0 %vm107_vm0, %v3163_v46 }
 0xf62   :  { %8966 = vmatpush3.bf16.msra.mxu0 %v8963_v27  ;;  %v7512_v27 = vld [vmem:[%s10824_s2 + $0x120] ss:$0 sm:$0xff] }
 0xf63   :  { %8968 = vmatprep.subr.bf16.mxu0 %v8967_v28 }
 0xf66   :  { %8970 = vmatpush3.bf16.msra.mxu0 %v8967_v28 }
0x102d   :  { %v8369_v10 = vpop.f32.mrb[38].mxu1 }
0x102e   :  { %v3236_v50 = vpop.f32.mrb[39].mxu1 }
0x102f   :  { %8379 = vmatprep.mubr.msk.f32.mxu1 %vm606_vm7, %v3236_v50 }
0x1030   :  { %8380 = vmatmul.mubr.msk.f32.vlgmr.msra.gmra.mrb[20].mxu1 %vm606_vm7, %v8369_v10 }
0x1031   :  { %8974 = vmatpush3.bf16.msra.mxu1 %v8971_v32 }
0x1032   :  { %8976 = vmatprep.subr.bf16.mxu1 %v8975_v34 }
0x1034   :  { %v8376_v52 = vpop.f32.mrb[46].mxu0 }
0x1035   :  { %v3317_v53 = vpop.f32.mrb[47].mxu0  ;;  %8978 = vmatpush3.bf16.msra.mxu1 %v8975_v34 }
0x1036   :  { %8382 = vmatprep.mubr.msk.f32.mxu1 %vm606_vm7, %v3317_v53  ;;  %8980 = vmatprep.subr.bf16.mxu1 %v8979_v19 }
0x1037   :  { %8383 = vmatmul.mubr.msk.f32.gmra.mrb[22].mxu1 %vm606_vm7, %v8376_v52 }
0x1039   :  { %8982 = vmatpush3.bf16.msra.mxu1 %v8979_v19 }
0x1103   :  { %v8381_v55 = vpop.f32.mrb[20].mxu1 }
0x1104   :  { %v3429_v56 = vadd.f32 %v8381_v55, %v9791_v47  ;;  %v3405_v57 = vpop.f32.mrb[21].mxu1 }
0x1105   :  { %v3428_v58 = vadd.f32 %v3405_v57, %v9788_v45 }
0x1106   :  { %v3437_v21 = vsel %vm257_vm6, %v3429_v56, 0.0 }
0x1107   :  { %3438 = vadd.xlane.f32.xlu0 %v3437_v21  ;;  %v3434_v0 = vsel %vm257_vm6, %v3428_v58, 0.0 }
0x1108   :  { %3435 = vadd.xlane.f32.xlu1 %v3434_v0  ;;  %v7506_v0 = vld [vmem:[%s10824_s2 + $0xd9] ss:$0 sm:$0xff] }
0x110a   :  { %v8384_v49 = vpop.f32.mrb[22].mxu1 }
0x110b   :  { %v3431_v7 = vadd.f32 %v8384_v49, %v9810_v54  ;;  %v3415_v22 = vpop.f32.mrb[23].mxu1 }
0x110c   :  { %v3430_v9 = vadd.f32 %v3415_v22, %v9803_v51 }
0x110d   :  { %v3443_v25 = vsel %vm257_vm6, %v3431_v7, 0.0 }
0x110e   :  { %3444 = vadd.xlane.f32.xlu0 %v3443_v25  ;;  %v3440_v47 = vsel %vm257_vm6, %v3430_v9, 0.0 }
0x110f   :  { %3441 = vadd.xlane.f32.xlu1 %v3440_v47 }
0x1194   :  { %v3439_v61 = vpop.xlane.xlu0 %3438 }
0x1195   :  { %v3447_v45 = vmul.f32 0.03125, %v3439_v61  ;;  %v3436_v60 = vpop.xlane.xlu1 %3435 }
0x1196   :  { %v3446_v24 = vmul.f32 0.03125, %v3436_v60 }
0x1197   :  { %v10176_v63 = vsub.f32 %v3429_v56, %v3447_v45  ;;  %v7505_v56 = vld [vmem:[%s10824_s2 + $0xd8] ss:$0 sm:$0xff] }
0x1198   :  { %v10178_v1 = vsub.f32 %v3428_v58, %v3446_v24 }
0x1199   :  { %v3455_v54 = vmul.f32 %v10176_v63, %v10176_v63 }
0x119a   :  { %v3454_v51 = vmul.f32 %v10178_v1, %v10178_v1 }
0x119b   :  { %v3445_v4 = vpop.xlane.xlu0 %3444  ;;  %v3461_v2 = vsel %vm257_vm6, %v3455_v54, 0.0  ;;  %v3618_v54 = vld [vmem:[%s10824_s2 + $0x110] sm:$0xff] }
0x119c   :  { %v3449_v8 = vmul.f32 0.03125, %v3445_v4  ;;  %v3442_v62 = vpop.xlane.xlu1 %3441  ;;  %3462 = vadd.xlane.f32.xlu0 %v3461_v2  ;;  %v3458_v11 = vsel %vm257_vm6, %v3454_v51, 0.0  ;;  %v3619_v51 = vld [vmem:[%s10824_s2 + $0x118] sm:$0xff]  ;;  %v7507_v2 = vld [vmem:[%s10825_s3 + $0x20] ss:$0 sm:$0xff] }
0x119d   :  { %v3448_v15 = vmul.f32 0.03125, %v3442_v62  ;;  %3459 = vadd.xlane.f32.xlu1 %v3458_v11  ;;  %v8983_v4 = vpack.c.bf16 %v3619_v51, %v3618_v54  ;;  %v10302_v54 = vld [vmem:[%s10824_s2 + $0x138] sm:$0xff]  ;;  %v10307_v51 = vld [vmem:[%s10824_s2 + $0x140] sm:$0xff] }
0x119e   :  { %v3453_v17 = vsub.f32 %v3431_v7, %v3449_v8 }
0x119f   :  { %v10186_v20 = vsub.f32 %v3430_v9, %v3448_v15  ;;  %8984 = vmatprep.subr.bf16.mxu1 %v8983_v4 }
0x11a0   :  { %v3457_v12 = vmul.f32 %v3453_v17, %v3453_v17  ;;  %8986 = vmatpush3.bf16.msra.mxu1 %v8983_v4  ;;  %v10312_v4 = vld [vmem:[%s10824_s2 + $0x178] sm:$0xff] }
0x11a1   :  { %v3456_v13 = vmul.f32 %v10186_v20, %v10186_v20 }
0x11a2   :  { %v3467_v14 = vsel %vm257_vm6, %v3457_v12, 0.0 }
0x11a3   :  { %3468 = vadd.xlane.f32.xlu0 %v3467_v14  ;;  %v3464_v16 = vsel %vm257_vm6, %v3456_v13, 0.0 }
0x11a4   :  { %3465 = vadd.xlane.f32.xlu1 %v3464_v16 }
0x1229   :  { %v3463_v3 = vpop.xlane.xlu0 %3462 }
0x122a   :  { %v3471_v6 = vmul.f32 0.03125, %v3463_v3  ;;  %v3460_v37 = vpop.xlane.xlu1 %3459 }
0x122b   :  { %v3470_v40 = vmul.f32 0.03125, %v3460_v37 }
0x122c   :  { %v3475_v41 = vadd.f32 1e-06, %v3471_v6 }
0x122d   :  { %v3474_v44 = vadd.f32 1e-06, %v3470_v40 }
0x122e   :  { %9480 = vrsqrt.f32 %v3475_v41 }
0x122f   :  { %9482 = vrsqrt.f32 %v3474_v44 }
0x1230   :  { %v3469_v46 = vpop.xlane.xlu0 %3468 }
0x1231   :  { %v3473_v48 = vmul.f32 0.03125, %v3469_v46  ;;  %v3466_v10 = vpop.xlane.xlu1 %3465 }
0x1232   :  { %v3472_v50 = vmul.f32 0.03125, %v3466_v10 }
0x1233   :  { %v3477_v52 = vadd.f32 1e-06, %v3473_v48 }
0x1234   :  { %v3476_v53 = vadd.f32 1e-06, %v3472_v50 }
0x1235   :  { %9484 = vrsqrt.f32 %v3477_v52 }
0x1236   :  { %9486 = vrsqrt.f32 %v3476_v53 }
0x1238   :  { %v9481_v55 = vpop.eup %9480 }
0x1239   :  { %v9483_v57 = vpop.eup %9482  ;;  %v3483_v58 = vmul.f32 %v9481_v55, %v10176_v63 }
0x123a   :  { %v3482_v21 = vmul.f32 %v9483_v57, %v10178_v1 }
0x123b   :  { %v3491_v49 = vmul.f32 %v7505_v56, %v3483_v58 }
0x123c   :  { %v3490_v7 = vmul.f32 %v7505_v56, %v3482_v21 }
0x123d   :  { %v3499_v25 = vadd.f32 %v7506_v0, %v3491_v49 }
0x123e   :  { %v3498_v22 = vadd.f32 %v7506_v0, %v3490_v7 }
0x123f   :  { %v9485_v9 = vpop.eup %9484 }
0x1240   :  { %v9487_v47 = vpop.eup %9486  ;;  %8393 = vmatprep.mubr.msk.f32.mxu0 %vm257_vm6, %v3498_v22  ;;  %v3485_v61 = vmul.f32 %v9485_v9, %v3453_v17 }
0x1241   :  { %8394 = vmatmul.mubr.msk.f32.vlgmr.msra.gmra.mrb[48].mxu0 %vm257_vm6, %v3499_v25  ;;  %v3484_v45 = vmul.f32 %v9487_v47, %v10186_v20 }
0x1242   :  { %v3493_v60 = vmul.f32 %v7505_v56, %v3485_v61  ;;  %v10278_v61 = vld [vmem:[%s10824_s2 + $0x128] sm:$0xff] }
0x1243   :  { %v3492_v24 = vmul.f32 %v7505_v56, %v3484_v45  ;;  %v10283_v45 = vld [vmem:[%s10824_s2 + $0x130] sm:$0xff] }
0x1244   :  { %v3501_v1 = vadd.f32 %v7506_v0, %v3493_v60  ;;  %v10288_v60 = vld [vmem:[%s10824_s2 + $0x168] sm:$0xff] }
0x1245   :  { %v3500_v63 = vadd.f32 %v7506_v0, %v3492_v24  ;;  %v8987_v24 = vpack.c.bf16 %v10283_v45, %v10278_v61 }
0x1247   :  { %8396 = vmatprep.mubr.msk.f32.mxu0 %vm257_vm6, %v3500_v63  ;;  %8988 = vmatprep.subr.bf16.mxu0 %v8987_v24 }
0x1248   :  { %8397 = vmatmul.mubr.msk.f32.gmra.mrb[50].mxu0 %vm257_vm6, %v3501_v1 }
0x1249   :  { %8990 = vmatpush3.bf16.msra.mxu0 %v8987_v24 }
0x1314   :  { %v8395_v8 = vpop.f32.mrb[48].mxu0 }
0x1315   :  { %v3595_v62 = vadd.f32 %v8395_v8, %v7507_v2  ;;  %v3589_v11 = vpop.f32.mrb[49].mxu0  ;;  %v10319_v8 = vld [vmem:[%s10824_s2 + $0x180] sm:$0xff] }
0x1316   :  { %v3590_v15 = vadd.f32 %v7507_v2, %v3589_v11  ;;  %v10326_v11 = vld [vmem:[%s10824_s2 + $0x148] sm:$0xff] }
0x1317   :  { %v3609_v20 = vmax.f32 %v3595_v62, 0.0  ;;  %v9007_v62 = vpack.c.bf16 %v10319_v8, %v10312_v4 }
0x1318   :  { %v3608_v17 = vmax.f32 %v3590_v15, 0.0  ;;  %v10331_v15 = vld [vmem:[%s10824_s2 + $0x150] sm:$0xff] }
0x131a   :  { %8415 = vmatprep.mubr.msk.f32.mxu1 %vm3625_vm5, %v3608_v17  ;;  %v8995_v17 = vpack.c.bf16 %v10331_v15, %v10326_v11 }
0x131b   :  { %v8398_v12 = vpop.f32.mrb[50].mxu0  ;;  %8416 = vmatmul.mubr.msk.f32.vlgmr.msra.gmra.mrb[40].mxu1 %vm3625_vm5, %v3609_v20 }
0x131c   :  { %v3605_v13 = vadd.f32 %v8398_v12, %v7507_v2  ;;  %v3599_v14 = vpop.f32.mrb[51].mxu0 }
0x131d   :  { %v3600_v16 = vadd.f32 %v7507_v2, %v3599_v14  ;;  %v8991_v2 = vpack.c.bf16 %v10307_v51, %v10302_v54 }
0x131e   :  { %v3611_v18 = vmax.f32 %v3605_v13, 0.0 }
0x131f   :  { %v3610_v26 = vmax.f32 %v3600_v16, 0.0  ;;  %8992 = vmatprep.subr.bf16.mxu0 %v8991_v2 }
0x1320   :  { %8994 = vmatpush3.bf16.msra.mxu0 %v8991_v2 }
0x1321   :  { %8418 = vmatprep.mubr.msk.f32.mxu1 %vm3625_vm5, %v3610_v26  ;;  %8996 = vmatprep.subr.bf16.mxu0 %v8995_v17 }
0x1322   :  { %8419 = vmatmul.mubr.msk.f32.gmra.mrb[42].mxu1 %vm3625_vm5, %v3611_v18 }
0x13ee   :  { %v8417_v42 = vpop.f32.mrb[40].mxu1 }
0x13ef   :  { %v3710_v43 = vadd.f32 %v8417_v42, %v7512_v27  ;;  %v3704_v28 = vpop.f32.mrb[41].mxu1 }
0x13f0   :  { %v3705_v29 = vadd.f32 %v7512_v27, %v3704_v28 }
0x13f1   :  { %v3724_v30 = vadd.f32 %v3710_v43, %v3499_v25 }
0x13f2   :  { %v3723_v31 = vadd.f32 %v3705_v29, %v3498_v22 }
0x13f3   :  { %v3732_v32 = vsel %vm257_vm6, %v3724_v30, 0.0 }
0x13f4   :  { %3733 = vadd.xlane.f32.xlu0 %v3732_v32  ;;  %v3729_v5 = vsel %vm257_vm6, %v3723_v31, 0.0 }
0x13f5   :  { %3730 = vadd.xlane.f32.xlu1 %v3729_v5  ;;  %v8420_v34 = vpop.f32.mrb[42].mxu1 }
0x13f6   :  { %v3720_v35 = vadd.f32 %v8420_v34, %v7512_v27  ;;  %v3714_v36 = vpop.f32.mrb[43].mxu1 }
0x13f7   :  { %v3715_v19 = vadd.f32 %v7512_v27, %v3714_v36 }
0x13f8   :  { %v3726_v3 = vadd.f32 %v3720_v35, %v3501_v1  ;;  %v7518_v35 = vld [vmem:[%s10824_s2 + $0xdb] ss:$0 sm:$0xff] }
0x13f9   :  { %v3725_v6 = vadd.f32 %v3715_v19, %v3500_v63  ;;  %v10295_v63 = vld [vmem:[%s10824_s2 + $0x170] sm:$0xff] }
0x13fa   :  { %v3738_v37 = vsel %vm257_vm6, %v3726_v3, 0.0  ;;  %v9003_v1 = vpack.c.bf16 %v10295_v63, %v10288_v60 }
0x13fb   :  { %3739 = vadd.xlane.f32.xlu0 %v3738_v37  ;;  %v3735_v40 = vsel %vm257_vm6, %v3725_v6, 0.0 }
0x13fc   :  { %3736 = vadd.xlane.f32.xlu1 %v3735_v40  ;;  %9004 = vmatprep.subr.bf16.mxu1 %v9003_v1 }
0x13fd   :  { %9006 = vmatpush3.bf16.msra.mxu1 %v9003_v1 }
0x13fe   :  { %9008 = vmatprep.subr.bf16.mxu1 %v9007_v62 }
0x1401   :  { %9010 = vmatpush3.bf16.msra.mxu1 %v9007_v62 }
0x1481   :  { %v3734_v41 = vpop.xlane.xlu0 %3733 }
0x1482   :  { %v3742_v44 = vmul.f32 0.03125, %v3734_v41  ;;  %v3731_v46 = vpop.xlane.xlu1 %3730 }
0x1483   :  { %v3741_v48 = vmul.f32 0.03125, %v3731_v46 }
0x1484   :  { %v10255_v10 = vsub.f32 %v3724_v30, %v3742_v44 }
0x1485   :  { %v10257_v50 = vsub.f32 %v3723_v31, %v3741_v48  ;;  %v7517_v31 = vld [vmem:[%s10824_s2 + $0xda] ss:$0 sm:$0xff] }
0x1486   :  { %v3750_v52 = vmul.f32 %v10255_v10, %v10255_v10 }
0x1487   :  { %v3749_v53 = vmul.f32 %v10257_v50, %v10257_v50 }
0x1488   :  { %v3740_v55 = vpop.xlane.xlu0 %3739  ;;  %v3756_v56 = vsel %vm257_vm6, %v3750_v52, 0.0 }
0x1489   :  { %v3744_v57 = vmul.f32 0.03125, %v3740_v55  ;;  %v3737_v58 = vpop.xlane.xlu1 %3736  ;;  %3757 = vadd.xlane.f32.xlu0 %v3756_v56  ;;  %v3753_v21 = vsel %vm257_vm6, %v3749_v53, 0.0 }
0x148a   :  { %v3743_v0 = vmul.f32 0.03125, %v3737_v58  ;;  %3754 = vadd.xlane.f32.xlu1 %v3753_v21 }
0x148b   :  { %v10265_v49 = vsub.f32 %v3726_v3, %v3744_v57  ;;  %v10346_v3 = vld [vmem:[%s10824_s2 + $0x158] sm:$0xff] }
0x148c   :  { %v10267_v7 = vsub.f32 %v3725_v6, %v3743_v0  ;;  %v10351_v6 = vld [vmem:[%s10824_s2 + $0x160] sm:$0xff] }
0x148d   :  { %v3752_v22 = vmul.f32 %v10265_v49, %v10265_v49  ;;  %v8999_v44 = vpack.c.bf16 %v10351_v6, %v10346_v3 }
0x148e   :  { %v3751_v9 = vmul.f32 %v10267_v7, %v10267_v7 }
0x148f   :  { %v3762_v25 = vsel %vm257_vm6, %v3752_v22, 0.0 }
0x1490   :  { %3763 = vadd.xlane.f32.xlu0 %v3762_v25  ;;  %v3759_v47 = vsel %vm257_vm6, %v3751_v9, 0.0 }
0x1491   :  { %3760 = vadd.xlane.f32.xlu1 %v3759_v47 }
0x1516   :  { %v3758_v20 = vpop.xlane.xlu0 %3757 }
0x1517   :  { %v3766_v12 = vmul.f32 0.03125, %v3758_v20  ;;  %v3755_v13 = vpop.xlane.xlu1 %3754 }
0x1518   :  { %v3765_v14 = vmul.f32 0.03125, %v3755_v13 }
0x1519   :  { %v3770_v16 = vadd.f32 1e-06, %v3766_v12 }
0x151a   :  { %v3769_v26 = vadd.f32 1e-06, %v3765_v14 }
0x151b   :  { %9488 = vrsqrt.f32 %v3770_v16 }
0x151c   :  { %9490 = vrsqrt.f32 %v3769_v26 }
0x151d   :  { %v3764_v18 = vpop.xlane.xlu0 %3763 }
0x151e   :  { %v3768_v27 = vmul.f32 0.03125, %v3764_v18  ;;  %v3761_v42 = vpop.xlane.xlu1 %3760 }
0x151f   :  { %v3767_v43 = vmul.f32 0.03125, %v3761_v42 }
0x1520   :  { %v3772_v28 = vadd.f32 1e-06, %v3768_v27 }
0x1521   :  { %v3771_v29 = vadd.f32 1e-06, %v3767_v43 }
0x1522   :  { %9492 = vrsqrt.f32 %v3772_v28 }
0x1523   :  { %9494 = vrsqrt.f32 %v3771_v29 }
0x1525   :  { %v9489_v30 = vpop.eup %9488 }
0x1526   :  { %v9491_v32 = vpop.eup %9490  ;;  %v3778_v5 = vmul.f32 %v9489_v30, %v10255_v10  ;;  %v10415_v30 = vpack.i.bf16 %v10331_v15, %v10326_v11 }
0x1527   :  { %v3777_v34 = vmul.f32 %v9491_v32, %v10257_v50 }
0x1528   :  { %v3786_v36 = vmul.f32 %v7517_v31, %v3778_v5 }
0x1529   :  { %v3785_v19 = vmul.f32 %v7517_v31, %v3777_v34 }
0x152a   :  { %v10355_v41 = vadd.f32 %v7518_v35, %v3786_v36 }
0x152b   :  { %v10353_v37 = vadd.f32 %v7518_v35, %v3785_v19 }
0x152c   :  { %v9493_v40 = vpop.eup %9492 }
0x152d   :  { %v9495_v46 = vpop.eup %9494  ;;  %v3780_v48 = vmul.f32 %v9493_v40, %v10265_v49  ;;  %8429 = vmatprep.mubr.msk.f32.mxu0 %vm257_vm6, %v10353_v37  ;;  %8457 = vmatprep.mubr.msk.f32.mxu1 %vm257_vm6, %v10353_v37 }
0x152e   :  { %v3779_v10 = vmul.f32 %v9495_v46, %v10267_v7  ;;  %8430 = vmatmul.mubr.msk.f32.vlgmr.msra.gmra.mrb[52].mxu0 %vm257_vm6, %v10355_v41  ;;  %8458 = vmatmul.mubr.msk.f32.vlgmr.msra.gmra.mrb[44].mxu1 %vm257_vm6, %v10355_v41 }
0x152f   :  { %v3788_v50 = vmul.f32 %v7517_v31, %v3780_v48  ;;  %8998 = vmatpush3.bf16.msra.mxu0 %v8995_v17 }
0x1530   :  { %v3787_v52 = vmul.f32 %v7517_v31, %v3779_v10  ;;  %9000 = vmatprep.subr.bf16.mxu0 %v8999_v44 }
0x1531   :  { %v10371_v55 = vadd.f32 %v7518_v35, %v3788_v50 }
0x1532   :  { %v10369_v53 = vadd.f32 %v7518_v35, %v3787_v52 }
0x1533   :  { %9002 = vmatpush3.bf16.msra.mxu0 %v8999_v44 }
0x1534   :  { %8432 = vmatprep.mubr.msk.f32.mxu0 %vm257_vm6, %v10369_v53  ;;  %8460 = vmatprep.mubr.msk.f32.mxu1 %vm257_vm6, %v10369_v53 }
0x1535   :  { %8433 = vmatmul.mubr.msk.f32.gmra.mrb[54].mxu0 %vm257_vm6, %v10371_v55  ;;  %8461 = vmatmul.mubr.msk.f32.gmra.mrb[46].mxu1 %vm257_vm6, %v10371_v55 }
0x1536   :  { %8443 = vmatprep.mubr.msk.f32.mxu0 %vm257_vm6, %v10353_v37 }
0x1539   :  { %8444 = vmatmul.mubr.msk.f32.vlgmr.msra.gmra.mrb[56].mxu0 %vm257_vm6, %v10355_v41 }
0x153a   :  { %8446 = vmatprep.mubr.msk.f32.mxu0 %vm257_vm6, %v10369_v53 }
0x153d   :  { %8447 = vmatmul.mubr.msk.f32.gmra.mrb[58].mxu0 %vm257_vm6, %v10371_v55 }
0x1601   :  { %v8431_v56 = vpop.f32.mrb[52].mxu0  ;;  %v8459_v57 = vpop.f32.mrb[44].mxu1 }
0x1602   :  { %v3887_v58 = vpop.f32.mrb[53].mxu0  ;;  %v4057_v21 = vpop.f32.mrb[45].mxu1 }
0x1603   :  { %v9023_v0 = vpack.c.bf16 %v8459_v57, %v4057_v21  ;;  %8467 = vmatprep.mubr.msk.f32.mxu0 %vm606_vm7, %v3887_v58 }
0x1608   :  { %v8434_v49 = vpop.f32.mrb[54].mxu0  ;;  %v8462_v7 = vpop.f32.mrb[46].mxu1 }
0x1609   :  { %v3897_v22 = vpop.f32.mrb[55].mxu0  ;;  %v4067_v9 = vpop.f32.mrb[47].mxu1 }
0x160a   :  { %v9027_v25 = vpack.c.bf16 %v8462_v7, %v4067_v9  ;;  %8474 = vmatprep.mubr.msk.f32.mxu1 %vm606_vm7, %v3897_v22  ;;  %v10428_v9 = vpack.i.bf16 %v10283_v45, %v10278_v61  ;;  %v10446_v61 = vpack.i.bf16 %v10295_v63, %v10288_v60  ;;  %v10450_v45 = vpack.i.bf16 %v10319_v8, %v10312_v4 }
0x160c   :  { %v8445_v47 = vpop.f32.mrb[56].mxu0 }
0x160d   :  { %v3972_v24 = vpop.f32.mrb[57].mxu0 }
0x160e   :  { %v9011_v1 = vpack.c.bf16 %v8445_v47, %v3972_v24  ;;  %v10438_v47 = vpack.i.bf16 %v10307_v51, %v10302_v54 }
0x1610   :  { %v8448_v2 = vpop.f32.mrb[58].mxu0  ;;  %9013 = vmatprep.subr.msk.bf16.mxu0 %vm9826_vm8, %v9011_v1 }
0x1611   :  { %v3982_v62 = vpop.f32.mrb[59].mxu0  ;;  %9016 = vmatpush3.bf16.xpose.msk.msra.mxu0 %vm9826_vm8, %v9011_v1 }
0x1612   :  { %v9017_v17 = vpack.c.bf16 %v8448_v2, %v3982_v62  ;;  %9024 = vmatprep.subr.bf16.mxu0 %v9023_v0 }
0x1614   :  { %9019 = vmatprep.subr.msk.bf16.mxu1 %vm9826_vm8, %v9017_v17 }
0x1615   :  { %9022 = vmatpush3.bf16.xpose.msk.msra.mxu1 %vm9826_vm8, %v9017_v17 }
0x1616   :  { %9028 = vmatprep.subr.bf16.mxu1 %v9027_v25 }
0x1618   :  { %8468 = vmatmul.mubr.msk.f32.vlgmr.msra.gmra.mrb[60].mxu0 %vm606_vm7, %v8431_v56 }
0x1619   :  { %9026 = vmatpush3.bf16.msra.mxu0 %v9023_v0 }
0x161c   :  { %8475 = vmatmul.mubr.msk.f32.vlgmr.msra.gmra.mrb[48].mxu1 %vm606_vm7, %v8434_v49 }
0x161d   :  { %9030 = vmatpush3.bf16.msra.mxu1 %v9027_v25  ;;  %v10434_v25 = vpack.i.bf16 %v10351_v6, %v10346_v3 }
0x16eb   :  { %v8469_v20 = vpop.f32.mrb[60].mxu0 }
0x16ec   :  { %v4154_v12 = vpop.f32.mrb[61].mxu0  ;;  %v4251_v27 = vsel %vm9859_vm15, %v8469_v20, -1e+09 }
0x16ed   :  { %v4250_v43 = vsel %vm9863_vm1, %v4154_v12, -1e+09  ;;  %v4257_v28 = vsel %vm107_vm0, %v4251_v27, -inf }
0x16ee   :  { %v4254_v29 = vsel %vm107_vm0, %v4250_v43, -inf }
0x16ef   :  { %v8476_v13 = vpop.f32.mrb[48].mxu1 }
0x16f0   :  { %v4253_v14 = vsel %vm9875_vm3, %v8476_v13, -1e+09  ;;  %v4241_v16 = vpop.f32.mrb[49].mxu1 }
0x16f1   :  { %v4252_v26 = vsel %vm9879_vm4, %v4241_v16, -1e+09  ;;  %v4263_v18 = vsel %vm107_vm0, %v4253_v14, -inf }
0x16f2   :  { %4264 = vmax.xlane.f32.xlu0 %v4263_v18  ;;  %v4260_v42 = vsel %vm107_vm0, %v4252_v26, -inf }
0x16f3   :  { %4261 = vmax.xlane.f32.xlu1 %v4260_v42 }
0x16f6   :  { %4258 = vmax.xlane.f32.xlu0 %v4257_v28 }
0x16f7   :  { %4255 = vmax.xlane.f32.xlu1 %v4254_v29 }
0x1708   :  { %9319 = vrot.lane.b32.xlu1 %v10415_v30, %s9603_s29 }
0x177f   :  { %v4265_v31 = vpop.xlane.xlu0 %4264 }
0x1780   :  { %v4262_v32 = vpop.xlane.xlu1 %4261  ;;  %v4269_v5 = vsub.f32 %v4253_v14, %v4265_v31 }
0x1781   :  { %v4268_v34 = vsub.f32 %v4252_v26, %v4262_v32 }
0x1782   :  { %v4276_v44 = vmul.f32 1.442695, %v4269_v5 }
0x1783   :  { %v4259_v35 = vpop.xlane.xlu0 %4258  ;;  %v4274_v48 = vmul.f32 1.442695, %v4268_v34 }
0x1784   :  { %v4267_v36 = vsub.f32 %v4251_v27, %v4259_v35  ;;  %v4256_v19 = vpop.xlane.xlu1 %4255 }
0x1785   :  { %v4266_v40 = vsub.f32 %v4250_v43, %v4256_v19 }
0x1786   :  { %v4272_v46 = vmul.f32 1.442695, %v4267_v36 }
0x1787   :  { %v4270_v10 = vmul.f32 1.442695, %v4266_v40 }
0x1788   :  { %9496 = vpow2.f32 %v4272_v46  ;;  %v9320_v50 = vpop.permute.xlu1 %9319 }
0x1789   :  { %9498 = vpow2.f32 %v4270_v10  ;;  %v9322_v11 = vunpack.i.h.bf16 %v9320_v50  ;;  %v9321_v15 = vunpack.i.l.bf16 %v9320_v50 }
0x178a   :  { %9500 = vpow2.f32 %v4276_v44 }
0x178b   :  { %9502 = vpow2.f32 %v4274_v48  ;;  %v10419_v52 = vpack.c.bf16 %v9322_v11, %v9321_v15 }
0x178d   :  { %9040 = vmatprep.subr.bf16.mxu1 %v10419_v52 }
0x1792   :  { %v9497_v56 = vpop.eup %9496 }
0x1793   :  { %v9499_v57 = vpop.eup %9498  ;;  %v4281_v58 = vsel %vm107_vm0, %v9497_v56, 0.0 }
0x1794   :  { %v9501_v21 = vpop.eup %9500  ;;  %4282 = vadd.xlane.f32.xlu0 %v4281_v58  ;;  %v4278_v0 = vsel %vm107_vm0, %v9499_v57, 0.0 }
0x1795   :  { %v9503_v49 = vpop.eup %9502  ;;  %4279 = vadd.xlane.f32.xlu1 %v4278_v0  ;;  %v4287_v7 = vsel %vm107_vm0, %v9501_v21, 0.0 }
0x1796   :  { %v4284_v22 = vsel %vm107_vm0, %v9503_v49, 0.0 }
0x1798   :  { %4288 = vadd.xlane.f32.xlu0 %v4287_v7 }
0x1799   :  { %4285 = vadd.xlane.f32.xlu1 %v4284_v22 }
0x17aa   :  { %9329 = vrot.lane.b32.xlu1 %v10428_v9, %s9603_s29 }
0x17ae   :  { %9324 = vrot.lane.b32.xlu0 %v10434_v25, %s9603_s29  ;;  %9334 = vrot.lane.b32.xlu1 %v10438_v47, %s9603_s29 }
0x17b2   :  { %9339 = vrot.lane.b32.xlu0 %v10446_v61, %s9603_s29  ;;  %9344 = vrot.lane.b32.xlu1 %v10450_v45, %s9603_s29 }
0x1821   :  { %v4283_v54 = vpop.xlane.xlu0 %4282 }
0x1822   :  { %9504 = vrcp.f32 %v4283_v54  ;;  %v4280_v51 = vpop.xlane.xlu1 %4279 }
0x1823   :  { %9506 = vrcp.f32 %v4280_v51 }
0x1825   :  { %v4289_v3 = vpop.xlane.xlu0 %4288 }
0x1826   :  { %9508 = vrcp.f32 %v4289_v3  ;;  %v4286_v6 = vpop.xlane.xlu1 %4285 }
0x1827   :  { %9510 = vrcp.f32 %v4286_v6 }
0x1829   :  { %v9325_v60 = vpop.permute.xlu0 %9324 }
0x182a   :  { %v9330_v63 = vpop.permute.xlu1 %9329  ;;  %v9327_v17 = vunpack.i.h.bf16 %v9325_v60  ;;  %v9326_v14 = vunpack.i.l.bf16 %v9325_v60 }
0x182b   :  { %v9332_v24 = vunpack.i.h.bf16 %v9330_v63  ;;  %v9331_v1 = vunpack.i.l.bf16 %v9330_v63 }
0x182c   :  { %v9505_v4 = vpop.eup %9504  ;;  %v9043_v5 = vpack.c.bf16 %v9327_v17, %v9326_v14 }
0x182d   :  { %v9507_v8 = vpop.eup %9506  ;;  %v9031_v2 = vpack.c.bf16 %v9332_v24, %v9331_v1  ;;  %v9340_v62 = vpop.permute.xlu0 %9339  ;;  %v4293_v13 = vmul.f32 %v9505_v4, %v9497_v56 }
0x182e   :  { %v9335_v20 = vpop.permute.xlu1 %9334  ;;  %v4291_v12 = vmul.f32 %v9507_v8, %v9499_v57  ;;  %v9342_v27 = vunpack.i.h.bf16 %v9340_v62  ;;  %v9341_v42 = vunpack.i.l.bf16 %v9340_v62 }
0x182f   :  { %v9337_v16 = vunpack.i.h.bf16 %v9335_v20  ;;  %v9336_v26 = vunpack.i.l.bf16 %v9335_v20  ;;  %9032 = vmatprep.subr.bf16.mxu0 %v9031_v2 }
0x1830   :  { %v9509_v18 = vpop.eup %9508  ;;  %8481 = vmatprep.mubr.msk.f32.mxu0 %vm107_vm0, %v4291_v12  ;;  %v9047_v34 = vpack.c.bf16 %v9342_v27, %v9341_v42 }
0x1831   :  { %v9511_v43 = vpop.eup %9510  ;;  %v9035_v28 = vpack.c.bf16 %v9337_v16, %v9336_v26  ;;  %8482 = vmatmul.mubr.msk.f32.vlgmr.msra.gmra.mrb[62].mxu0 %vm107_vm0, %v4293_v13  ;;  %v4297_v32 = vmul.f32 %v9509_v18, %v9501_v21 }
0x1832   :  { %9034 = vmatpush3.bf16.msra.mxu0 %v9031_v2  ;;  %8499 = vmatprep.mubr.msk.f32.mxu0 %vm257_vm6, %v10353_v37  ;;  %v4295_v29 = vmul.f32 %v9511_v43, %v9503_v49  ;;  %v9345_v31 = vpop.permute.xlu1 %9344 }
0x1833   :  { %9036 = vmatprep.subr.bf16.mxu0 %v9035_v28  ;;  %v9347_v35 = vunpack.i.h.bf16 %v9345_v31  ;;  %v9346_v36 = vunpack.i.l.bf16 %v9345_v31 }
0x1834   :  { %8488 = vmatprep.mubr.msk.f32.mxu1 %vm107_vm0, %v4295_v29 }
0x1835   :  { %8489 = vmatmul.mubr.msk.f32.vlgmr.msra.gmra.mrb[50].mxu1 %vm107_vm0, %v4297_v32  ;;  %v9051_v19 = vpack.c.bf16 %v9347_v35, %v9346_v36 }
0x1836   :  { %9038 = vmatpush3.bf16.msra.mxu0 %v9035_v28  ;;  %9042 = vmatpush3.bf16.msra.mxu1 %v10419_v52 }
0x1837   :  { %8513 = vmatprep.mubr.msk.f32.mxu1 %vm257_vm6, %v10353_v37  ;;  %9044 = vmatprep.subr.bf16.mxu1 %v9043_v5 }
0x1838   :  { %9048 = vmatprep.subr.bf16.mxu0 %v9047_v34 }
0x1839   :  { %8500 = vmatmul.mubr.msk.f32.vlgmr.msra.gmra.mrb[64].mxu0 %vm257_vm6, %v10355_v41 }
0x183a   :  { %8502 = vmatprep.mubr.msk.f32.mxu0 %vm257_vm6, %v10369_v53  ;;  %9046 = vmatpush3.bf16.msra.mxu1 %v9043_v5 }
0x183b   :  { %9050 = vmatpush3.bf16.msra.mxu0 %v9047_v34 }
0x183c   :  { %9052 = vmatprep.subr.bf16.mxu0 %v9051_v19 }
0x183d   :  { %8503 = vmatmul.mubr.msk.f32.gmra.mrb[66].mxu0 %vm257_vm6, %v10371_v55  ;;  %8514 = vmatmul.mubr.msk.f32.vlgmr.msra.gmra.mrb[52].mxu1 %vm257_vm6, %v10355_v41 }
0x183e   :  { %8516 = vmatprep.mubr.msk.f32.mxu1 %vm257_vm6, %v10369_v53  ;;  %8527 = vmatprep.mubr.msk.f32.mxu0 %vm257_vm6, %v10353_v37 }
0x183f   :  { %9054 = vmatpush3.bf16.msra.mxu0 %v9051_v19 }
0x1841   :  { %8517 = vmatmul.mubr.msk.f32.gmra.mrb[54].mxu1 %vm257_vm6, %v10371_v55 }
0x1842   :  { %8528 = vmatmul.mubr.msk.f32.vlgmr.msra.gmra.mrb[68].mxu0 %vm257_vm6, %v10355_v41 }
0x1843   :  { %8530 = vmatprep.mubr.msk.f32.mxu0 %vm257_vm6, %v10369_v53 }
0x1846   :  { %8531 = vmatmul.mubr.msk.f32.gmra.mrb[70].mxu0 %vm257_vm6, %v10371_v55 }
0x1904   :  { %v10485_v40 = vpop.f32.mrb[62].mxu0 }
0x1905   :  { %v10487_v44 = vpop.f32.mrb[63].mxu0 }
0x1908   :  { %v10489_v46 = vpop.f32.mrb[50].mxu1 }
0x1909   :  { %v10491_v48 = vpop.f32.mrb[51].mxu1 }
0x190c   :  { %v8501_v10 = vpop.f32.mrb[64].mxu0 }
0x190d   :  { %v4543_v50 = vpop.f32.mrb[65].mxu0 }
0x190e   :  { %8537 = vmatprep.mubr.msk.f32.mxu1 %vm606_vm7, %v4543_v50 }
0x1910   :  { %v8504_v11 = vpop.f32.mrb[66].mxu0  ;;  %v8515_v15 = vpop.f32.mrb[52].mxu1 }
0x1911   :  { %v4553_v52 = vpop.f32.mrb[67].mxu0  ;;  %v4644_v56 = vpop.f32.mrb[53].mxu1 }
0x1912   :  { %v9055_v57 = vpack.c.bf16 %v8515_v15, %v4644_v56  ;;  %8544 = vmatprep.mubr.msk.f32.mxu0 %vm606_vm7, %v4553_v52 }
0x1914   :  { %v8518_v58 = vpop.f32.mrb[54].mxu1  ;;  %9057 = vmatprep.subr.msk.bf16.mxu1 %vm9826_vm8, %v9055_v57 }
0x1915   :  { %v8529_v21 = vpop.f32.mrb[68].mxu0  ;;  %v4654_v0 = vpop.f32.mrb[55].mxu1  ;;  %9060 = vmatpush3.bf16.xpose.msk.msra.mxu1 %vm9826_vm8, %v9055_v57 }
0x1916   :  { %v9061_v49 = vpack.c.bf16 %v8518_v58, %v4654_v0  ;;  %v4745_v7 = vpop.f32.mrb[69].mxu0 }
0x1917   :  { %v9067_v22 = vpack.c.bf16 %v8529_v21, %v4745_v7 }
0x1918   :  { %9063 = vmatprep.subr.msk.bf16.mxu0 %vm9826_vm8, %v9061_v49 }
0x1919   :  { %v8532_v54 = vpop.f32.mrb[70].mxu0  ;;  %9068 = vmatprep.subr.bf16.mxu1 %v9067_v22  ;;  %9066 = vmatpush3.bf16.xpose.msk.msra.mxu0 %vm9826_vm8, %v9061_v49 }
0x191a   :  { %v4755_v51 = vpop.f32.mrb[71].mxu0 }
0x191b   :  { %v10503_v3 = vpack.c.bf16 %v8532_v54, %v4755_v51 }
0x191c   :  { %8538 = vmatmul.mubr.msk.f32.vlgmr.msra.gmra.mrb[56].mxu1 %vm606_vm7, %v8501_v10 }
0x191d   :  { %9070 = vmatpush3.bf16.msra.mxu1 %v9067_v22 }
0x191e   :  { %9072 = vmatprep.subr.bf16.mxu1 %v10503_v3 }
0x1920   :  { %8545 = vmatmul.mubr.msk.f32.vlgmr.msra.gmra.mrb[72].mxu0 %vm606_vm7, %v8504_v11 }
0x19ef   :  { %v8539_v6 = vpop.f32.mrb[56].mxu1 }
0x19f0   :  { %v4939_v60 = vsel %vm9859_vm15, %v8539_v6, -1e+09  ;;  %v4842_v63 = vpop.f32.mrb[57].mxu1 }
0x19f1   :  { %v4938_v24 = vsel %vm9863_vm1, %v4842_v63, -1e+09  ;;  %v4945_v1 = vsel %vm107_vm0, %v4939_v60, -inf }
0x19f2   :  { %4946 = vmax.xlane.f32.xlu1 %v4945_v1  ;;  %v4942_v4 = vsel %vm107_vm0, %v4938_v24, -inf }
0x19f3   :  { %v8546_v8 = vpop.f32.mrb[72].mxu0  ;;  %4943 = vmax.xlane.f32.xlu0 %v4942_v4 }
0x19f4   :  { %v4929_v2 = vpop.f32.mrb[73].mxu0  ;;  %v4941_v20 = vsel %vm9875_vm3, %v8546_v8, -1e+09 }
0x19f5   :  { %v4940_v62 = vsel %vm9879_vm4, %v4929_v2, -1e+09  ;;  %v4951_v12 = vsel %vm107_vm0, %v4941_v20, -inf }
0x19f6   :  { %v4948_v17 = vsel %vm107_vm0, %v4940_v62, -inf }
0x19f7   :  { %4949 = vmax.xlane.f32.xlu0 %v4948_v17 }
0x19fb   :  { %4952 = vmax.xlane.f32.xlu0 %v4951_v12 }
0x1a03   :  { %9349 = vrot.lane.b32.xlu1 %v10428_v9, %s9604_s30 }
0x1a7f   :  { %v4947_v13 = vpop.xlane.xlu1 %4946 }
0x1a80   :  { %v4955_v14 = vsub.f32 %v4939_v60, %v4947_v13  ;;  %v4944_v16 = vpop.xlane.xlu0 %4943 }
0x1a81   :  { %v4954_v26 = vsub.f32 %v4938_v24, %v4944_v16 }
0x1a82   :  { %v4960_v18 = vmul.f32 1.442695, %v4955_v14 }
0x1a83   :  { %v4958_v27 = vmul.f32 1.442695, %v4954_v26  ;;  %v9350_v15 = vpop.permute.xlu1 %9349  ;;  %v5148_v26 = vld [vmem:[%s10824_s2 + $0x190] sm:$0xff] }
0x1a84   :  { %9512 = vpow2.f32 %v4960_v18  ;;  %v4950_v42 = vpop.xlane.xlu0 %4949  ;;  %v9352_v49 = vunpack.i.h.bf16 %v9350_v15  ;;  %v9351_v7 = vunpack.i.l.bf16 %v9350_v15  ;;  %8561 = vmatprep.subr.mxu0 %v5148_v26  ;;  %v4460_v18 = vld [vmem:[%s10824_s2 + $0x188] sm:$0xff] }
0x1a85   :  { %9514 = vpow2.f32 %v4958_v27  ;;  %v4956_v43 = vsub.f32 %v4940_v62, %v4950_v42  ;;  %8562 = vmatpush3.msra.mxu0 %v5148_v26 }
0x1a86   :  { %v9075_v60 = vpack.c.bf16 %v9352_v49, %v9351_v7  ;;  %8569 = vmatprep.subr.mxu0 %v4460_v18 }
0x1a87   :  { %v4962_v28 = vmul.f32 1.442695, %v4956_v43 }
0x1a88   :  { %v4953_v29 = vpop.xlane.xlu0 %4952 }
0x1a89   :  { %9516 = vpow2.f32 %v4962_v28  ;;  %v4957_v31 = vsub.f32 %v4941_v20, %v4953_v29 }
0x1a8b   :  { %v4964_v32 = vmul.f32 1.442695, %v4957_v31 }
0x1a8d   :  { %9518 = vpow2.f32 %v4964_v32 }
0x1a8e   :  { %v9513_v5 = vpop.eup %9512 }
0x1a8f   :  { %v9515_v34 = vpop.eup %9514  ;;  %v4969_v35 = vsel %vm107_vm0, %v9513_v5, 0.0 }
0x1a90   :  { %4970 = vadd.xlane.f32.xlu0 %v4969_v35  ;;  %v4966_v36 = vsel %vm107_vm0, %v9515_v34, 0.0 }
0x1a91   :  { %4967 = vadd.xlane.f32.xlu1 %v4966_v36 }
0x1a93   :  { %v9517_v19 = vpop.eup %9516 }
0x1a94   :  { %v4972_v10 = vsel %vm107_vm0, %v9517_v19, 0.0 }
0x1a95   :  { %4973 = vadd.xlane.f32.xlu1 %v4972_v10 }
0x1a97   :  { %v9519_v50 = vpop.eup %9518 }
0x1a98   :  { %v4975_v11 = vsel %vm107_vm0, %v9519_v50, 0.0 }
0x1a99   :  { %4976 = vadd.xlane.f32.xlu0 %v4975_v11 }
0x1aa6   :  { %9359 = vrot.lane.b32.xlu1 %v10415_v30, %s9604_s30 }
0x1aaa   :  { %9364 = vrot.lane.b32.xlu1 %v10434_v25, %s9604_s30 }
0x1aae   :  { %9374 = vrot.lane.b32.xlu1 %v10450_v45, %s9604_s30 }
0x1aaf   :  { %9354 = vrot.lane.b32.xlu0 %v10438_v47, %s9604_s30 }
0x1ab3   :  { %9369 = vrot.lane.b32.xlu0 %v10446_v61, %s9604_s30 }
0x1b1d   :  { %v4971_v52 = vpop.xlane.xlu0 %4970 }
0x1b1e   :  { %9520 = vrcp.f32 %v4971_v52  ;;  %v4968_v56 = vpop.xlane.xlu1 %4967 }
0x1b1f   :  { %9522 = vrcp.f32 %v4968_v56 }
0x1b22   :  { %v4974_v57 = vpop.xlane.xlu1 %4973 }
0x1b23   :  { %9524 = vrcp.f32 %v4974_v57 }
0x1b26   :  { %v4977_v58 = vpop.xlane.xlu0 %4976  ;;  %v9360_v63 = vpop.permute.xlu1 %9359 }
0x1b27   :  { %9526 = vrcp.f32 %v4977_v58  ;;  %v9362_v17 = vunpack.i.h.bf16 %v9360_v63  ;;  %v9361_v20 = vunpack.i.l.bf16 %v9360_v63 }
0x1b28   :  { %v9521_v21 = vpop.eup %9520 }
0x1b29   :  { %v9523_v0 = vpop.eup %9522  ;;  %v4981_v54 = vmul.f32 %v9521_v21, %v9513_v5  ;;  %v9083_v13 = vpack.c.bf16 %v9362_v17, %v9361_v20 }
0x1b2a   :  { %v4979_v22 = vmul.f32 %v9523_v0, %v9515_v34  ;;  %v9355_v51 = vpop.permute.xlu0 %9354  ;;  %v9365_v12 = vpop.permute.xlu1 %9364 }
0x1b2b   :  { %v9357_v1 = vunpack.i.h.bf16 %v9355_v51  ;;  %v9356_v4 = vunpack.i.l.bf16 %v9355_v51  ;;  %v9366_v14 = vunpack.i.l.bf16 %v9365_v12 }
0x1b2c   :  { %8551 = vmatprep.mubr.msk.f32.mxu1 %vm107_vm0, %v4979_v22 }
0x1b2d   :  { %v9525_v6 = vpop.eup %9524  ;;  %8552 = vmatmul.mubr.msk.f32.vlgmr.msra.gmra.mrb[58].mxu1 %vm107_vm0, %v4981_v54  ;;  %v9079_v62 = vpack.c.bf16 %v9357_v1, %v9356_v4 }
0x1b2e   :  { %9074 = vmatpush3.bf16.msra.mxu1 %v10503_v3  ;;  %v4983_v24 = vmul.f32 %v9525_v6, %v9517_v19  ;;  %v9367_v3 = vunpack.i.h.bf16 %v9365_v12  ;;  %v9370_v27 = vpop.permute.xlu0 %9369  ;;  %v9375_v32 = vpop.permute.xlu1 %9374 }
0x1b2f   :  { %9076 = vmatprep.subr.bf16.mxu1 %v9075_v60  ;;  %v9372_v42 = vunpack.i.h.bf16 %v9370_v27  ;;  %v9371_v43 = vunpack.i.l.bf16 %v9370_v27  ;;  %v9377_v35 = vunpack.i.h.bf16 %v9375_v32  ;;  %v9376_v36 = vunpack.i.l.bf16 %v9375_v32 }
0x1b30   :  { %8558 = vmatprep.mubr.msk.f32.mxu1 %vm107_vm0, %v4983_v24  ;;  %v9087_v16 = vpack.c.bf16 %v9367_v3, %v9366_v14 }
0x1b31   :  { %v9527_v8 = vpop.eup %9526  ;;  %v9091_v31 = vpack.c.bf16 %v9372_v42, %v9371_v43  ;;  %v9095_v19 = vpack.c.bf16 %v9377_v35, %v9376_v36 }
0x1b32   :  { %v4985_v2 = vmul.f32 %v9527_v8, %v9519_v50 }
0x1b34   :  { %8559 = vmatmul.mubr.msk.f32.vlgmr.msra.gmra.mrb[60].mxu1 %vm107_vm0, %v4985_v2 }
0x1b35   :  { %9078 = vmatpush3.bf16.msra.mxu1 %v9075_v60  ;;  %8585 = vmatprep.mubr.msk.f32.mxu1 %vm257_vm6, %v10353_v37 }
0x1b36   :  { %9080 = vmatprep.subr.bf16.mxu1 %v9079_v62 }
0x1b39   :  { %9082 = vmatpush3.bf16.msra.mxu1 %v9079_v62 }
0x1b3a   :  { %9084 = vmatprep.subr.bf16.mxu1 %v9083_v13 }
0x1b3c   :  { %8586 = vmatmul.mubr.msk.f32.vlgmr.msra.gmra.mrb[62].mxu1 %vm257_vm6, %v10355_v41 }
0x1b3d   :  { %8588 = vmatprep.mubr.msk.f32.mxu1 %vm257_vm6, %v10369_v53  ;;  %9086 = vmatpush3.bf16.msra.mxu1 %v9083_v13 }
0x1b3e   :  { %9088 = vmatprep.subr.bf16.mxu1 %v9087_v16 }
0x1b40   :  { %8589 = vmatmul.mubr.msk.f32.gmra.mrb[64].mxu1 %vm257_vm6, %v10371_v55 }
0x1b41   :  { %9090 = vmatpush3.bf16.msra.mxu1 %v9087_v16  ;;  %8599 = vmatprep.mubr.msk.f32.mxu1 %vm257_vm6, %v10353_v37 }
0x1b44   :  { %8600 = vmatmul.mubr.msk.f32.vlgmr.msra.gmra.mrb[66].mxu1 %vm257_vm6, %v10355_v41 }
0x1b45   :  { %8602 = vmatprep.mubr.msk.f32.mxu1 %vm257_vm6, %v10369_v53 }
0x1b48   :  { %8603 = vmatmul.mubr.msk.f32.gmra.mrb[68].mxu1 %vm257_vm6, %v10371_v55 }
0x1c00   :  { %v8553_v28 = vpop.f32.mrb[58].mxu1 }
0x1c01   :  { %v5058_v29 = vpop.f32.mrb[59].mxu1 }
0x1c02   :  { %8563 = vmatprep.mubr.msk.f32.mxu0 %vm606_vm7, %v5058_v29 }
0x1c03   :  { %8564 = vmatmul.mubr.msk.f32.vlgmr.msra.gmra.mrb[74].mxu0 %vm606_vm7, %v8553_v28 }
0x1c04   :  { %8570 = vmatpush3.msra.mxu0 %v4460_v18 }
0x1c05   :  { %9092 = vmatprep.subr.bf16.mxu0 %v9091_v31 }
0x1c07   :  { %v8560_v5 = vpop.f32.mrb[60].mxu1 }
0x1c08   :  { %v5139_v34 = vpop.f32.mrb[61].mxu1 }
0x1c09   :  { %8566 = vmatprep.mubr.msk.f32.mxu0 %vm606_vm7, %v5139_v34 }
0x1c0a   :  { %8567 = vmatmul.mubr.msk.f32.gmra.mrb[76].mxu0 %vm606_vm7, %v8560_v5 }
0x1c0b   :  { %8571 = vmatprep.mubr.msk.f32.mxu0 %vm606_vm7, %v10487_v44 }
0x1c0e   :  { %8572 = vmatmul.mubr.msk.f32.vlgmr.msra.gmra.mrb[74].mxu0 %vm606_vm7, %v10485_v40 }
0x1c0f   :  { %v8587_v10 = vpop.f32.mrb[62].mxu1  ;;  %8574 = vmatprep.mubr.msk.f32.mxu0 %vm606_vm7, %v10491_v48  ;;  %9094 = vmatpush3.bf16.msra.mxu0 %v9091_v31 }
0x1c10   :  { %v5421_v50 = vpop.f32.mrb[63].mxu1  ;;  %9096 = vmatprep.subr.bf16.mxu0 %v9095_v19 }
0x1c11   :  { %8623 = vmatprep.mubr.msk.f32.mxu1 %vm606_vm7, %v5421_v50 }
0x1c12   :  { %8575 = vmatmul.mubr.msk.f32.gmra.mrb[76].mxu0 %vm606_vm7, %v10489_v46 }
0x1c13   :  { %v8590_v11 = vpop.f32.mrb[64].mxu1  ;;  %9098 = vmatpush3.bf16.msra.mxu0 %v9095_v19  ;;  %8613 = vmatprep.mubr.msk.f32.mxu0 %vm257_vm6, %v10353_v37 }
0x1c14   :  { %v5431_v44 = vpop.f32.mrb[65].mxu1 }
0x1c16   :  { %8614 = vmatmul.mubr.msk.f32.vlgmr.msra.gmra.mrb[78].mxu0 %vm257_vm6, %v10355_v41 }
0x1c17   :  { %v8601_v40 = vpop.f32.mrb[66].mxu1  ;;  %8616 = vmatprep.mubr.msk.f32.mxu0 %vm257_vm6, %v10369_v53 }
0x1c18   :  { %v5518_v48 = vpop.f32.mrb[67].mxu1 }
0x1c19   :  { %v9099_v15 = vpack.c.bf16 %v8601_v40, %v5518_v48 }
0x1c1a   :  { %8617 = vmatmul.mubr.msk.f32.gmra.mrb[80].mxu0 %vm257_vm6, %v10371_v55 }
0x1c1b   :  { %v8604_v52 = vpop.f32.mrb[68].mxu1  ;;  %9101 = vmatprep.subr.msk.bf16.mxu1 %vm9826_vm8, %v9099_v15  ;;  %8630 = vmatprep.mubr.msk.f32.mxu0 %vm606_vm7, %v5431_v44 }
0x1c1c   :  { %v5528_v46 = vpop.f32.mrb[69].mxu1  ;;  %9104 = vmatpush3.bf16.xpose.msk.msra.mxu1 %vm9826_vm8, %v9099_v15 }
0x1c1d   :  { %v9105_v56 = vpack.c.bf16 %v8604_v52, %v5528_v46 }
0x1c1f   :  { %9107 = vmatprep.subr.msk.bf16.mxu0 %vm9826_vm8, %v9105_v56 }
0x1c20   :  { %9110 = vmatpush3.bf16.xpose.msk.msra.mxu0 %vm9826_vm8, %v9105_v56 }
0x1c23   :  { %8624 = vmatmul.mubr.msk.f32.vlgmr.msra.gmra.mrb[70].mxu1 %vm606_vm7, %v8587_v10 }
0x1c27   :  { %8631 = vmatmul.mubr.msk.f32.vlgmr.msra.gmra.mrb[82].mxu0 %vm606_vm7, %v8590_v11 }
0x1ce9   :  { %v8615_v57 = vpop.f32.mrb[78].mxu0 }
0x1cea   :  { %v5615_v58 = vpop.f32.mrb[79].mxu0 }
0x1ceb   :  { %v9111_v21 = vpack.c.bf16 %v8615_v57, %v5615_v58 }
0x1ced   :  { %v8618_v0 = vpop.f32.mrb[80].mxu0  ;;  %9112 = vmatprep.subr.bf16.mxu1 %v9111_v21 }
0x1cee   :  { %v5625_v49 = vpop.f32.mrb[81].mxu0  ;;  %9114 = vmatpush3.bf16.msra.mxu1 %v9111_v21 }
0x1cef   :  { %v9115_v7 = vpack.c.bf16 %v8618_v0, %v5625_v49 }
0x1cf1   :  { %9116 = vmatprep.subr.bf16.mxu0 %v9115_v7 }
0x1cf2   :  { %9118 = vmatpush3.bf16.msra.mxu0 %v9115_v7 }
0x1cf6   :  { %v8625_v22 = vpop.f32.mrb[70].mxu1 }
0x1cf7   :  { %v5809_v54 = vsel %vm9859_vm15, %v8625_v22, -1e+09  ;;  %v5712_v51 = vpop.f32.mrb[71].mxu1 }
0x1cf8   :  { %v5815_v6 = vsel %vm107_vm0, %v5809_v54, -inf  ;;  %v5808_v60 = vsel %vm9863_vm1, %v5712_v51, -1e+09 }
0x1cf9   :  { %v5812_v63 = vsel %vm107_vm0, %v5808_v60, -inf  ;;  %5816 = vmax.xlane.f32.xlu1 %v5815_v6 }
0x1cfa   :  { %v8632_v24 = vpop.f32.mrb[82].mxu0  ;;  %5813 = vmax.xlane.f32.xlu0 %v5812_v63 }
0x1cfb   :  { %v5799_v1 = vpop.f32.mrb[83].mxu0  ;;  %v5811_v2 = vsel %vm9875_vm3, %v8632_v24, -1e+09 }
0x1cfc   :  { %v5810_v4 = vsel %vm9879_vm4, %v5799_v1, -1e+09  ;;  %v5821_v62 = vsel %vm107_vm0, %v5811_v2, -inf }
0x1cfd   :  { %v5818_v8 = vsel %vm107_vm0, %v5810_v4, -inf }
0x1cfe   :  { %5819 = vmax.xlane.f32.xlu0 %v5818_v8 }
0x1d02   :  { %5822 = vmax.xlane.f32.xlu0 %v5821_v62 }
0x1d86   :  { %v5817_v17 = vpop.xlane.xlu1 %5816 }
0x1d87   :  { %v5825_v20 = vsub.f32 %v5809_v54, %v5817_v17  ;;  %v5814_v12 = vpop.xlane.xlu0 %5813 }
0x1d88   :  { %v5824_v13 = vsub.f32 %v5808_v60, %v5814_v12 }
0x1d89   :  { %v5830_v3 = vmul.f32 1.442695, %v5825_v20 }
0x1d8a   :  { %v5828_v14 = vmul.f32 1.442695, %v5824_v13 }
0x1d8b   :  { %9528 = vpow2.f32 %v5830_v3  ;;  %v5820_v16 = vpop.xlane.xlu0 %5819 }
0x1d8c   :  { %9530 = vpow2.f32 %v5828_v14  ;;  %v5826_v26 = vsub.f32 %v5810_v4, %v5820_v16 }
0x1d8e   :  { %v5832_v18 = vmul.f32 1.442695, %v5826_v26 }
0x1d8f   :  { %v5823_v27 = vpop.xlane.xlu0 %5822 }
0x1d90   :  { %9532 = vpow2.f32 %v5832_v18  ;;  %v5827_v42 = vsub.f32 %v5811_v2, %v5823_v27  ;;  %v6018_v2 = vld [vmem:[%s10824_s2 + $0x198] sm:$0xff] }
0x1d91   :  { %8647 = vmatprep.subr.mxu0 %v6018_v2 }
0x1d92   :  { %v5834_v43 = vmul.f32 1.442695, %v5827_v42 }
0x1d94   :  { %9534 = vpow2.f32 %v5834_v43 }
0x1d95   :  { %v9529_v28 = vpop.eup %9528 }
0x1d96   :  { %v9531_v29 = vpop.eup %9530  ;;  %v5839_v31 = vsel %vm107_vm0, %v9529_v28, 0.0 }
0x1d97   :  { %5840 = vadd.xlane.f32.xlu0 %v5839_v31  ;;  %v5836_v32 = vsel %vm107_vm0, %v9531_v29, 0.0 }
0x1d98   :  { %5837 = vadd.xlane.f32.xlu1 %v5836_v32 }
0x1d9a   :  { %v9533_v5 = vpop.eup %9532 }
0x1d9b   :  { %v5842_v34 = vsel %vm107_vm0, %v9533_v5, 0.0 }
0x1d9c   :  { %5843 = vadd.xlane.f32.xlu1 %v5842_v34 }
0x1d9e   :  { %v9535_v35 = vpop.eup %9534 }
0x1d9f   :  { %v5845_v36 = vsel %vm107_vm0, %v9535_v35, 0.0 }
0x1da0   :  { %5846 = vadd.xlane.f32.xlu0 %v5845_v36 }
0x1dad   :  { %9379 = vrot.lane.b32.xlu1 %v10415_v30, %s9605_s10 }
0x1db1   :  { %9389 = vrot.lane.b32.xlu1 %v10428_v9, %s9605_s10 }
0x1db5   :  { %9394 = vrot.lane.b32.xlu1 %v10438_v47, %s9605_s10 }
0x1db6   :  { %9384 = vrot.lane.b32.xlu0 %v10434_v25, %s9605_s10 }
0x1db9   :  { %9404 = vrot.lane.b32.xlu1 %v10450_v45, %s9605_s10 }
0x1dba   :  { %9399 = vrot.lane.b32.xlu0 %v10446_v61, %s9605_s10 }
0x1e24   :  { %v5841_v19 = vpop.xlane.xlu0 %5840 }
0x1e25   :  { %9536 = vrcp.f32 %v5841_v19  ;;  %v5838_v10 = vpop.xlane.xlu1 %5837 }
0x1e26   :  { %9538 = vrcp.f32 %v5838_v10 }
0x1e29   :  { %v5844_v30 = vpop.xlane.xlu1 %5843 }
0x1e2a   :  { %9540 = vrcp.f32 %v5844_v30 }
0x1e2d   :  { %v9380_v50 = vpop.permute.xlu1 %9379  ;;  %v5847_v9 = vpop.xlane.xlu0 %5846 }
0x1e2e   :  { %9542 = vrcp.f32 %v5847_v9  ;;  %v9382_v1 = vunpack.i.h.bf16 %v9380_v50  ;;  %v9381_v4 = vunpack.i.l.bf16 %v9380_v50 }
0x1e2f   :  { %v9537_v11 = vpop.eup %9536 }
0x1e30   :  { %v9539_v47 = vpop.eup %9538  ;;  %v5851_v48 = vmul.f32 %v9537_v11, %v9529_v28  ;;  %v9127_v8 = vpack.c.bf16 %v9382_v1, %v9381_v4 }
0x1e31   :  { %v9390_v44 = vpop.permute.xlu1 %9389  ;;  %v5849_v40 = vmul.f32 %v9539_v47, %v9531_v29  ;;  %v9385_v25 = vpop.permute.xlu0 %9384 }
0x1e32   :  { %v9392_v15 = vunpack.i.h.bf16 %v9390_v44  ;;  %v9391_v45 = vunpack.i.l.bf16 %v9390_v44  ;;  %v9387_v62 = vunpack.i.h.bf16 %v9385_v25  ;;  %v9386_v17 = vunpack.i.l.bf16 %v9385_v25 }
0x1e33   :  { %8637 = vmatprep.mubr.msk.f32.mxu1 %vm107_vm0, %v5849_v40 }
0x1e34   :  { %v9541_v61 = vpop.eup %9540  ;;  %v9119_v52 = vpack.c.bf16 %v9392_v15, %v9391_v45  ;;  %8638 = vmatmul.mubr.msk.f32.vlgmr.msra.gmra.mrb[72].mxu1 %vm107_vm0, %v5851_v48  ;;  %v9131_v12 = vpack.c.bf16 %v9387_v62, %v9386_v17 }
0x1e35   :  { %v9395_v46 = vpop.permute.xlu1 %9394  ;;  %8663 = vmatprep.mubr.msk.f32.mxu1 %vm257_vm6, %v10353_v37  ;;  %v5853_v56 = vmul.f32 %v9541_v61, %v9533_v5  ;;  %v9400_v57 = vpop.permute.xlu0 %9399 }
0x1e36   :  { %v9397_v58 = vunpack.i.h.bf16 %v9395_v46  ;;  %v9396_v21 = vunpack.i.l.bf16 %v9395_v46  ;;  %9120 = vmatprep.subr.bf16.mxu1 %v9119_v52  ;;  %v9402_v0 = vunpack.i.h.bf16 %v9400_v57  ;;  %v9401_v49 = vunpack.i.l.bf16 %v9400_v57 }
0x1e37   :  { %8644 = vmatprep.mubr.msk.f32.mxu0 %vm107_vm0, %v5853_v56  ;;  %9122 = vmatpush3.bf16.msra.mxu1 %v9119_v52 }
0x1e38   :  { %v9543_v7 = vpop.eup %9542  ;;  %v9123_v22 = vpack.c.bf16 %v9397_v58, %v9396_v21  ;;  %v9135_v54 = vpack.c.bf16 %v9402_v0, %v9401_v49 }
0x1e39   :  { %v5855_v51 = vmul.f32 %v9543_v7, %v9535_v35  ;;  %v9405_v6 = vpop.permute.xlu1 %9404 }
0x1e3a   :  { %9124 = vmatprep.subr.bf16.mxu1 %v9123_v22  ;;  %v9407_v60 = vunpack.i.h.bf16 %v9405_v6  ;;  %v9406_v63 = vunpack.i.l.bf16 %v9405_v6 }
0x1e3b   :  { %8645 = vmatmul.mubr.msk.f32.vlgmr.msra.gmra.mrb[84].mxu0 %vm107_vm0, %v5855_v51  ;;  %9126 = vmatpush3.bf16.msra.mxu1 %v9123_v22 }
0x1e3c   :  { %v9139_v24 = vpack.c.bf16 %v9407_v60, %v9406_v63  ;;  %9136 = vmatprep.subr.bf16.mxu1 %v9135_v54  ;;  %8648 = vmatpush3.msra.mxu0 %v6018_v2 }
0x1e3d   :  { %9128 = vmatprep.subr.bf16.mxu0 %v9127_v8 }
0x1e3e   :  { %8664 = vmatmul.mubr.msk.f32.vlgmr.msra.gmra.mrb[74].mxu1 %vm257_vm6, %v10355_v41 }
0x1e3f   :  { %8666 = vmatprep.mubr.msk.f32.mxu1 %vm257_vm6, %v10369_v53  ;;  %9138 = vmatpush3.bf16.msra.mxu1 %v9135_v54 }
0x1e40   :  { %9140 = vmatprep.subr.bf16.mxu1 %v9139_v24 }
0x1e42   :  { %8667 = vmatmul.mubr.msk.f32.gmra.mrb[76].mxu1 %vm257_vm6, %v10371_v55 }
0x1e43   :  { %9142 = vmatpush3.bf16.msra.mxu1 %v9139_v24  ;;  %8691 = vmatprep.mubr.msk.f32.mxu1 %vm257_vm6, %v10353_v37 }
0x1e46   :  { %8692 = vmatmul.mubr.msk.f32.vlgmr.msra.gmra.mrb[78].mxu1 %vm257_vm6, %v10355_v41 }
0x1e47   :  { %8694 = vmatprep.mubr.msk.f32.mxu1 %vm257_vm6, %v10369_v53 }
0x1e4a   :  { %8695 = vmatmul.mubr.msk.f32.gmra.mrb[80].mxu1 %vm257_vm6, %v10371_v55 }
0x1f07   :  { %v8639_v20 = vpop.f32.mrb[72].mxu1 }
0x1f08   :  { %v5928_v13 = vpop.f32.mrb[73].mxu1 }
0x1f09   :  { %8649 = vmatprep.mubr.msk.f32.mxu0 %vm606_vm7, %v5928_v13 }
0x1f0a   :  { %8650 = vmatmul.mubr.msk.f32.vlgmr.msra.gmra.mrb[74].mxu0 %vm606_vm7, %v8639_v20 }
0x1f0b   :  { %9130 = vmatpush3.bf16.msra.mxu0 %v9127_v8 }
0x1f0c   :  { %9132 = vmatprep.subr.bf16.mxu0 %v9131_v12 }
0x1f0e   :  { %v8646_v3 = vpop.f32.mrb[84].mxu0 }
0x1f0f   :  { %v6009_v14 = vpop.f32.mrb[85].mxu0  ;;  %9134 = vmatpush3.bf16.msra.mxu0 %v9131_v12 }
0x1f10   :  { %8652 = vmatprep.mubr.msk.f32.mxu0 %vm606_vm7, %v6009_v14 }
0x1f11   :  { %8653 = vmatmul.mubr.msk.f32.gmra.mrb[76].mxu0 %vm606_vm7, %v8646_v3  ;;  %v8665_v16 = vpop.f32.mrb[74].mxu1 }
0x1f12   :  { %v6198_v26 = vpop.f32.mrb[75].mxu1  ;;  %8677 = vmatprep.mubr.msk.f32.mxu0 %vm257_vm6, %v10353_v37 }
0x1f15   :  { %v8668_v18 = vpop.f32.mrb[76].mxu1  ;;  %8678 = vmatmul.mubr.msk.f32.vlgmr.msra.gmra.mrb[86].mxu0 %vm257_vm6, %v10355_v41 }
0x1f16   :  { %v6208_v27 = vpop.f32.mrb[77].mxu1  ;;  %8680 = vmatprep.mubr.msk.f32.mxu0 %vm257_vm6, %v10369_v53 }
0x1f17   :  { %8708 = vmatprep.mubr.msk.f32.mxu1 %vm606_vm7, %v6208_v27 }
0x1f19   :  { %8681 = vmatmul.mubr.msk.f32.gmra.mrb[88].mxu0 %vm257_vm6, %v10371_v55  ;;  %v8693_v42 = vpop.f32.mrb[78].mxu1 }
0x1f1a   :  { %v6392_v43 = vpop.f32.mrb[79].mxu1  ;;  %8701 = vmatprep.mubr.msk.f32.mxu0 %vm606_vm7, %v6198_v26 }
0x1f1b   :  { %v9155_v28 = vpack.c.bf16 %v8693_v42, %v6392_v43 }
0x1f1d   :  { %v8696_v29 = vpop.f32.mrb[80].mxu1 }
0x1f1e   :  { %v6402_v31 = vpop.f32.mrb[81].mxu1 }
0x1f1f   :  { %v9159_v32 = vpack.c.bf16 %v8696_v29, %v6402_v31 }
0x1fe8   :  { %v8679_v5 = vpop.f32.mrb[86].mxu0 }
0x1fe9   :  { %v6295_v34 = vpop.f32.mrb[87].mxu0 }
0x1fea   :  { %v9143_v35 = vpack.c.bf16 %v8679_v5, %v6295_v34 }
0x1fec   :  { %v8682_v36 = vpop.f32.mrb[88].mxu0  ;;  %9145 = vmatprep.subr.msk.bf16.mxu0 %vm9826_vm8, %v9143_v35 }
0x1fed   :  { %v6305_v19 = vpop.f32.mrb[89].mxu0  ;;  %9148 = vmatpush3.bf16.xpose.msk.msra.mxu0 %vm9826_vm8, %v9143_v35 }
0x1fee   :  { %v9149_v10 = vpack.c.bf16 %v8682_v36, %v6305_v19  ;;  %9156 = vmatprep.subr.bf16.mxu0 %v9155_v28 }
0x1ff0   :  { %9151 = vmatprep.subr.msk.bf16.mxu1 %vm9826_vm8, %v9149_v10 }
0x1ff1   :  { %9154 = vmatpush3.bf16.xpose.msk.msra.mxu1 %vm9826_vm8, %v9149_v10 }
0x1ff2   :  { %9160 = vmatprep.subr.bf16.mxu1 %v9159_v32 }
0x1ff4   :  { %8702 = vmatmul.mubr.msk.f32.vlgmr.msra.gmra.mrb[90].mxu0 %vm606_vm7, %v8665_v16  ;;  %v6795_v16 = vld [vmem:[%s10824_s2 + $0x1a0] sm:$0xff] }
0x1ff5   :  { %9158 = vmatpush3.bf16.msra.mxu0 %v9155_v28 }
0x1ff6   :  { %8725 = vmatprep.subr.mxu0 %v6795_v16 }
0x1ff8   :  { %8709 = vmatmul.mubr.msk.f32.vlgmr.msra.gmra.mrb[82].mxu1 %vm606_vm7, %v8668_v18 }
0x1ff9   :  { %9162 = vmatpush3.bf16.msra.mxu1 %v9159_v32 }
0x20c7   :  { %v8703_v30 = vpop.f32.mrb[90].mxu0 }
0x20c8   :  { %v6586_v50 = vsel %vm9859_vm15, %v8703_v30, -1e+09  ;;  %v6489_v9 = vpop.f32.mrb[91].mxu0 }
0x20c9   :  { %v6592_v11 = vsel %vm107_vm0, %v6586_v50, -inf  ;;  %v6585_v47 = vsel %vm9863_vm1, %v6489_v9, -1e+09 }
0x20ca   :  { %v6589_v59 = vsel %vm107_vm0, %v6585_v47, -inf  ;;  %6593 = vmax.xlane.f32.xlu1 %v6592_v11 }
0x20cb   :  { %v8710_v44 = vpop.f32.mrb[82].mxu1  ;;  %6590 = vmax.xlane.f32.xlu0 %v6589_v59 }
0x20cc   :  { %v6576_v40 = vpop.f32.mrb[83].mxu1  ;;  %v6588_v33 = vsel %vm9875_vm3, %v8710_v44, -1e+09 }
0x20cd   :  { %v6587_v25 = vsel %vm9879_vm4, %v6576_v40, -1e+09  ;;  %v6598_v15 = vsel %vm107_vm0, %v6588_v33, -inf }
0x20ce   :  { %v6595_v48 = vsel %vm107_vm0, %v6587_v25, -inf }
0x20cf   :  { %6596 = vmax.xlane.f32.xlu0 %v6595_v48 }
0x20d3   :  { %6599 = vmax.xlane.f32.xlu0 %v6598_v15 }
0x2157   :  { %v6594_v23 = vpop.xlane.xlu1 %6593 }
0x2158   :  { %v6602_v45 = vsub.f32 %v6586_v50, %v6594_v23  ;;  %v6591_v61 = vpop.xlane.xlu0 %6590 }
0x2159   :  { %v6601_v52 = vsub.f32 %v6585_v47, %v6591_v61 }
0x215a   :  { %v6607_v46 = vmul.f32 1.442695, %v6602_v45 }
0x215b   :  { %v6605_v56 = vmul.f32 1.442695, %v6601_v52 }
0x215c   :  { %9544 = vpow2.f32 %v6607_v46  ;;  %v6597_v57 = vpop.xlane.xlu0 %6596 }
0x215d   :  { %9546 = vpow2.f32 %v6605_v56  ;;  %v6603_v39 = vsub.f32 %v6587_v25, %v6597_v57  ;;  %v6971_v56 = vld [vmem:[%s10825_s3 + $0x28] sm:$0xff]  ;;  %v6972_v57 = vld [vmem:[%s10825_s3 + $0x30] sm:$0xff] }
0x215f   :  { %v6609_v58 = vmul.f32 1.442695, %v6603_v39  ;;  %v9163_v39 = vpack.c.bf16 %v6972_v57, %v6971_v56 }
0x2160   :  { %v6600_v21 = vpop.xlane.xlu0 %6599 }
0x2161   :  { %9548 = vpow2.f32 %v6609_v58  ;;  %v6604_v0 = vsub.f32 %v6588_v33, %v6600_v21  ;;  %9164 = vmatprep.subr.bf16.mxu1 %v9163_v39  ;;  %v6973_v58 = vld [vmem:[%s10825_s3 + $0x38] sm:$0xff]  ;;  %v6974_v21 = vld [vmem:[%s10825_s3 + $0x40] sm:$0xff] }
0x2163   :  { %v6611_v38 = vmul.f32 1.442695, %v6604_v0  ;;  %v9167_v0 = vpack.c.bf16 %v6974_v21, %v6973_v58 }
0x2165   :  { %9550 = vpow2.f32 %v6611_v38  ;;  %v7081_v38 = vld [vmem:[%s10824_s2 + $0x1b0] sm:$0xff] }
0x2166   :  { %v9545_v49 = vpop.eup %9544 }
0x2167   :  { %v9547_v7 = vpop.eup %9546  ;;  %v6616_v22 = vsel %vm107_vm0, %v9545_v49, 0.0 }
0x2168   :  { %6617 = vadd.xlane.f32.xlu0 %v6616_v22  ;;  %v6613_v54 = vsel %vm107_vm0, %v9547_v7, 0.0 }
0x2169   :  { %6614 = vadd.xlane.f32.xlu1 %v6613_v54  ;;  %v7084_v54 = vld [vmem:[%s10824_s2 + $0x1c8] sm:$0xff] }
0x216b   :  { %v9549_v51 = vpop.eup %9548 }
0x216c   :  { %v6619_v6 = vsel %vm107_vm0, %v9549_v51, 0.0 }
0x216d   :  { %6620 = vadd.xlane.f32.xlu1 %v6619_v6  ;;  %v7085_v6 = vld [vmem:[%s10824_s2 + $0x1d0] sm:$0xff] }
0x216f   :  { %v9551_v60 = vpop.eup %9550 }
0x2170   :  { %v6622_v63 = vsel %vm107_vm0, %v9551_v60, 0.0 }
0x2171   :  { %6623 = vadd.xlane.f32.xlu0 %v6622_v63 }
0x21f5   :  { %v6618_v24 = vpop.xlane.xlu0 %6617 }
0x21f6   :  { %9552 = vrcp.f32 %v6618_v24  ;;  %v6615_v1 = vpop.xlane.xlu1 %6614 }
0x21f7   :  { %9554 = vrcp.f32 %v6615_v1 }
0x21fa   :  { %v6621_v4 = vpop.xlane.xlu1 %6620 }
0x21fb   :  { %9556 = vrcp.f32 %v6621_v4 }
0x21fe   :  { %v6624_v8 = vpop.xlane.xlu0 %6623 }
0x21ff   :  { %9558 = vrcp.f32 %v6624_v8 }
0x2200   :  { %v9553_v2 = vpop.eup %9552 }
0x2201   :  { %v9555_v62 = vpop.eup %9554  ;;  %v6628_v20 = vmul.f32 %v9553_v2, %v9545_v49  ;;  %v7082_v49 = vld [vmem:[%s10824_s2 + $0x1b8] sm:$0xff] }
0x2202   :  { %v6626_v17 = vmul.f32 %v9555_v62, %v9547_v7  ;;  %v7083_v7 = vld [vmem:[%s10824_s2 + $0x1c0] sm:$0xff]  ;;  %v9171_v22 = vpack.c.bf16 %v7082_v49, %v7081_v38 }
0x2204   :  { %8715 = vmatprep.mubr.msk.f32.mxu0 %vm107_vm0, %v6626_v17 }
0x2205   :  { %v9557_v12 = vpop.eup %9556  ;;  %8716 = vmatmul.mubr.msk.f32.vlgmr.msra.gmra.mrb[92].mxu0 %vm107_vm0, %v6628_v20 }
0x2206   :  { %v6630_v13 = vmul.f32 %v9557_v12, %v9549_v51  ;;  %8726 = vmatpush3.msra.mxu0 %v6795_v16  ;;  %v9175_v51 = vpack.c.bf16 %v7084_v54, %v7083_v7 }
0x2207   :  { %9172 = vmatprep.subr.bf16.mxu0 %v9171_v22 }
0x2208   :  { %8722 = vmatprep.mubr.msk.f32.mxu1 %vm107_vm0, %v6630_v13 }
0x2209   :  { %v9559_v3 = vpop.eup %9558 }
0x220a   :  { %v6632_v14 = vmul.f32 %v9559_v3, %v9551_v60  ;;  %v7086_v60 = vld [vmem:[%s10824_s2 + $0x1d8] sm:$0xff] }
0x220b   :  { %v9179_v63 = vpack.c.bf16 %v7086_v60, %v7085_v6 }
0x220c   :  { %8723 = vmatmul.mubr.msk.f32.vlgmr.msra.gmra.mrb[84].mxu1 %vm107_vm0, %v6632_v14 }
0x220d   :  { %9166 = vmatpush3.bf16.msra.mxu1 %v9163_v39 }
0x220e   :  { %9168 = vmatprep.subr.bf16.mxu1 %v9167_v0 }
0x2211   :  { %9170 = vmatpush3.bf16.msra.mxu1 %v9167_v0 }
0x22d8   :  { %v8717_v26 = vpop.f32.mrb[92].mxu0 }
0x22d9   :  { %v6705_v18 = vpop.f32.mrb[93].mxu0 }
0x22da   :  { %8727 = vmatprep.mubr.msk.f32.mxu0 %vm606_vm7, %v6705_v18 }
0x22db   :  { %8728 = vmatmul.mubr.msk.f32.vlgmr.msra.gmra.mrb[74].mxu0 %vm606_vm7, %v8717_v26  ;;  %v7631_v26 = vld [vmem:[%s10824_s2 + $0x1a8] ss:$0 sm:$0xff] }
0x22dc   :  { %9174 = vmatpush3.bf16.msra.mxu0 %v9171_v22 }
0x22dd   :  { %9176 = vmatprep.subr.bf16.mxu0 %v9175_v51 }
0x22df   :  { %v8724_v27 = vpop.f32.mrb[84].mxu1 }
0x22e0   :  { %v6786_v42 = vpop.f32.mrb[85].mxu1  ;;  %9178 = vmatpush3.bf16.msra.mxu0 %v9175_v51 }
0x22e1   :  { %8730 = vmatprep.mubr.msk.f32.mxu0 %vm606_vm7, %v6786_v42  ;;  %9180 = vmatprep.subr.bf16.mxu0 %v9179_v63 }
0x22e2   :  { %8731 = vmatmul.mubr.msk.f32.gmra.mrb[76].mxu0 %vm606_vm7, %v8724_v27 }
0x22e4   :  { %9182 = vmatpush3.bf16.msra.mxu0 %v9179_v63 }
0x23ae   :  { %v8729_v43 = vpop.f32.mrb[74].mxu0 }
0x23af   :  { %v6898_v28 = vadd.f32 %v8729_v43, %v10355_v41  ;;  %v6874_v29 = vpop.f32.mrb[75].mxu0  ;;  %v7632_v43 = vld [vmem:[%s10824_s2 + $0x1a9] ss:$0 sm:$0xff] }
0x23b0   :  { %v6897_v31 = vadd.f32 %v6874_v29, %v10353_v37 }
0x23b1   :  { %v6906_v32 = vsel %vm257_vm6, %v6898_v28, 0.0 }
0x23b2   :  { %6907 = vadd.xlane.f32.xlu0 %v6906_v32  ;;  %v6903_v5 = vsel %vm257_vm6, %v6897_v31, 0.0 }
0x23b3   :  { %6904 = vadd.xlane.f32.xlu1 %v6903_v5 }
0x23b5   :  { %v8732_v34 = vpop.f32.mrb[76].mxu0 }
0x23b6   :  { %v6900_v35 = vadd.f32 %v8732_v34, %v10371_v55  ;;  %v6884_v36 = vpop.f32.mrb[77].mxu0 }
0x23b7   :  { %v6899_v19 = vadd.f32 %v6884_v36, %v10369_v53 }
0x23b8   :  { %v6912_v10 = vsel %vm257_vm6, %v6900_v35, 0.0 }
0x23b9   :  { %6913 = vadd.xlane.f32.xlu0 %v6912_v10  ;;  %v6909_v41 = vsel %vm257_vm6, %v6899_v19, 0.0 }
0x23ba   :  { %6910 = vadd.xlane.f32.xlu1 %v6909_v41 }
0x243f   :  { %v6908_v30 = vpop.xlane.xlu0 %6907 }
0x2440   :  { %v6916_v37 = vmul.f32 0.03125, %v6908_v30  ;;  %v6905_v50 = vpop.xlane.xlu1 %6904 }
0x2441   :  { %v6915_v9 = vmul.f32 0.03125, %v6905_v50  ;;  %v7088_v50 = vld [vmem:[%s10824_s2 + $0x1e8] sm:$0xff] }
0x2442   :  { %v10705_v11 = vsub.f32 %v6898_v28, %v6916_v37  ;;  %v7087_v37 = vld [vmem:[%s10824_s2 + $0x1e0] sm:$0xff] }
0x2443   :  { %v10707_v47 = vsub.f32 %v6897_v31, %v6915_v9  ;;  %v9183_v9 = vpack.c.bf16 %v7088_v50, %v7087_v37 }
0x2444   :  { %v6924_v55 = vmul.f32 %v10705_v11, %v10705_v11 }
0x2445   :  { %v6923_v53 = vmul.f32 %v10707_v47, %v10707_v47  ;;  %9184 = vmatprep.subr.bf16.mxu0 %v9183_v9 }
0x2446   :  { %v6914_v59 = vpop.xlane.xlu0 %6913  ;;  %v6930_v44 = vsel %vm257_vm6, %v6924_v55, 0.0  ;;  %9186 = vmatpush3.bf16.msra.mxu0 %v9183_v9 }
0x2447   :  { %v6918_v40 = vmul.f32 0.03125, %v6914_v59  ;;  %v6911_v25 = vpop.xlane.xlu1 %6910  ;;  %6931 = vadd.xlane.f32.xlu0 %v6930_v44  ;;  %v6927_v48 = vsel %vm257_vm6, %v6923_v53, 0.0 }
0x2448   :  { %v6917_v33 = vmul.f32 0.03125, %v6911_v25  ;;  %6928 = vadd.xlane.f32.xlu1 %v6927_v48 }
0x2449   :  { %v6922_v15 = vsub.f32 %v6900_v35, %v6918_v40 }
0x244a   :  { %v10715_v23 = vsub.f32 %v6899_v19, %v6917_v33 }
0x244b   :  { %v6926_v45 = vmul.f32 %v6922_v15, %v6922_v15 }
0x244c   :  { %v6925_v61 = vmul.f32 %v10715_v23, %v10715_v23 }
0x244d   :  { %v6936_v52 = vsel %vm257_vm6, %v6926_v45, 0.0 }
0x244e   :  { %6937 = vadd.xlane.f32.xlu0 %v6936_v52  ;;  %v6933_v46 = vsel %vm257_vm6, %v6925_v61, 0.0  ;;  %v7638_v61 = vld [vmem:[%s10824_s2 + $0x1f0] ss:$0 sm:$0xff] }
0x244f   :  { %6934 = vadd.xlane.f32.xlu1 %v6933_v46 }
0x24d4   :  { %v6932_v24 = vpop.xlane.xlu0 %6931 }
0x24d5   :  { %v6940_v1 = vmul.f32 0.03125, %v6932_v24  ;;  %v6929_v4 = vpop.xlane.xlu1 %6928 }
0x24d6   :  { %v6939_v8 = vmul.f32 0.03125, %v6929_v4 }
0x24d7   :  { %v6944_v2 = vadd.f32 1e-06, %v6940_v1 }
0x24d8   :  { %v6943_v62 = vadd.f32 1e-06, %v6939_v8 }
0x24d9   :  { %9560 = vrsqrt.f32 %v6944_v2 }
0x24da   :  { %9562 = vrsqrt.f32 %v6943_v62 }
0x24db   :  { %v6938_v17 = vpop.xlane.xlu0 %6937 }
0x24dc   :  { %v6942_v20 = vmul.f32 0.03125, %v6938_v17  ;;  %v6935_v12 = vpop.xlane.xlu1 %6934 }
0x24dd   :  { %v6941_v13 = vmul.f32 0.03125, %v6935_v12 }
0x24de   :  { %v6946_v3 = vadd.f32 1e-06, %v6942_v20 }
0x24df   :  { %v6945_v14 = vadd.f32 1e-06, %v6941_v13 }
0x24e0   :  { %9564 = vrsqrt.f32 %v6946_v3 }
0x24e1   :  { %9566 = vrsqrt.f32 %v6945_v14 }
0x24e3   :  { %v9561_v16 = vpop.eup %9560 }
0x24e4   :  { %v9563_v18 = vpop.eup %9562  ;;  %v6952_v27 = vmul.f32 %v9561_v16, %v10705_v11  ;;  %v7633_v11 = vld [vmem:[%s10825_s3 + $0x48] ss:$0 sm:$0xff] }
0x24e5   :  { %v6951_v42 = vmul.f32 %v9563_v18, %v10707_v47 }
0x24e6   :  { %v6960_v28 = vmul.f32 %v7631_v26, %v6952_v27 }
0x24e7   :  { %v6959_v29 = vmul.f32 %v7631_v26, %v6951_v42 }
0x24e8   :  { %v6968_v5 = vadd.f32 %v7632_v43, %v6960_v28 }
0x24e9   :  { %v6967_v31 = vadd.f32 %v7632_v43, %v6959_v29  ;;  %v7265_v29 = vld [vmem:[%s10826_s4] sm:$0xff] }
0x24ea   :  { %v9565_v32 = vpop.eup %9564 }
0x24eb   :  { %v9567_v34 = vpop.eup %9566  ;;  %8741 = vmatprep.mubr.msk.f32.mxu1 %vm257_vm6, %v6967_v31  ;;  %v6954_v35 = vmul.f32 %v9565_v32, %v6922_v15 }
0x24ec   :  { %8742 = vmatmul.mubr.msk.f32.vlgmr.msra.gmra.mrb[86].mxu1 %vm257_vm6, %v6968_v5  ;;  %v6953_v36 = vmul.f32 %v9567_v34, %v10715_v23  ;;  %v7268_v34 = vld [vmem:[%s10826_s4 + $0x18] sm:$0xff] }
0x24ed   :  { %v6962_v19 = vmul.f32 %v7631_v26, %v6954_v35 }
0x24ee   :  { %v6961_v10 = vmul.f32 %v7631_v26, %v6953_v36 }
0x24ef   :  { %v6970_v30 = vadd.f32 %v7632_v43, %v6962_v19 }
0x24f0   :  { %v6969_v41 = vadd.f32 %v7632_v43, %v6961_v10 }
0x24f2   :  { %8744 = vmatprep.mubr.msk.f32.mxu1 %vm257_vm6, %v6969_v41 }
0x24f3   :  { %8745 = vmatmul.mubr.msk.f32.gmra.mrb[88].mxu1 %vm257_vm6, %v6970_v30 }
0x25bf   :  { %v8743_v47 = vpop.f32.mrb[86].mxu1 }
0x25c0   :  { %v7064_v55 = vadd.f32 %v8743_v47, %v7633_v11  ;;  %v7058_v53 = vpop.f32.mrb[87].mxu1 }
0x25c1   :  { %v7059_v59 = vadd.f32 %v7633_v11, %v7058_v53 }
0x25c2   :  { %v7078_v40 = vmax.f32 %v7064_v55, 0.0 }
0x25c3   :  { %v7077_v44 = vmax.f32 %v7059_v59, 0.0 }
0x25c5   :  { %8763 = vmatprep.mubr.msk.f32.mxu0 %vm3625_vm5, %v7077_v44  ;;  %v7643_v44 = vld [vmem:[%s10824_s2 + $0x1aa] ss:$0 sm:$0xff] }
0x25c6   :  { %v8746_v25 = vpop.f32.mrb[88].mxu1  ;;  %8764 = vmatmul.mubr.msk.f32.vlgmr.msra.gmra.mrb[94].mxu0 %vm3625_vm5, %v7078_v40 }
0x25c7   :  { %v7074_v48 = vadd.f32 %v8746_v25, %v7633_v11  ;;  %v7068_v33 = vpop.f32.mrb[89].mxu1 }
0x25c8   :  { %v7069_v15 = vadd.f32 %v7633_v11, %v7068_v33  ;;  %v7644_v33 = vld [vmem:[%s10824_s2 + $0x1ab] ss:$0 sm:$0xff]  ;;  %s9606_s2 = smov [#allocation2]  }
0x25c9   :  { %v7080_v45 = vmax.f32 %v7074_v48, 0.0  ;;  %s7375_s23 = sshll.u32 %s9606_s2, 4  ;;  %s7376_s23 = int_to_ptr.vmem [resolvable:$true] %s7375_s23 }
0x25ca   :  { %v7079_v23 = vmax.f32 %v7069_v15, 0.0  ;;  %s9576_s0 = scalar_lea.vmem %s7376_s23, 512  ;;  %p9581_p1 = scmp.lt.s32.totalorder %s7376_s23, %s7376_s23 }
0x25cb   :  { %p9577_p0 = scmp.ne.s32.totalorder %s7376_s23, %s9576_s0  ;;  %p9582_p2 = scmp.lt.s32.totalorder %s9576_s0, %s9576_s0 }
0x25cc   :  { %8766 = vmatprep.mubr.msk.f32.mxu0 %vm3625_vm5, %v7079_v23 }
0x25cd   :  { %8767 = vmatmul.mubr.msk.f32.gmra.mrb[96].mxu0 %vm3625_vm5, %v7080_v45  ;;  %p9583_p3 = por %p9582_p2, %p9581_p1 }
0x25cf   :  { %p9584_p4 = pnand %p9583_p3, %p9577_p0 }
0x2699   :  { %v8765_v52 = vpop.f32.mrb[94].mxu0 }
0x269a   :  { %v7178_v46 = vadd.f32 %v8765_v52, %v7638_v61  ;;  %v7172_v56 = vpop.f32.mrb[95].mxu0 }
0x269b   :  { %v7173_v57 = vadd.f32 %v7638_v61, %v7172_v56 }
0x269c   :  { %v7192_v39 = vadd.f32 %v7178_v46, %v6968_v5  ;;  %v7267_v5 = vld [vmem:[%s10826_s4 + $0x10] sm:$0xff] }
0x269d   :  { %v7191_v58 = vadd.f32 %v7173_v57, %v6967_v31  ;;  %v7266_v31 = vld [vmem:[%s10826_s4 + $0x8] sm:$0xff]  ;;  %v9191_v35 = vpack.c.bf16 %v7268_v34, %v7267_v5 }
0x269e   :  { %v7200_v21 = vsel %vm257_vm6, %v7192_v39, 0.0  ;;  %v9187_v32 = vpack.c.bf16 %v7266_v31, %v7265_v29 }
0x269f   :  { %7201 = vadd.xlane.f32.xlu0 %v7200_v21  ;;  %v7197_v0 = vsel %vm257_vm6, %v7191_v58, 0.0 }
0x26a0   :  { %7198 = vadd.xlane.f32.xlu1 %v7197_v0  ;;  %v8768_v38 = vpop.f32.mrb[96].mxu0  ;;  %9188 = vmatprep.subr.bf16.mxu1 %v9187_v32 }
0x26a1   :  { %v7188_v49 = vadd.f32 %v8768_v38, %v7638_v61  ;;  %v7182_v7 = vpop.f32.mrb[97].mxu0  ;;  %9190 = vmatpush3.bf16.msra.mxu1 %v9187_v32 }
0x26a2   :  { %v7183_v22 = vadd.f32 %v7638_v61, %v7182_v7  ;;  %9192 = vmatprep.subr.bf16.mxu1 %v9191_v35 }
0x26a3   :  { %v7194_v54 = vadd.f32 %v7188_v49, %v6970_v30 }
0x26a4   :  { %v7193_v51 = vadd.f32 %v7183_v22, %v6969_v41 }
0x26a5   :  { %v7206_v6 = vsel %vm257_vm6, %v7194_v54, 0.0  ;;  %9194 = vmatpush3.bf16.msra.mxu1 %v9191_v35 }
0x26a6   :  { %7207 = vadd.xlane.f32.xlu0 %v7206_v6  ;;  %v7203_v60 = vsel %vm257_vm6, %v7193_v51, 0.0 }
0x26a7   :  { %7204 = vadd.xlane.f32.xlu1 %v7203_v60 }
0x272c   :  { %v7202_v63 = vpop.xlane.xlu0 %7201 }
0x272d   :  { %v7210_v24 = vmul.f32 0.03125, %v7202_v63  ;;  %v7199_v1 = vpop.xlane.xlu1 %7198 }
0x272e   :  { %v7209_v4 = vmul.f32 0.03125, %v7199_v1 }
0x272f   :  { %v7214_v8 = vsub.f32 %v7192_v39, %v7210_v24 }
0x2730   :  { %v7213_v2 = vsub.f32 %v7191_v58, %v7209_v4 }
0x2731   :  { %v7218_v62 = vmul.f32 %v7214_v8, %v7214_v8 }
0x2732   :  { %v7217_v17 = vmul.f32 %v7213_v2, %v7213_v2 }
0x2733   :  { %v7208_v20 = vpop.xlane.xlu0 %7207  ;;  %v7224_v12 = vsel %vm257_vm6, %v7218_v62, 0.0 }
0x2734   :  { %v7212_v13 = vmul.f32 0.03125, %v7208_v20  ;;  %v7205_v3 = vpop.xlane.xlu1 %7204  ;;  %7225 = vadd.xlane.f32.xlu0 %v7224_v12  ;;  %v7221_v14 = vsel %vm257_vm6, %v7217_v17, 0.0 }
0x2735   :  { %v7211_v16 = vmul.f32 0.03125, %v7205_v3  ;;  %7222 = vadd.xlane.f32.xlu1 %v7221_v14 }
0x2736   :  { %v7216_v26 = vsub.f32 %v7194_v54, %v7212_v13 }
0x2737   :  { %v7215_v18 = vsub.f32 %v7193_v51, %v7211_v16 }
0x2738   :  { %v7220_v27 = vmul.f32 %v7216_v26, %v7216_v26 }
0x2739   :  { %v7219_v42 = vmul.f32 %v7215_v18, %v7215_v18 }
0x273a   :  { %v7230_v43 = vsel %vm257_vm6, %v7220_v27, 0.0 }
0x273b   :  { %7231 = vadd.xlane.f32.xlu0 %v7230_v43  ;;  %v7227_v28 = vsel %vm257_vm6, %v7219_v42, 0.0 }
0x273c   :  { %7228 = vadd.xlane.f32.xlu1 %v7227_v28 }
0x27c1   :  { %v7226_v36 = vpop.xlane.xlu0 %7225 }
0x27c2   :  { %v7234_v19 = vmul.f32 0.03125, %v7226_v36  ;;  %v7223_v10 = vpop.xlane.xlu1 %7222 }
0x27c3   :  { %v7233_v41 = vmul.f32 0.03125, %v7223_v10 }
0x27c4   :  { %v7238_v30 = vadd.f32 1e-06, %v7234_v19 }
0x27c5   :  { %v7237_v37 = vadd.f32 1e-06, %v7233_v41 }
0x27c6   :  { %9568 = vrsqrt.f32 %v7238_v30 }
0x27c7   :  { %9570 = vrsqrt.f32 %v7237_v37 }
0x27c8   :  { %v7232_v50 = vpop.xlane.xlu0 %7231 }
0x27c9   :  { %v7236_v9 = vmul.f32 0.03125, %v7232_v50  ;;  %v7229_v11 = vpop.xlane.xlu1 %7228 }
0x27ca   :  { %v7235_v47 = vmul.f32 0.03125, %v7229_v11 }
0x27cb   :  { %v7240_v55 = vadd.f32 1e-06, %v7236_v9 }
0x27cc   :  { %v7239_v53 = vadd.f32 1e-06, %v7235_v47 }
0x27cd   :  { %9572 = vrsqrt.f32 %v7240_v55 }
0x27ce   :  { %9574 = vrsqrt.f32 %v7239_v53 }
0x27d0   :  { %v9569_v59 = vpop.eup %9568 }
0x27d1   :  { %v9571_v40 = vpop.eup %9570  ;;  %v7246_v25 = vmul.f32 %v9569_v59, %v7214_v8 }
0x27d2   :  { %v7245_v48 = vmul.f32 %v9571_v40, %v7213_v2 }
0x27d3   :  { %v7254_v15 = vmul.f32 %v7643_v44, %v7246_v25 }
0x27d4   :  { %v7253_v23 = vmul.f32 %v7643_v44, %v7245_v48 }
0x27d5   :  { %v7262_v52 = vadd.f32 %v7644_v33, %v7254_v15 }
0x27d6   :  { %v7261_v45 = vadd.f32 %v7644_v33, %v7253_v23 }
0x27d7   :  { %v9573_v61 = vpop.eup %9572 }
0x27d8   :  { %v9575_v46 = vpop.eup %9574  ;;  %8777 = vmatprep.mubr.msk.f32.mxu1 %vm257_vm6, %v7261_v45  ;;  %v7248_v56 = vmul.f32 %v9573_v61, %v7216_v26 }
0x27d9   :  { %8778 = vmatmul.mubr.msk.f32.vlgmr.msra.gmra.mrb[90].mxu1 %vm257_vm6, %v7262_v52  ;;  %v7247_v57 = vmul.f32 %v9575_v46, %v7215_v18 }
0x27da   :  { %v7256_v39 = vmul.f32 %v7643_v44, %v7248_v56 }
0x27db   :  { %v7255_v58 = vmul.f32 %v7643_v44, %v7247_v57 }
0x27dc   :  { %v7264_v0 = vadd.f32 %v7644_v33, %v7256_v39 }
0x27dd   :  { %v7263_v21 = vadd.f32 %v7644_v33, %v7255_v58 }
0x27df   :  { %8780 = vmatprep.mubr.msk.f32.mxu1 %vm257_vm6, %v7263_v21 }
0x27e0   :  { %8781 = vmatmul.mubr.msk.f32.gmra.mrb[92].mxu1 %vm257_vm6, %v7264_v0 }
0x28ac   :  { %v8779_v38 = vpop.f32.mrb[90].mxu1 }
0x28ad   :  { %7367 = vst [vmem:[#allocation2 + $0x8] sm:$0xff] %v8779_v38  ;;  %v7347_v49 = vpop.f32.mrb[91].mxu1 }
0x28ae   :  { %7366 = vst [vmem:[#allocation2] sm:$0xff] %v7347_v49 }
0x28b3   :  { %v8782_v7 = vpop.f32.mrb[92].mxu1 }
0x28b4   :  { %7369 = vst [vmem:[#allocation2 + $0x18] sm:$0xff] %v8782_v7  ;;  %v7357_v22 = vpop.f32.mrb[93].mxu1 }
0x28b5   :  { %7368 = vst [vmem:[#allocation2 + $0x10] sm:$0xff] %v7357_v22 }
0x28b6   :  { %9587 = shalt.err (!%p9584_p4)
}
0x28b7   :  { %s9588_s29 = scalar_lea.hbm %s10827_s5, 512 }
0x28b8   :  { %p9589_p5 = scmp.ne.s32.totalorder %s10827_s5, %s9588_s29  ;;  %p9592_p6 = scmp.lt.u32.totalorder %s9588_s29, %s10827_s5 }
0x28ba   :  { %p9594_p7 = pnand %p9592_p6, %p9589_p5 }
0x28bc   :  { %9597 = shalt.err (!%p9594_p7)
}
0x28bd   :  { %s9607_s28 = smov 128   ;;  %s9608_s1 = smov 8  }
0x28be   :  { %7381 = dma.vmem_to_hbm [thread:$0]  %s7376_s23, 512, %s10827_s5, [#allocation3], %s9607_s28, %s9607_s28, %s9608_s1  }
0x28bf   :  { %9598 = dma.done.wait [#allocation3], 512  }
0x28c0   :  { %9599 = vsyncadd [#allocation3], 4294966784 }
0x28c1   :  { %7385 = vsyncpa [#allocation3], 1 }

</bundles_post_ra>
